<compile_context>
chip_gen: v7x
topology: tpu7x:2x2x1
jax: 0.10.0
libtpu: 0.0.40
codegen_flags: <defaults>
</compile_context>

<pallas_src>
import functools

import jax
import jax.numpy as jnp
from jax import lax
from jax.experimental import pallas as pl
from jax.experimental.pallas import tpu as pltpu


def _spatial_attn_kernel(w_ref, x_ref, o_ref, sum_ref, max_ref, pad_ref, *,
                         C, TB, TC, H, W, K, PAD, CHUNK, NSUB):
    # w_ref  : (2*K*K,) f32 SMEM    flattened conv weight, layout [cin, kh, kw]
    # x_ref  : (TB, TC, H*W) VMEM   one (batch-tile, channel-tile) block of x
    # o_ref  : (TB, 1, H, W) VMEM   output block (written at the last k step)
    # sum_ref: (TB, H*W) f32 VMEM   running channel sum (lane-dense)
    # max_ref: (TB, H*W) f32 VMEM   running channel max (lane-dense)
    # pad_ref: (TB, 2, H+2*PAD, W+2*PAD) f32 VMEM zero-padded avg/max maps
    k = pl.program_id(1)
    nk = pl.num_programs(1)
    HP = H + 2 * PAD
    WP = W + 2 * PAD

    @pl.when(k == 0)
    def _init():
        sum_ref[...] = jnp.zeros_like(sum_ref)
        max_ref[...] = jnp.full(max_ref.shape, -jnp.inf, dtype=max_ref.dtype)
        # Zero only the halo border; the interior is fully overwritten in the
        # finalize step.  Per batch tile -> safe under megacore sharding.
        zrow = jnp.zeros((TB, 2, PAD, WP), jnp.float32)
        zcol = jnp.zeros((TB, 2, HP, PAD), jnp.float32)
        pad_ref[:, :, 0:PAD, 0:WP] = zrow
        pad_ref[:, :, H + PAD:HP, 0:WP] = zrow
        pad_ref[:, :, 0:HP, 0:PAD] = zcol
        pad_ref[:, :, 0:HP, W + PAD:WP] = zcol

    # ---- streamed channel reduction (sum + max fused, one pass) ------------
    if NSUB == 1:
        xs = x_ref[...]                                    # (TB, TC, HW)
        sum_ref[...] = sum_ref[...] + jnp.sum(xs.astype(jnp.float32), axis=1)
        max_ref[...] = jnp.maximum(
            max_ref[...], jnp.max(xs, axis=1).astype(jnp.float32))
    else:
        def _step(t, carry):
            s, m = carry
            off = pl.multiple_of(t * CHUNK, CHUNK)
            xs = x_ref[:, pl.ds(off, CHUNK), :]            # (TB, CHUNK, HW)
            # sum accumulates in f32; max is exact in the native dtype.
            s = s + jnp.sum(xs.astype(jnp.float32), axis=1)
            m = jnp.maximum(m, jnp.max(xs, axis=1).astype(jnp.float32))
            return s, m

        s, m = lax.fori_loop(0, NSUB, _step,
                             (sum_ref[...], max_ref[...]),
                             unroll=min(NSUB, 4))
        sum_ref[...] = s
        max_ref[...] = m

    # ---- conv + sigmoid once all channel tiles have been reduced -----------
    @pl.when(k == nk - 1)
    def _finalize():
        inv_c = 1.0 / C
        # Scatter the flat (lane-dense) accumulators back into the (H, W)
        # padded conv scratch, one image row per store (once per batch tile).
        for r in range(H):
            lo = r * W
            pad_ref[:, 0, PAD + r, PAD:PAD + W] = sum_ref[:, lo:lo + W] * inv_c
            pad_ref[:, 1, PAD + r, PAD:PAD + W] = max_ref[:, lo:lo + W]

        # KxK "same" conv on the VPU.  Each tap is loaded directly from the
        # padded scratch (rides the vector-load slots rather than XLU shifts);
        # 4 partial accumulators break the 2*K*K-long serial multiply-add chain.
        accs = [jnp.zeros((TB, H, W), jnp.float32) for _ in range(4)]
        for c in range(2):
            for i in range(K):
                a = 2 * c + (i & 1)
                for j in range(K):
                    wv = w_ref[c * K * K + i * K + j]      # scalar from SMEM
                    accs[a] = accs[a] + wv * pad_ref[:, c, i:i + H, j:j + W]
        acc = (accs[0] + accs[1]) + (accs[2] + accs[3])

        o_ref[:, 0, :, :] = jax.nn.sigmoid(acc).astype(o_ref.dtype)


def _largest_divisor_leq(n, cap):
    cap = max(1, min(n, cap))
    for d in range(cap, 0, -1):
        if n % d == 0:
            return d
    return 1


def _pick_channel_tile(C, max_elems):
    """Largest channel tile that divides C, is a multiple of 8 (sublane rule
    for the second-minor block dim) or equals C, and fits the VMEM element
    budget.  Falls back to whole-C rather than degrading to tiny tiles."""
    if C <= max_elems:
        return C
    cands = [t for t in range(8, C, 8) if C % t == 0]
    fit = [t for t in cands if t <= max_elems]
    if fit:
        return max(fit)
    if cands:
        return min(cands)       # smallest legal partial tile (over budget)
    return C                    # no legal partial tile; take the whole axis


def spatial_attention(x, weight, kernel_size=7):
    """x: (B, C, H, W), weight: (1, 2, K, K) f32.  Returns (B, 1, H, W)."""
    assert kernel_size in (3, 7), "kernel size must be 3 or 7"
    pad = 3 if kernel_size == 7 else 1
    B, C, H, W = x.shape
    K = kernel_size
    assert weight.shape == (1, 2, K, K)

    HW = H * W
    HP, WP = H + 2 * pad, W + 2 * pad
    itemsize = jnp.dtype(x.dtype).itemsize

    # Per-generation VMEM budget (v7x: 64 MiB/TC; v5e/v6e: 128 MiB).
    try:
        vmem_cap = int(pltpu.get_tpu_info().vmem_capacity_bytes)
    except Exception:
        vmem_cap = 64 << 20          # conservative (v7x-sized) fallback
    block_budget = (12 << 20) if vmem_cap <= (64 << 20) else (16 << 20)

    # Batch tile: enough per-step work to amortize ~0.35us grid overhead, but
    # always >= 2 batch-grid steps when B >= 2 (v7x megacore utilization).
    min_step_elems = 16 * 1024
    want_tb = max(1, min_step_elems // max(1, C * HW))
    tb_cap = max(1, B // 2) if B >= 2 else 1
    TB = _largest_divisor_leq(B, min(want_tb, tb_cap, 8))

    # Channel tile: sized purely from the VMEM byte budget (large contiguous
    # DMA blocks push the HBM-bound kernel toward roofline).
    max_tc = max(1, block_budget // (TB * HW * itemsize))
    TC = _pick_channel_tile(C, max_tc)

    # In-kernel reduction sub-chunk (multiple of 8 sublanes when possible).
    if TC % 32 == 0:
        chunk = 32
    elif TC % 16 == 0:
        chunk = 16
    elif TC % 8 == 0:
        chunk = 8
    else:
        chunk = TC
    nsub = TC // chunk

    # Explicit scoped-VMEM limit: double-buffered in/out blocks + scratch
    # plus headroom, capped below the physical per-core capacity.
    in_block = TB * TC * HW * itemsize
    out_block = TB * HW * itemsize
    scratch = 2 * TB * HW * 4 + TB * 2 * HP * WP * 4
    vmem_used = 2 * in_block + 2 * out_block + scratch
    vmem_limit = max(vmem_used + (16 << 20), 32 << 20)
    vmem_limit = min(vmem_limit, vmem_cap - (4 << 20))
    vmem_limit = max(vmem_limit, vmem_used + (1 << 20))

    w_flat = weight.reshape(-1).astype(jnp.float32)        # [cin, kh, kw]
    x_flat = x.reshape(B, C, HW)                           # lane-dense blocks

    kernel = functools.partial(
        _spatial_attn_kernel, C=C, TB=TB, TC=TC, H=H, W=W, K=K, PAD=pad,
        CHUNK=chunk, NSUB=nsub)

    cost = pl.CostEstimate(
        flops=2 * B * C * HW + 2 * (2 * K * K) * B * HW,
        transcendentals=B * HW,
        bytes_accessed=(B * C * HW + B * HW) * itemsize + w_flat.size * 4)

    return pl.pallas_call(
        kernel,
        out_shape=jax.ShapeDtypeStruct((B, 1, H, W), x.dtype),
        grid_spec=pltpu.PrefetchScalarGridSpec(
            num_scalar_prefetch=0,
            grid=(B // TB, C // TC),
            in_specs=[
                # flattened conv weights live in SMEM (scalar reads)
                pl.BlockSpec(memory_space=pltpu.MemorySpace.SMEM),
                # one lane-dense (batch-tile, channel-tile) block per step
                pl.BlockSpec((TB, TC, HW), lambda bb, k: (bb, k, 0)),
            ],
            out_specs=pl.BlockSpec((TB, 1, H, W), lambda bb, k: (bb, 0, 0, 0)),
            scratch_shapes=[
                pltpu.VMEM((TB, HW), jnp.float32),                   # run. sum
                pltpu.VMEM((TB, HW), jnp.float32),                   # run. max
                pltpu.VMEM((TB, 2, HP, WP), jnp.float32),            # pad buf
            ],
        ),
        compiler_params=pltpu.CompilerParams(
            # batch tiles are independent -> shard across TensorCores on v7x;
            # the channel axis is a sequential (accumulator) reduction.
            dimension_semantics=("parallel", "arbitrary"),
            vmem_limit_bytes=int(vmem_limit),
        ),
        cost_estimate=cost,
    )(w_flat, x_flat)


def _reference(x, weight, kernel_size=7):
    pad = 3 if kernel_size == 7 else 1
    avg = jnp.mean(x, axis=1, keepdims=True)
    mx = jnp.max(x, axis=1, keepdims=True)
    feat = jnp.concatenate([avg, mx], axis=1)
    conv = jax.lax.conv_general_dilated(
        feat, weight, window_strides=(1, 1),
        padding=((pad, pad), (pad, pad)),
        dimension_numbers=("NCHW", "OIHW", "NCHW"),
    )
    return jax.nn.sigmoid(conv)


if __name__ == "__main__":
    key = jax.random.PRNGKey(0)
    kx, kw = jax.random.split(key)

    B, C, H, W = 2, 4, 16, 16
    K = 7

    x = jax.random.normal(kx, (B, C, H, W), dtype=jnp.float32)

    # Deterministic conv weight init (PyTorch-style kaiming-uniform bound).
    fan_in = 2 * K * K
    bound = 1.0 / (fan_in ** 0.5)
    weight = jax.random.uniform(
        kw, (1, 2, K, K), dtype=jnp.float32, minval=-bound, maxval=bound)

    out = jax.block_until_ready(spatial_attention(x, weight, kernel_size=K))
    ref = jax.block_until_ready(_reference(x, weight, kernel_size=K))

    assert out.shape == (B, 1, H, W)
    assert jnp.allclose(out, ref, rtol=1e-4, atol=1e-5), "mismatch vs reference"

    print("KERNEL_OK")
</pallas_src>

<mosaic_0001>
module attributes {stable_mosaic.version = 11 : i64} {
  func.func @_spatial_attn_kernel(%arg0: i32, %arg1: i32, %arg2: memref<98xf32, #tpu.memory_space<smem>>, %arg3: memref<1x4x256xf32, #tpu.memory_space<vmem>>, %arg4: memref<1x1x16x16xf32, #tpu.memory_space<vmem>>, %arg5: memref<1x256xf32, #tpu.memory_space<vmem>>, %arg6: memref<1x256xf32, #tpu.memory_space<vmem>>, %arg7: memref<1x2x22x22xf32, #tpu.memory_space<vmem>>) attributes {dimension_semantics = [#tpu.dimension_semantics<parallel>, #tpu.dimension_semantics<arbitrary>], iteration_bounds = array<i64: 2, 1>, scalar_prefetch = 0 : i64, scratch_operands = 3 : i64, tpu.core_type = #tpu.core_type<tc>, window_params = [{transform_indices = @transform_0, window_bounds = array<i64: 98>}, {transform_indices = @transform_1, window_bounds = array<i64: 1, 4, 256>}, {transform_indices = @transform_2, window_bounds = array<i64: 1, 1, 16, 16>}]} {
    %c0_i32 = arith.constant 0 : i32
    %0 = arith.cmpi eq, %arg1, %c0_i32 : i32
    %1 = arith.extui %0 : i1 to i32
    %c0_i32_0 = arith.constant 0 : i32
    %2 = arith.cmpi ne, %1, %c0_i32_0 : i32
    scf.if %2 {
      %cst_14 = arith.constant 0.000000e+00 : f32
      %15 = vector.broadcast %cst_14 : f32 to vector<1x256xf32>
      %c0_15 = arith.constant 0 : index
      %c0_16 = arith.constant 0 : index
      %16 = vector.load %arg5[%c0_15, %c0_16] : memref<1x256xf32, #tpu.memory_space<vmem>>, vector<1x256xf32>
      tpu.vector_store %arg5[%c0_15, %c0_16], %15 {strides = array<i32>} : memref<1x256xf32, #tpu.memory_space<vmem>>, vector<1x256xf32>,
      %cst_17 = arith.constant 0xFF800000 : f32
      %17 = vector.broadcast %cst_17 : f32 to vector<1x256xf32>
      %c0_18 = arith.constant 0 : index
      %c0_19 = arith.constant 0 : index
      %18 = vector.load %arg6[%c0_18, %c0_19] : memref<1x256xf32, #tpu.memory_space<vmem>>, vector<1x256xf32>
      tpu.vector_store %arg6[%c0_18, %c0_19], %17 {strides = array<i32>} : memref<1x256xf32, #tpu.memory_space<vmem>>, vector<1x256xf32>,
      %cst_20 = arith.constant 0.000000e+00 : f32
      %19 = vector.broadcast %cst_20 : f32 to vector<1x2x3x22xf32>
      %cst_21 = arith.constant 0.000000e+00 : f32
      %20 = vector.broadcast %cst_21 : f32 to vector<1x2x22x3xf32>
      %c0_22 = arith.constant 0 : index
      %c0_23 = arith.constant 0 : index
      %c0_24 = arith.constant 0 : index
      %c0_25 = arith.constant 0 : index
      %21 = vector.load %arg7[%c0_22, %c0_23, %c0_24, %c0_25] : memref<1x2x22x22xf32, #tpu.memory_space<vmem>>, vector<1x2x3x22xf32>
      tpu.vector_store %arg7[%c0_22, %c0_23, %c0_24, %c0_25], %19 {strides = array<i32>} : memref<1x2x22x22xf32, #tpu.memory_space<vmem>>, vector<1x2x3x22xf32>,
      %c0_26 = arith.constant 0 : index
      %c0_27 = arith.constant 0 : index
      %c19 = arith.constant 19 : index
      %c0_28 = arith.constant 0 : index
      %22 = vector.load %arg7[%c0_26, %c0_27, %c19, %c0_28] : memref<1x2x22x22xf32, #tpu.memory_space<vmem>>, vector<1x2x3x22xf32>
      tpu.vector_store %arg7[%c0_26, %c0_27, %c19, %c0_28], %19 {strides = array<i32>} : memref<1x2x22x22xf32, #tpu.memory_space<vmem>>, vector<1x2x3x22xf32>,
      %c0_29 = arith.constant 0 : index
      %c0_30 = arith.constant 0 : index
      %c0_31 = arith.constant 0 : index
      %c0_32 = arith.constant 0 : index
      %23 = vector.load %arg7[%c0_29, %c0_30, %c0_31, %c0_32] : memref<1x2x22x22xf32, #tpu.memory_space<vmem>>, vector<1x2x22x3xf32>
      tpu.vector_store %arg7[%c0_29, %c0_30, %c0_31, %c0_32], %20 {strides = array<i32>} : memref<1x2x22x22xf32, #tpu.memory_space<vmem>>, vector<1x2x22x3xf32>,
      %c0_33 = arith.constant 0 : index
      %c0_34 = arith.constant 0 : index
      %c0_35 = arith.constant 0 : index
      %c19_36 = arith.constant 19 : index
      %24 = vector.load %arg7[%c0_33, %c0_34, %c0_35, %c19_36] : memref<1x2x22x22xf32, #tpu.memory_space<vmem>>, vector<1x2x22x3xf32>
      tpu.vector_store %arg7[%c0_33, %c0_34, %c0_35, %c19_36], %20 {strides = array<i32>} : memref<1x2x22x22xf32, #tpu.memory_space<vmem>>, vector<1x2x22x3xf32>,
    } else {
    }
    %c0 = arith.constant 0 : index
    %c0_1 = arith.constant 0 : index
    %c0_2 = arith.constant 0 : index
    %3 = vector.load %arg3[%c0, %c0_1, %c0_2] : memref<1x4x256xf32, #tpu.memory_space<vmem>>, vector<1x4x256xf32>
    %c0_3 = arith.constant 0 : index
    %c0_4 = arith.constant 0 : index
    %4 = vector.load %arg5[%c0_3, %c0_4] : memref<1x256xf32, #tpu.memory_space<vmem>>, vector<1x256xf32>
    %cst = arith.constant dense<0.000000e+00> : vector<1x256xf32>
    %5 = vector.multi_reduction <add>, %3, %cst [1] : vector<1x4x256xf32> to vector<1x256xf32>
    %6 = arith.addf %4, %5 : vector<1x256xf32>
    %c0_5 = arith.constant 0 : index
    %c0_6 = arith.constant 0 : index
    %7 = vector.load %arg5[%c0_5, %c0_6] : memref<1x256xf32, #tpu.memory_space<vmem>>, vector<1x256xf32>
    tpu.vector_store %arg5[%c0_5, %c0_6], %6 {strides = array<i32>} : memref<1x256xf32, #tpu.memory_space<vmem>>, vector<1x256xf32>,
    %c0_7 = arith.constant 0 : index
    %c0_8 = arith.constant 0 : index
    %8 = vector.load %arg6[%c0_7, %c0_8] : memref<1x256xf32, #tpu.memory_space<vmem>>, vector<1x256xf32>
    %cst_9 = arith.constant dense<0xFF800000> : vector<1x256xf32>
    %9 = vector.multi_reduction <maximumf>, %3, %cst_9 [1] : vector<1x4x256xf32> to vector<1x256xf32>
    %10 = arith.maximumf %8, %9 : vector<1x256xf32>
    %c0_10 = arith.constant 0 : index
    %c0_11 = arith.constant 0 : index
    %11 = vector.load %arg6[%c0_10, %c0_11] : memref<1x256xf32, #tpu.memory_space<vmem>>, vector<1x256xf32>
    tpu.vector_store %arg6[%c0_10, %c0_11], %10 {strides = array<i32>} : memref<1x256xf32, #tpu.memory_space<vmem>>, vector<1x256xf32>,
    %c0_i32_12 = arith.constant 0 : i32
    %12 = arith.cmpi eq, %arg1, %c0_i32_12 : i32
    %13 = arith.extui %12 : i1 to i32
    %c0_i32_13 = arith.constant 0 : i32
    %14 = arith.cmpi ne, %13, %c0_i32_13 : i32
    scf.if %14 {
      %c0_14 = arith.constant 0 : index
      %c0_15 = arith.constant 0 : index
      %15 = vector.load %arg5[%c0_14, %c0_15] : memref<1x256xf32, #tpu.memory_space<vmem>>, vector<1x16xf32>
      %cst_16 = arith.constant 2.500000e-01 : f32
      %16 = vector.broadcast %cst_16 : f32 to vector<1x16xf32>
      %17 = arith.mulf %15, %16 : vector<1x16xf32>
      %c0_17 = arith.constant 0 : index
      %c0_18 = arith.constant 0 : index
      %c3 = arith.constant 3 : index
      %c3_19 = arith.constant 3 : index
      %18 = vector.load %arg7[%c0_17, %c0_18, %c3, %c3_19] : memref<1x2x22x22xf32, #tpu.memory_space<vmem>>, vector<1x1x1x16xf32>
      %19 = vector.shape_cast %18 : vector<1x1x1x16xf32> to vector<1x16xf32>
      %20 = vector.shape_cast %17 : vector<1x16xf32> to vector<1x1x1x16xf32>
      tpu.vector_store %arg7[%c0_17, %c0_18, %c3, %c3_19], %20 {strides = array<i32>} : memref<1x2x22x22xf32, #tpu.memory_space<vmem>>, vector<1x1x1x16xf32>,
      %c0_20 = arith.constant 0 : index
      %c0_21 = arith.constant 0 : index
      %21 = vector.load %arg6[%c0_20, %c0_21] : memref<1x256xf32, #tpu.memory_space<vmem>>, vector<1x16xf32>
      %c0_22 = arith.constant 0 : index
      %c1 = arith.constant 1 : index
      %c3_23 = arith.constant 3 : index
      %c3_24 = arith.constant 3 : index
      %22 = vector.load %arg7[%c0_22, %c1, %c3_23, %c3_24] : memref<1x2x22x22xf32, #tpu.memory_space<vmem>>, vector<1x1x1x16xf32>
      %23 = vector.shape_cast %22 : vector<1x1x1x16xf32> to vector<1x16xf32>
      %24 = vector.shape_cast %21 : vector<1x16xf32> to vector<1x1x1x16xf32>
      tpu.vector_store %arg7[%c0_22, %c1, %c3_23, %c3_24], %24 {strides = array<i32>} : memref<1x2x22x22xf32, #tpu.memory_space<vmem>>, vector<1x1x1x16xf32>,
      %c0_25 = arith.constant 0 : index
      %c16 = arith.constant 16 : index
      %25 = vector.load %arg5[%c0_25, %c16] : memref<1x256xf32, #tpu.memory_space<vmem>>, vector<1x16xf32>
      %cst_26 = arith.constant 2.500000e-01 : f32
      %26 = vector.broadcast %cst_26 : f32 to vector<1x16xf32>
      %27 = arith.mulf %25, %26 : vector<1x16xf32>
      %c0_27 = arith.constant 0 : index
      %c0_28 = arith.constant 0 : index
      %c4 = arith.constant 4 : index
      %c3_29 = arith.constant 3 : index
      %28 = vector.load %arg7[%c0_27, %c0_28, %c4, %c3_29] : memref<1x2x22x22xf32, #tpu.memory_space<vmem>>, vector<1x1x1x16xf32>
      %29 = vector.shape_cast %28 : vector<1x1x1x16xf32> to vector<1x16xf32>
      %30 = vector.shape_cast %27 : vector<1x16xf32> to vector<1x1x1x16xf32>
      tpu.vector_store %arg7[%c0_27, %c0_28, %c4, %c3_29], %30 {strides = array<i32>} : memref<1x2x22x22xf32, #tpu.memory_space<vmem>>, vector<1x1x1x16xf32>,
      %c0_30 = arith.constant 0 : index
      %c16_31 = arith.constant 16 : index
      %31 = vector.load %arg6[%c0_30, %c16_31] : memref<1x256xf32, #tpu.memory_space<vmem>>, vector<1x16xf32>
      %c0_32 = arith.constant 0 : index
      %c1_33 = arith.constant 1 : index
      %c4_34 = arith.constant 4 : index
      %c3_35 = arith.constant 3 : index
      %32 = vector.load %arg7[%c0_32, %c1_33, %c4_34, %c3_35] : memref<1x2x22x22xf32, #tpu.memory_space<vmem>>, vector<1x1x1x16xf32>
      %33 = vector.shape_cast %32 : vector<1x1x1x16xf32> to vector<1x16xf32>
      %34 = vector.shape_cast %31 : vector<1x16xf32> to vector<1x1x1x16xf32>
      tpu.vector_store %arg7[%c0_32, %c1_33, %c4_34, %c3_35], %34 {strides = array<i32>} : memref<1x2x22x22xf32, #tpu.memory_space<vmem>>, vector<1x1x1x16xf32>,
      %c0_36 = arith.constant 0 : index
      %c32 = arith.constant 32 : index
      %35 = vector.load %arg5[%c0_36, %c32] : memref<1x256xf32, #tpu.memory_space<vmem>>, vector<1x16xf32>
      %cst_37 = arith.constant 2.500000e-01 : f32
      %36 = vector.broadcast %cst_37 : f32 to vector<1x16xf32>
      %37 = arith.mulf %35, %36 : vector<1x16xf32>
      %c0_38 = arith.constant 0 : index
      %c0_39 = arith.constant 0 : index
      %c5 = arith.constant 5 : index
      %c3_40 = arith.constant 3 : index
      %38 = vector.load %arg7[%c0_38, %c0_39, %c5, %c3_40] : memref<1x2x22x22xf32, #tpu.memory_space<vmem>>, vector<1x1x1x16xf32>
      %39 = vector.shape_cast %38 : vector<1x1x1x16xf32> to vector<1x16xf32>
      %40 = vector.shape_cast %37 : vector<1x16xf32> to vector<1x1x1x16xf32>
      tpu.vector_store %arg7[%c0_38, %c0_39, %c5, %c3_40], %40 {strides = array<i32>} : memref<1x2x22x22xf32, #tpu.memory_space<vmem>>, vector<1x1x1x16xf32>,
      %c0_41 = arith.constant 0 : index
      %c32_42 = arith.constant 32 : index
      %41 = vector.load %arg6[%c0_41, %c32_42] : memref<1x256xf32, #tpu.memory_space<vmem>>, vector<1x16xf32>
      %c0_43 = arith.constant 0 : index
      %c1_44 = arith.constant 1 : index
      %c5_45 = arith.constant 5 : index
      %c3_46 = arith.constant 3 : index
      %42 = vector.load %arg7[%c0_43, %c1_44, %c5_45, %c3_46] : memref<1x2x22x22xf32, #tpu.memory_space<vmem>>, vector<1x1x1x16xf32>
      %43 = vector.shape_cast %42 : vector<1x1x1x16xf32> to vector<1x16xf32>
      %44 = vector.shape_cast %41 : vector<1x16xf32> to vector<1x1x1x16xf32>
      tpu.vector_store %arg7[%c0_43, %c1_44, %c5_45, %c3_46], %44 {strides = array<i32>} : memref<1x2x22x22xf32, #tpu.memory_space<vmem>>, vector<1x1x1x16xf32>,
      %c0_47 = arith.constant 0 : index
      %c48 = arith.constant 48 : index
      %45 = vector.load %arg5[%c0_47, %c48] : memref<1x256xf32, #tpu.memory_space<vmem>>, vector<1x16xf32>
      %cst_48 = arith.constant 2.500000e-01 : f32
      %46 = vector.broadcast %cst_48 : f32 to vector<1x16xf32>
      %47 = arith.mulf %45, %46 : vector<1x16xf32>
      %c0_49 = arith.constant 0 : index
      %c0_50 = arith.constant 0 : index
      %c6 = arith.constant 6 : index
      %c3_51 = arith.constant 3 : index
      %48 = vector.load %arg7[%c0_49, %c0_50, %c6, %c3_51] : memref<1x2x22x22xf32, #tpu.memory_space<vmem>>, vector<1x1x1x16xf32>
      %49 = vector.shape_cast %48 : vector<1x1x1x16xf32> to vector<1x16xf32>
      %50 = vector.shape_cast %47 : vector<1x16xf32> to vector<1x1x1x16xf32>
      tpu.vector_store %arg7[%c0_49, %c0_50, %c6, %c3_51], %50 {strides = array<i32>} : memref<1x2x22x22xf32, #tpu.memory_space<vmem>>, vector<1x1x1x16xf32>,
      %c0_52 = arith.constant 0 : index
      %c48_53 = arith.constant 48 : index
      %51 = vector.load %arg6[%c0_52, %c48_53] : memref<1x256xf32, #tpu.memory_space<vmem>>, vector<1x16xf32>
      %c0_54 = arith.constant 0 : index
      %c1_55 = arith.constant 1 : index
      %c6_56 = arith.constant 6 : index
      %c3_57 = arith.constant 3 : index
      %52 = vector.load %arg7[%c0_54, %c1_55, %c6_56, %c3_57] : memref<1x2x22x22xf32, #tpu.memory_space<vmem>>, vector<1x1x1x16xf32>
      %53 = vector.shape_cast %52 : vector<1x1x1x16xf32> to vector<1x16xf32>
      %54 = vector.shape_cast %51 : vector<1x16xf32> to vector<1x1x1x16xf32>
      tpu.vector_store %arg7[%c0_54, %c1_55, %c6_56, %c3_57], %54 {strides = array<i32>} : memref<1x2x22x22xf32, #tpu.memory_space<vmem>>, vector<1x1x1x16xf32>,
      %c0_58 = arith.constant 0 : index
      %c64 = arith.constant 64 : index
      %55 = vector.load %arg5[%c0_58, %c64] : memref<1x256xf32, #tpu.memory_space<vmem>>, vector<1x16xf32>
      %cst_59 = arith.constant 2.500000e-01 : f32
      %56 = vector.broadcast %cst_59 : f32 to vector<1x16xf32>
      %57 = arith.mulf %55, %56 : vector<1x16xf32>
      %c0_60 = arith.constant 0 : index
      %c0_61 = arith.constant 0 : index
      %c7 = arith.constant 7 : index
      %c3_62 = arith.constant 3 : index
      %58 = vector.load %arg7[%c0_60, %c0_61, %c7, %c3_62] : memref<1x2x22x22xf32, #tpu.memory_space<vmem>>, vector<1x1x1x16xf32>
      %59 = vector.shape_cast %58 : vector<1x1x1x16xf32> to vector<1x16xf32>
      %60 = vector.shape_cast %57 : vector<1x16xf32> to vector<1x1x1x16xf32>
      tpu.vector_store %arg7[%c0_60, %c0_61, %c7, %c3_62], %60 {strides = array<i32>} : memref<1x2x22x22xf32, #tpu.memory_space<vmem>>, vector<1x1x1x16xf32>,
      %c0_63 = arith.constant 0 : index
      %c64_64 = arith.constant 64 : index
      %61 = vector.load %arg6[%c0_63, %c64_64] : memref<1x256xf32, #tpu.memory_space<vmem>>, vector<1x16xf32>
      %c0_65 = arith.constant 0 : index
      %c1_66 = arith.constant 1 : index
      %c7_67 = arith.constant 7 : index
      %c3_68 = arith.constant 3 : index
      %62 = vector.load %arg7[%c0_65, %c1_66, %c7_67, %c3_68] : memref<1x2x22x22xf32, #tpu.memory_space<vmem>>, vector<1x1x1x16xf32>
      %63 = vector.shape_cast %62 : vector<1x1x1x16xf32> to vector<1x16xf32>
      %64 = vector.shape_cast %61 : vector<1x16xf32> to vector<1x1x1x16xf32>
      tpu.vector_store %arg7[%c0_65, %c1_66, %c7_67, %c3_68], %64 {strides = array<i32>} : memref<1x2x22x22xf32, #tpu.memory_space<vmem>>, vector<1x1x1x16xf32>,
      %c0_69 = arith.constant 0 : index
      %c80 = arith.constant 80 : index
      %65 = vector.load %arg5[%c0_69, %c80] : memref<1x256xf32, #tpu.memory_space<vmem>>, vector<1x16xf32>
      %cst_70 = arith.constant 2.500000e-01 : f32
      %66 = vector.broadcast %cst_70 : f32 to vector<1x16xf32>
      %67 = arith.mulf %65, %66 : vector<1x16xf32>
      %c0_71 = arith.constant 0 : index
      %c0_72 = arith.constant 0 : index
      %c8 = arith.constant 8 : index
      %c3_73 = arith.constant 3 : index
      %68 = vector.load %arg7[%c0_71, %c0_72, %c8, %c3_73] : memref<1x2x22x22xf32, #tpu.memory_space<vmem>>, vector<1x1x1x16xf32>
      %69 = vector.shape_cast %68 : vector<1x1x1x16xf32> to vector<1x16xf32>
      %70 = vector.shape_cast %67 : vector<1x16xf32> to vector<1x1x1x16xf32>
      tpu.vector_store %arg7[%c0_71, %c0_72, %c8, %c3_73], %70 {strides = array<i32>} : memref<1x2x22x22xf32, #tpu.memory_space<vmem>>, vector<1x1x1x16xf32>,
      %c0_74 = arith.constant 0 : index
      %c80_75 = arith.constant 80 : index
      %71 = vector.load %arg6[%c0_74, %c80_75] : memref<1x256xf32, #tpu.memory_space<vmem>>, vector<1x16xf32>
      %c0_76 = arith.constant 0 : index
      %c1_77 = arith.constant 1 : index
      %c8_78 = arith.constant 8 : index
      %c3_79 = arith.constant 3 : index
      %72 = vector.load %arg7[%c0_76, %c1_77, %c8_78, %c3_79] : memref<1x2x22x22xf32, #tpu.memory_space<vmem>>, vector<1x1x1x16xf32>
      %73 = vector.shape_cast %72 : vector<1x1x1x16xf32> to vector<1x16xf32>
      %74 = vector.shape_cast %71 : vector<1x16xf32> to vector<1x1x1x16xf32>
      tpu.vector_store %arg7[%c0_76, %c1_77, %c8_78, %c3_79], %74 {strides = array<i32>} : memref<1x2x22x22xf32, #tpu.memory_space<vmem>>, vector<1x1x1x16xf32>,
      %c0_80 = arith.constant 0 : index
      %c96 = arith.constant 96 : index
      %75 = vector.load %arg5[%c0_80, %c96] : memref<1x256xf32, #tpu.memory_space<vmem>>, vector<1x16xf32>
      %cst_81 = arith.constant 2.500000e-01 : f32
      %76 = vector.broadcast %cst_81 : f32 to vector<1x16xf32>
      %77 = arith.mulf %75, %76 : vector<1x16xf32>
      %c0_82 = arith.constant 0 : index
      %c0_83 = arith.constant 0 : index
      %c9 = arith.constant 9 : index
      %c3_84 = arith.constant 3 : index
      %78 = vector.load %arg7[%c0_82, %c0_83, %c9, %c3_84] : memref<1x2x22x22xf32, #tpu.memory_space<vmem>>, vector<1x1x1x16xf32>
      %79 = vector.shape_cast %78 : vector<1x1x1x16xf32> to vector<1x16xf32>
      %80 = vector.shape_cast %77 : vector<1x16xf32> to vector<1x1x1x16xf32>
      tpu.vector_store %arg7[%c0_82, %c0_83, %c9, %c3_84], %80 {strides = array<i32>} : memref<1x2x22x22xf32, #tpu.memory_space<vmem>>, vector<1x1x1x16xf32>,
      %c0_85 = arith.constant 0 : index
      %c96_86 = arith.constant 96 : index
      %81 = vector.load %arg6[%c0_85, %c96_86] : memref<1x256xf32, #tpu.memory_space<vmem>>, vector<1x16xf32>
      %c0_87 = arith.constant 0 : index
      %c1_88 = arith.constant 1 : index
      %c9_89 = arith.constant 9 : index
      %c3_90 = arith.constant 3 : index
      %82 = vector.load %arg7[%c0_87, %c1_88, %c9_89, %c3_90] : memref<1x2x22x22xf32, #tpu.memory_space<vmem>>, vector<1x1x1x16xf32>
      %83 = vector.shape_cast %82 : vector<1x1x1x16xf32> to vector<1x16xf32>
      %84 = vector.shape_cast %81 : vector<1x16xf32> to vector<1x1x1x16xf32>
      tpu.vector_store %arg7[%c0_87, %c1_88, %c9_89, %c3_90], %84 {strides = array<i32>} : memref<1x2x22x22xf32, #tpu.memory_space<vmem>>, vector<1x1x1x16xf32>,
      %c0_91 = arith.constant 0 : index
      %c112 = arith.constant 112 : index
      %85 = vector.load %arg5[%c0_91, %c112] : memref<1x256xf32, #tpu.memory_space<vmem>>, vector<1x16xf32>
      %cst_92 = arith.constant 2.500000e-01 : f32
      %86 = vector.broadcast %cst_92 : f32 to vector<1x16xf32>
      %87 = arith.mulf %85, %86 : vector<1x16xf32>
      %c0_93 = arith.constant 0 : index
      %c0_94 = arith.constant 0 : index
      %c10 = arith.constant 10 : index
      %c3_95 = arith.constant 3 : index
      %88 = vector.load %arg7[%c0_93, %c0_94, %c10, %c3_95] : memref<1x2x22x22xf32, #tpu.memory_space<vmem>>, vector<1x1x1x16xf32>
      %89 = vector.shape_cast %88 : vector<1x1x1x16xf32> to vector<1x16xf32>
      %90 = vector.shape_cast %87 : vector<1x16xf32> to vector<1x1x1x16xf32>
      tpu.vector_store %arg7[%c0_93, %c0_94, %c10, %c3_95], %90 {strides = array<i32>} : memref<1x2x22x22xf32, #tpu.memory_space<vmem>>, vector<1x1x1x16xf32>,
      %c0_96 = arith.constant 0 : index
      %c112_97 = arith.constant 112 : index
      %91 = vector.load %arg6[%c0_96, %c112_97] : memref<1x256xf32, #tpu.memory_space<vmem>>, vector<1x16xf32>
      %c0_98 = arith.constant 0 : index
      %c1_99 = arith.constant 1 : index
      %c10_100 = arith.constant 10 : index
      %c3_101 = arith.constant 3 : index
      %92 = vector.load %arg7[%c0_98, %c1_99, %c10_100, %c3_101] : memref<1x2x22x22xf32, #tpu.memory_space<vmem>>, vector<1x1x1x16xf32>
      %93 = vector.shape_cast %92 : vector<1x1x1x16xf32> to vector<1x16xf32>
      %94 = vector.shape_cast %91 : vector<1x16xf32> to vector<1x1x1x16xf32>
      tpu.vector_store %arg7[%c0_98, %c1_99, %c10_100, %c3_101], %94 {strides = array<i32>} : memref<1x2x22x22xf32, #tpu.memory_space<vmem>>, vector<1x1x1x16xf32>,
      %c0_102 = arith.constant 0 : index
      %c128 = arith.constant 128 : index
      %95 = vector.load %arg5[%c0_102, %c128] : memref<1x256xf32, #tpu.memory_space<vmem>>, vector<1x16xf32>
      %cst_103 = arith.constant 2.500000e-01 : f32
      %96 = vector.broadcast %cst_103 : f32 to vector<1x16xf32>
      %97 = arith.mulf %95, %96 : vector<1x16xf32>
      %c0_104 = arith.constant 0 : index
      %c0_105 = arith.constant 0 : index
      %c11 = arith.constant 11 : index
      %c3_106 = arith.constant 3 : index
      %98 = vector.load %arg7[%c0_104, %c0_105, %c11, %c3_106] : memref<1x2x22x22xf32, #tpu.memory_space<vmem>>, vector<1x1x1x16xf32>
      %99 = vector.shape_cast %98 : vector<1x1x1x16xf32> to vector<1x16xf32>
      %100 = vector.shape_cast %97 : vector<1x16xf32> to vector<1x1x1x16xf32>
      tpu.vector_store %arg7[%c0_104, %c0_105, %c11, %c3_106], %100 {strides = array<i32>} : memref<1x2x22x22xf32, #tpu.memory_space<vmem>>, vector<1x1x1x16xf32>,
      %c0_107 = arith.constant 0 : index
      %c128_108 = arith.constant 128 : index
      %101 = vector.load %arg6[%c0_107, %c128_108] : memref<1x256xf32, #tpu.memory_space<vmem>>, vector<1x16xf32>
      %c0_109 = arith.constant 0 : index
      %c1_110 = arith.constant 1 : index
      %c11_111 = arith.constant 11 : index
      %c3_112 = arith.constant 3 : index
      %102 = vector.load %arg7[%c0_109, %c1_110, %c11_111, %c3_112] : memref<1x2x22x22xf32, #tpu.memory_space<vmem>>, vector<1x1x1x16xf32>
      %103 = vector.shape_cast %102 : vector<1x1x1x16xf32> to vector<1x16xf32>
      %104 = vector.shape_cast %101 : vector<1x16xf32> to vector<1x1x1x16xf32>
      tpu.vector_store %arg7[%c0_109, %c1_110, %c11_111, %c3_112], %104 {strides = array<i32>} : memref<1x2x22x22xf32, #tpu.memory_space<vmem>>, vector<1x1x1x16xf32>,
      %c0_113 = arith.constant 0 : index
      %c144 = arith.constant 144 : index
      %105 = vector.load %arg5[%c0_113, %c144] : memref<1x256xf32, #tpu.memory_space<vmem>>, vector<1x16xf32>
      %cst_114 = arith.constant 2.500000e-01 : f32
      %106 = vector.broadcast %cst_114 : f32 to vector<1x16xf32>
      %107 = arith.mulf %105, %106 : vector<1x16xf32>
      %c0_115 = arith.constant 0 : index
      %c0_116 = arith.constant 0 : index
      %c12 = arith.constant 12 : index
      %c3_117 = arith.constant 3 : index
      %108 = vector.load %arg7[%c0_115, %c0_116, %c12, %c3_117] : memref<1x2x22x22xf32, #tpu.memory_space<vmem>>, vector<1x1x1x16xf32>
      %109 = vector.shape_cast %108 : vector<1x1x1x16xf32> to vector<1x16xf32>
      %110 = vector.shape_cast %107 : vector<1x16xf32> to vector<1x1x1x16xf32>
      tpu.vector_store %arg7[%c0_115, %c0_116, %c12, %c3_117], %110 {strides = array<i32>} : memref<1x2x22x22xf32, #tpu.memory_space<vmem>>, vector<1x1x1x16xf32>,
      %c0_118 = arith.constant 0 : index
      %c144_119 = arith.constant 144 : index
      %111 = vector.load %arg6[%c0_118, %c144_119] : memref<1x256xf32, #tpu.memory_space<vmem>>, vector<1x16xf32>
      %c0_120 = arith.constant 0 : index
      %c1_121 = arith.constant 1 : index
      %c12_122 = arith.constant 12 : index
      %c3_123 = arith.constant 3 : index
      %112 = vector.load %arg7[%c0_120, %c1_121, %c12_122, %c3_123] : memref<1x2x22x22xf32, #tpu.memory_space<vmem>>, vector<1x1x1x16xf32>
      %113 = vector.shape_cast %112 : vector<1x1x1x16xf32> to vector<1x16xf32>
      %114 = vector.shape_cast %111 : vector<1x16xf32> to vector<1x1x1x16xf32>
      tpu.vector_store %arg7[%c0_120, %c1_121, %c12_122, %c3_123], %114 {strides = array<i32>} : memref<1x2x22x22xf32, #tpu.memory_space<vmem>>, vector<1x1x1x16xf32>,
      %c0_124 = arith.constant 0 : index
      %c160 = arith.constant 160 : index
      %115 = vector.load %arg5[%c0_124, %c160] : memref<1x256xf32, #tpu.memory_space<vmem>>, vector<1x16xf32>
      %cst_125 = arith.constant 2.500000e-01 : f32
      %116 = vector.broadcast %cst_125 : f32 to vector<1x16xf32>
      %117 = arith.mulf %115, %116 : vector<1x16xf32>
      %c0_126 = arith.constant 0 : index
      %c0_127 = arith.constant 0 : index
      %c13 = arith.constant 13 : index
      %c3_128 = arith.constant 3 : index
      %118 = vector.load %arg7[%c0_126, %c0_127, %c13, %c3_128] : memref<1x2x22x22xf32, #tpu.memory_space<vmem>>, vector<1x1x1x16xf32>
      %119 = vector.shape_cast %118 : vector<1x1x1x16xf32> to vector<1x16xf32>
      %120 = vector.shape_cast %117 : vector<1x16xf32> to vector<1x1x1x16xf32>
      tpu.vector_store %arg7[%c0_126, %c0_127, %c13, %c3_128], %120 {strides = array<i32>} : memref<1x2x22x22xf32, #tpu.memory_space<vmem>>, vector<1x1x1x16xf32>,
      %c0_129 = arith.constant 0 : index
      %c160_130 = arith.constant 160 : index
      %121 = vector.load %arg6[%c0_129, %c160_130] : memref<1x256xf32, #tpu.memory_space<vmem>>, vector<1x16xf32>
      %c0_131 = arith.constant 0 : index
      %c1_132 = arith.constant 1 : index
      %c13_133 = arith.constant 13 : index
      %c3_134 = arith.constant 3 : index
      %122 = vector.load %arg7[%c0_131, %c1_132, %c13_133, %c3_134] : memref<1x2x22x22xf32, #tpu.memory_space<vmem>>, vector<1x1x1x16xf32>
      %123 = vector.shape_cast %122 : vector<1x1x1x16xf32> to vector<1x16xf32>
      %124 = vector.shape_cast %121 : vector<1x16xf32> to vector<1x1x1x16xf32>
      tpu.vector_store %arg7[%c0_131, %c1_132, %c13_133, %c3_134], %124 {strides = array<i32>} : memref<1x2x22x22xf32, #tpu.memory_space<vmem>>, vector<1x1x1x16xf32>,
      %c0_135 = arith.constant 0 : index
      %c176 = arith.constant 176 : index
      %125 = vector.load %arg5[%c0_135, %c176] : memref<1x256xf32, #tpu.memory_space<vmem>>, vector<1x16xf32>
      %cst_136 = arith.constant 2.500000e-01 : f32
      %126 = vector.broadcast %cst_136 : f32 to vector<1x16xf32>
      %127 = arith.mulf %125, %126 : vector<1x16xf32>
      %c0_137 = arith.constant 0 : index
      %c0_138 = arith.constant 0 : index
      %c14 = arith.constant 14 : index
      %c3_139 = arith.constant 3 : index
      %128 = vector.load %arg7[%c0_137, %c0_138, %c14, %c3_139] : memref<1x2x22x22xf32, #tpu.memory_space<vmem>>, vector<1x1x1x16xf32>
      %129 = vector.shape_cast %128 : vector<1x1x1x16xf32> to vector<1x16xf32>
      %130 = vector.shape_cast %127 : vector<1x16xf32> to vector<1x1x1x16xf32>
      tpu.vector_store %arg7[%c0_137, %c0_138, %c14, %c3_139], %130 {strides = array<i32>} : memref<1x2x22x22xf32, #tpu.memory_space<vmem>>, vector<1x1x1x16xf32>,
      %c0_140 = arith.constant 0 : index
      %c176_141 = arith.constant 176 : index
      %131 = vector.load %arg6[%c0_140, %c176_141] : memref<1x256xf32, #tpu.memory_space<vmem>>, vector<1x16xf32>
      %c0_142 = arith.constant 0 : index
      %c1_143 = arith.constant 1 : index
      %c14_144 = arith.constant 14 : index
      %c3_145 = arith.constant 3 : index
      %132 = vector.load %arg7[%c0_142, %c1_143, %c14_144, %c3_145] : memref<1x2x22x22xf32, #tpu.memory_space<vmem>>, vector<1x1x1x16xf32>
      %133 = vector.shape_cast %132 : vector<1x1x1x16xf32> to vector<1x16xf32>
      %134 = vector.shape_cast %131 : vector<1x16xf32> to vector<1x1x1x16xf32>
      tpu.vector_store %arg7[%c0_142, %c1_143, %c14_144, %c3_145], %134 {strides = array<i32>} : memref<1x2x22x22xf32, #tpu.memory_space<vmem>>, vector<1x1x1x16xf32>,
      %c0_146 = arith.constant 0 : index
      %c192 = arith.constant 192 : index
      %135 = vector.load %arg5[%c0_146, %c192] : memref<1x256xf32, #tpu.memory_space<vmem>>, vector<1x16xf32>
      %cst_147 = arith.constant 2.500000e-01 : f32
      %136 = vector.broadcast %cst_147 : f32 to vector<1x16xf32>
      %137 = arith.mulf %135, %136 : vector<1x16xf32>
      %c0_148 = arith.constant 0 : index
      %c0_149 = arith.constant 0 : index
      %c15 = arith.constant 15 : index
      %c3_150 = arith.constant 3 : index
      %138 = vector.load %arg7[%c0_148, %c0_149, %c15, %c3_150] : memref<1x2x22x22xf32, #tpu.memory_space<vmem>>, vector<1x1x1x16xf32>
      %139 = vector.shape_cast %138 : vector<1x1x1x16xf32> to vector<1x16xf32>
      %140 = vector.shape_cast %137 : vector<1x16xf32> to vector<1x1x1x16xf32>
      tpu.vector_store %arg7[%c0_148, %c0_149, %c15, %c3_150], %140 {strides = array<i32>} : memref<1x2x22x22xf32, #tpu.memory_space<vmem>>, vector<1x1x1x16xf32>,
      %c0_151 = arith.constant 0 : index
      %c192_152 = arith.constant 192 : index
      %141 = vector.load %arg6[%c0_151, %c192_152] : memref<1x256xf32, #tpu.memory_space<vmem>>, vector<1x16xf32>
      %c0_153 = arith.constant 0 : index
      %c1_154 = arith.constant 1 : index
      %c15_155 = arith.constant 15 : index
      %c3_156 = arith.constant 3 : index
      %142 = vector.load %arg7[%c0_153, %c1_154, %c15_155, %c3_156] : memref<1x2x22x22xf32, #tpu.memory_space<vmem>>, vector<1x1x1x16xf32>
      %143 = vector.shape_cast %142 : vector<1x1x1x16xf32> to vector<1x16xf32>
      %144 = vector.shape_cast %141 : vector<1x16xf32> to vector<1x1x1x16xf32>
      tpu.vector_store %arg7[%c0_153, %c1_154, %c15_155, %c3_156], %144 {strides = array<i32>} : memref<1x2x22x22xf32, #tpu.memory_space<vmem>>, vector<1x1x1x16xf32>,
      %c0_157 = arith.constant 0 : index
      %c208 = arith.constant 208 : index
      %145 = vector.load %arg5[%c0_157, %c208] : memref<1x256xf32, #tpu.memory_space<vmem>>, vector<1x16xf32>
      %cst_158 = arith.constant 2.500000e-01 : f32
      %146 = vector.broadcast %cst_158 : f32 to vector<1x16xf32>
      %147 = arith.mulf %145, %146 : vector<1x16xf32>
      %c0_159 = arith.constant 0 : index
      %c0_160 = arith.constant 0 : index
      %c16_161 = arith.constant 16 : index
      %c3_162 = arith.constant 3 : index
      %148 = vector.load %arg7[%c0_159, %c0_160, %c16_161, %c3_162] : memref<1x2x22x22xf32, #tpu.memory_space<vmem>>, vector<1x1x1x16xf32>
      %149 = vector.shape_cast %148 : vector<1x1x1x16xf32> to vector<1x16xf32>
      %150 = vector.shape_cast %147 : vector<1x16xf32> to vector<1x1x1x16xf32>
      tpu.vector_store %arg7[%c0_159, %c0_160, %c16_161, %c3_162], %150 {strides = array<i32>} : memref<1x2x22x22xf32, #tpu.memory_space<vmem>>, vector<1x1x1x16xf32>,
      %c0_163 = arith.constant 0 : index
      %c208_164 = arith.constant 208 : index
      %151 = vector.load %arg6[%c0_163, %c208_164] : memref<1x256xf32, #tpu.memory_space<vmem>>, vector<1x16xf32>
      %c0_165 = arith.constant 0 : index
      %c1_166 = arith.constant 1 : index
      %c16_167 = arith.constant 16 : index
      %c3_168 = arith.constant 3 : index
      %152 = vector.load %arg7[%c0_165, %c1_166, %c16_167, %c3_168] : memref<1x2x22x22xf32, #tpu.memory_space<vmem>>, vector<1x1x1x16xf32>
      %153 = vector.shape_cast %152 : vector<1x1x1x16xf32> to vector<1x16xf32>
      %154 = vector.shape_cast %151 : vector<1x16xf32> to vector<1x1x1x16xf32>
      tpu.vector_store %arg7[%c0_165, %c1_166, %c16_167, %c3_168], %154 {strides = array<i32>} : memref<1x2x22x22xf32, #tpu.memory_space<vmem>>, vector<1x1x1x16xf32>,
      %c0_169 = arith.constant 0 : index
      %c224 = arith.constant 224 : index
      %155 = vector.load %arg5[%c0_169, %c224] : memref<1x256xf32, #tpu.memory_space<vmem>>, vector<1x16xf32>
      %cst_170 = arith.constant 2.500000e-01 : f32
      %156 = vector.broadcast %cst_170 : f32 to vector<1x16xf32>
      %157 = arith.mulf %155, %156 : vector<1x16xf32>
      %c0_171 = arith.constant 0 : index
      %c0_172 = arith.constant 0 : index
      %c17 = arith.constant 17 : index
      %c3_173 = arith.constant 3 : index
      %158 = vector.load %arg7[%c0_171, %c0_172, %c17, %c3_173] : memref<1x2x22x22xf32, #tpu.memory_space<vmem>>, vector<1x1x1x16xf32>
      %159 = vector.shape_cast %158 : vector<1x1x1x16xf32> to vector<1x16xf32>
      %160 = vector.shape_cast %157 : vector<1x16xf32> to vector<1x1x1x16xf32>
      tpu.vector_store %arg7[%c0_171, %c0_172, %c17, %c3_173], %160 {strides = array<i32>} : memref<1x2x22x22xf32, #tpu.memory_space<vmem>>, vector<1x1x1x16xf32>,
      %c0_174 = arith.constant 0 : index
      %c224_175 = arith.constant 224 : index
      %161 = vector.load %arg6[%c0_174, %c224_175] : memref<1x256xf32, #tpu.memory_space<vmem>>, vector<1x16xf32>
      %c0_176 = arith.constant 0 : index
      %c1_177 = arith.constant 1 : index
      %c17_178 = arith.constant 17 : index
      %c3_179 = arith.constant 3 : index
      %162 = vector.load %arg7[%c0_176, %c1_177, %c17_178, %c3_179] : memref<1x2x22x22xf32, #tpu.memory_space<vmem>>, vector<1x1x1x16xf32>
      %163 = vector.shape_cast %162 : vector<1x1x1x16xf32> to vector<1x16xf32>
      %164 = vector.shape_cast %161 : vector<1x16xf32> to vector<1x1x1x16xf32>
      tpu.vector_store %arg7[%c0_176, %c1_177, %c17_178, %c3_179], %164 {strides = array<i32>} : memref<1x2x22x22xf32, #tpu.memory_space<vmem>>, vector<1x1x1x16xf32>,
      %c0_180 = arith.constant 0 : index
      %c240 = arith.constant 240 : index
      %165 = vector.load %arg5[%c0_180, %c240] : memref<1x256xf32, #tpu.memory_space<vmem>>, vector<1x16xf32>
      %cst_181 = arith.constant 2.500000e-01 : f32
      %166 = vector.broadcast %cst_181 : f32 to vector<1x16xf32>
      %167 = arith.mulf %165, %166 : vector<1x16xf32>
      %c0_182 = arith.constant 0 : index
      %c0_183 = arith.constant 0 : index
      %c18 = arith.constant 18 : index
      %c3_184 = arith.constant 3 : index
      %168 = vector.load %arg7[%c0_182, %c0_183, %c18, %c3_184] : memref<1x2x22x22xf32, #tpu.memory_space<vmem>>, vector<1x1x1x16xf32>
      %169 = vector.shape_cast %168 : vector<1x1x1x16xf32> to vector<1x16xf32>
      %170 = vector.shape_cast %167 : vector<1x16xf32> to vector<1x1x1x16xf32>
      tpu.vector_store %arg7[%c0_182, %c0_183, %c18, %c3_184], %170 {strides = array<i32>} : memref<1x2x22x22xf32, #tpu.memory_space<vmem>>, vector<1x1x1x16xf32>,
      %c0_185 = arith.constant 0 : index
      %c240_186 = arith.constant 240 : index
      %171 = vector.load %arg6[%c0_185, %c240_186] : memref<1x256xf32, #tpu.memory_space<vmem>>, vector<1x16xf32>
      %c0_187 = arith.constant 0 : index
      %c1_188 = arith.constant 1 : index
      %c18_189 = arith.constant 18 : index
      %c3_190 = arith.constant 3 : index
      %172 = vector.load %arg7[%c0_187, %c1_188, %c18_189, %c3_190] : memref<1x2x22x22xf32, #tpu.memory_space<vmem>>, vector<1x1x1x16xf32>
      %173 = vector.shape_cast %172 : vector<1x1x1x16xf32> to vector<1x16xf32>
      %174 = vector.shape_cast %171 : vector<1x16xf32> to vector<1x1x1x16xf32>
      tpu.vector_store %arg7[%c0_187, %c1_188, %c18_189, %c3_190], %174 {strides = array<i32>} : memref<1x2x22x22xf32, #tpu.memory_space<vmem>>, vector<1x1x1x16xf32>,
      %cst_191 = arith.constant 0.000000e+00 : f32
      %175 = vector.broadcast %cst_191 : f32 to vector<1x16x16xf32>
      %cst_192 = arith.constant 0.000000e+00 : f32
      %176 = vector.broadcast %cst_192 : f32 to vector<1x16x16xf32>
      %cst_193 = arith.constant 0.000000e+00 : f32
      %177 = vector.broadcast %cst_193 : f32 to vector<1x16x16xf32>
      %cst_194 = arith.constant 0.000000e+00 : f32
      %178 = vector.broadcast %cst_194 : f32 to vector<1x16x16xf32>
      %c0_195 = arith.constant 0 : index
      %179 = memref.load %arg2[%c0_195] : memref<98xf32, #tpu.memory_space<smem>>
      %c0_196 = arith.constant 0 : index
      %c0_197 = arith.constant 0 : index
      %c0_198 = arith.constant 0 : index
      %c0_199 = arith.constant 0 : index
      %180 = vector.load %arg7[%c0_196, %c0_197, %c0_198, %c0_199] : memref<1x2x22x22xf32, #tpu.memory_space<vmem>>, vector<1x1x16x16xf32>
      %181 = vector.shape_cast %180 : vector<1x1x16x16xf32> to vector<1x16x16xf32>
      %182 = vector.broadcast %179 : f32 to vector<1x16x16xf32>
      %183 = arith.mulf %182, %181 : vector<1x16x16xf32>
      %184 = arith.addf %175, %183 : vector<1x16x16xf32>
      %c1_200 = arith.constant 1 : index
      %185 = memref.load %arg2[%c1_200] : memref<98xf32, #tpu.memory_space<smem>>
      %c0_201 = arith.constant 0 : index
      %c0_202 = arith.constant 0 : index
      %c0_203 = arith.constant 0 : index
      %c1_204 = arith.constant 1 : index
      %186 = vector.load %arg7[%c0_201, %c0_202, %c0_203, %c1_204] : memref<1x2x22x22xf32, #tpu.memory_space<vmem>>, vector<1x1x16x16xf32>
      %187 = vector.shape_cast %186 : vector<1x1x16x16xf32> to vector<1x16x16xf32>
      %188 = vector.broadcast %185 : f32 to vector<1x16x16xf32>
      %189 = arith.mulf %188, %187 : vector<1x16x16xf32>
      %190 = arith.addf %184, %189 : vector<1x16x16xf32>
      %c2 = arith.constant 2 : index
      %191 = memref.load %arg2[%c2] : memref<98xf32, #tpu.memory_space<smem>>
      %c0_205 = arith.constant 0 : index
      %c0_206 = arith.constant 0 : index
      %c0_207 = arith.constant 0 : index
      %c2_208 = arith.constant 2 : index
      %192 = vector.load %arg7[%c0_205, %c0_206, %c0_207, %c2_208] : memref<1x2x22x22xf32, #tpu.memory_space<vmem>>, vector<1x1x16x16xf32>
      %193 = vector.shape_cast %192 : vector<1x1x16x16xf32> to vector<1x16x16xf32>
      %194 = vector.broadcast %191 : f32 to vector<1x16x16xf32>
      %195 = arith.mulf %194, %193 : vector<1x16x16xf32>
      %196 = arith.addf %190, %195 : vector<1x16x16xf32>
      %c3_209 = arith.constant 3 : index
      %197 = memref.load %arg2[%c3_209] : memref<98xf32, #tpu.memory_space<smem>>
      %c0_210 = arith.constant 0 : index
      %c0_211 = arith.constant 0 : index
      %c0_212 = arith.constant 0 : index
      %c3_213 = arith.constant 3 : index
      %198 = vector.load %arg7[%c0_210, %c0_211, %c0_212, %c3_213] : memref<1x2x22x22xf32, #tpu.memory_space<vmem>>, vector<1x1x16x16xf32>
      %199 = vector.shape_cast %198 : vector<1x1x16x16xf32> to vector<1x16x16xf32>
      %200 = vector.broadcast %197 : f32 to vector<1x16x16xf32>
      %201 = arith.mulf %200, %199 : vector<1x16x16xf32>
      %202 = arith.addf %196, %201 : vector<1x16x16xf32>
      %c4_214 = arith.constant 4 : index
      %203 = memref.load %arg2[%c4_214] : memref<98xf32, #tpu.memory_space<smem>>
      %c0_215 = arith.constant 0 : index
      %c0_216 = arith.constant 0 : index
      %c0_217 = arith.constant 0 : index
      %c4_218 = arith.constant 4 : index
      %204 = vector.load %arg7[%c0_215, %c0_216, %c0_217, %c4_218] : memref<1x2x22x22xf32, #tpu.memory_space<vmem>>, vector<1x1x16x16xf32>
      %205 = vector.shape_cast %204 : vector<1x1x16x16xf32> to vector<1x16x16xf32>
      %206 = vector.broadcast %203 : f32 to vector<1x16x16xf32>
      %207 = arith.mulf %206, %205 : vector<1x16x16xf32>
      %208 = arith.addf %202, %207 : vector<1x16x16xf32>
      %c5_219 = arith.constant 5 : index
      %209 = memref.load %arg2[%c5_219] : memref<98xf32, #tpu.memory_space<smem>>
      %c0_220 = arith.constant 0 : index
      %c0_221 = arith.constant 0 : index
      %c0_222 = arith.constant 0 : index
      %c5_223 = arith.constant 5 : index
      %210 = vector.load %arg7[%c0_220, %c0_221, %c0_222, %c5_223] : memref<1x2x22x22xf32, #tpu.memory_space<vmem>>, vector<1x1x16x16xf32>
      %211 = vector.shape_cast %210 : vector<1x1x16x16xf32> to vector<1x16x16xf32>
      %212 = vector.broadcast %209 : f32 to vector<1x16x16xf32>
      %213 = arith.mulf %212, %211 : vector<1x16x16xf32>
      %214 = arith.addf %208, %213 : vector<1x16x16xf32>
      %c6_224 = arith.constant 6 : index
      %215 = memref.load %arg2[%c6_224] : memref<98xf32, #tpu.memory_space<smem>>
      %c0_225 = arith.constant 0 : index
      %c0_226 = arith.constant 0 : index
      %c0_227 = arith.constant 0 : index
      %c6_228 = arith.constant 6 : index
      %216 = vector.load %arg7[%c0_225, %c0_226, %c0_227, %c6_228] : memref<1x2x22x22xf32, #tpu.memory_space<vmem>>, vector<1x1x16x16xf32>
      %217 = vector.shape_cast %216 : vector<1x1x16x16xf32> to vector<1x16x16xf32>
      %218 = vector.broadcast %215 : f32 to vector<1x16x16xf32>
      %219 = arith.mulf %218, %217 : vector<1x16x16xf32>
      %220 = arith.addf %214, %219 : vector<1x16x16xf32>
      %c7_229 = arith.constant 7 : index
      %221 = memref.load %arg2[%c7_229] : memref<98xf32, #tpu.memory_space<smem>>
      %c0_230 = arith.constant 0 : index
      %c0_231 = arith.constant 0 : index
      %c1_232 = arith.constant 1 : index
      %c0_233 = arith.constant 0 : index
      %222 = vector.load %arg7[%c0_230, %c0_231, %c1_232, %c0_233] : memref<1x2x22x22xf32, #tpu.memory_space<vmem>>, vector<1x1x16x16xf32>
      %223 = vector.shape_cast %222 : vector<1x1x16x16xf32> to vector<1x16x16xf32>
      %224 = vector.broadcast %221 : f32 to vector<1x16x16xf32>
      %225 = arith.mulf %224, %223 : vector<1x16x16xf32>
      %226 = arith.addf %176, %225 : vector<1x16x16xf32>
      %c8_234 = arith.constant 8 : index
      %227 = memref.load %arg2[%c8_234] : memref<98xf32, #tpu.memory_space<smem>>
      %c0_235 = arith.constant 0 : index
      %c0_236 = arith.constant 0 : index
      %c1_237 = arith.constant 1 : index
      %c1_238 = arith.constant 1 : index
      %228 = vector.load %arg7[%c0_235, %c0_236, %c1_237, %c1_238] : memref<1x2x22x22xf32, #tpu.memory_space<vmem>>, vector<1x1x16x16xf32>
      %229 = vector.shape_cast %228 : vector<1x1x16x16xf32> to vector<1x16x16xf32>
      %230 = vector.broadcast %227 : f32 to vector<1x16x16xf32>
      %231 = arith.mulf %230, %229 : vector<1x16x16xf32>
      %232 = arith.addf %226, %231 : vector<1x16x16xf32>
      %c9_239 = arith.constant 9 : index
      %233 = memref.load %arg2[%c9_239] : memref<98xf32, #tpu.memory_space<smem>>
      %c0_240 = arith.constant 0 : index
      %c0_241 = arith.constant 0 : index
      %c1_242 = arith.constant 1 : index
      %c2_243 = arith.constant 2 : index
      %234 = vector.load %arg7[%c0_240, %c0_241, %c1_242, %c2_243] : memref<1x2x22x22xf32, #tpu.memory_space<vmem>>, vector<1x1x16x16xf32>
      %235 = vector.shape_cast %234 : vector<1x1x16x16xf32> to vector<1x16x16xf32>
      %236 = vector.broadcast %233 : f32 to vector<1x16x16xf32>
      %237 = arith.mulf %236, %235 : vector<1x16x16xf32>
      %238 = arith.addf %232, %237 : vector<1x16x16xf32>
      %c10_244 = arith.constant 10 : index
      %239 = memref.load %arg2[%c10_244] : memref<98xf32, #tpu.memory_space<smem>>
      %c0_245 = arith.constant 0 : index
      %c0_246 = arith.constant 0 : index
      %c1_247 = arith.constant 1 : index
      %c3_248 = arith.constant 3 : index
      %240 = vector.load %arg7[%c0_245, %c0_246, %c1_247, %c3_248] : memref<1x2x22x22xf32, #tpu.memory_space<vmem>>, vector<1x1x16x16xf32>
      %241 = vector.shape_cast %240 : vector<1x1x16x16xf32> to vector<1x16x16xf32>
      %242 = vector.broadcast %239 : f32 to vector<1x16x16xf32>
      %243 = arith.mulf %242, %241 : vector<1x16x16xf32>
      %244 = arith.addf %238, %243 : vector<1x16x16xf32>
      %c11_249 = arith.constant 11 : index
      %245 = memref.load %arg2[%c11_249] : memref<98xf32, #tpu.memory_space<smem>>
      %c0_250 = arith.constant 0 : index
      %c0_251 = arith.constant 0 : index
      %c1_252 = arith.constant 1 : index
      %c4_253 = arith.constant 4 : index
      %246 = vector.load %arg7[%c0_250, %c0_251, %c1_252, %c4_253] : memref<1x2x22x22xf32, #tpu.memory_space<vmem>>, vector<1x1x16x16xf32>
      %247 = vector.shape_cast %246 : vector<1x1x16x16xf32> to vector<1x16x16xf32>
      %248 = vector.broadcast %245 : f32 to vector<1x16x16xf32>
      %249 = arith.mulf %248, %247 : vector<1x16x16xf32>
      %250 = arith.addf %244, %249 : vector<1x16x16xf32>
      %c12_254 = arith.constant 12 : index
      %251 = memref.load %arg2[%c12_254] : memref<98xf32, #tpu.memory_space<smem>>
      %c0_255 = arith.constant 0 : index
      %c0_256 = arith.constant 0 : index
      %c1_257 = arith.constant 1 : index
      %c5_258 = arith.constant 5 : index
      %252 = vector.load %arg7[%c0_255, %c0_256, %c1_257, %c5_258] : memref<1x2x22x22xf32, #tpu.memory_space<vmem>>, vector<1x1x16x16xf32>
      %253 = vector.shape_cast %252 : vector<1x1x16x16xf32> to vector<1x16x16xf32>
      %254 = vector.broadcast %251 : f32 to vector<1x16x16xf32>
      %255 = arith.mulf %254, %253 : vector<1x16x16xf32>
      %256 = arith.addf %250, %255 : vector<1x16x16xf32>
      %c13_259 = arith.constant 13 : index
      %257 = memref.load %arg2[%c13_259] : memref<98xf32, #tpu.memory_space<smem>>
      %c0_260 = arith.constant 0 : index
      %c0_261 = arith.constant 0 : index
      %c1_262 = arith.constant 1 : index
      %c6_263 = arith.constant 6 : index
      %258 = vector.load %arg7[%c0_260, %c0_261, %c1_262, %c6_263] : memref<1x2x22x22xf32, #tpu.memory_space<vmem>>, vector<1x1x16x16xf32>
      %259 = vector.shape_cast %258 : vector<1x1x16x16xf32> to vector<1x16x16xf32>
      %260 = vector.broadcast %257 : f32 to vector<1x16x16xf32>
      %261 = arith.mulf %260, %259 : vector<1x16x16xf32>
      %262 = arith.addf %256, %261 : vector<1x16x16xf32>
      %c14_264 = arith.constant 14 : index
      %263 = memref.load %arg2[%c14_264] : memref<98xf32, #tpu.memory_space<smem>>
      %c0_265 = arith.constant 0 : index
      %c0_266 = arith.constant 0 : index
      %c2_267 = arith.constant 2 : index
      %c0_268 = arith.constant 0 : index
      %264 = vector.load %arg7[%c0_265, %c0_266, %c2_267, %c0_268] : memref<1x2x22x22xf32, #tpu.memory_space<vmem>>, vector<1x1x16x16xf32>
      %265 = vector.shape_cast %264 : vector<1x1x16x16xf32> to vector<1x16x16xf32>
      %266 = vector.broadcast %263 : f32 to vector<1x16x16xf32>
      %267 = arith.mulf %266, %265 : vector<1x16x16xf32>
      %268 = arith.addf %220, %267 : vector<1x16x16xf32>
      %c15_269 = arith.constant 15 : index
      %269 = memref.load %arg2[%c15_269] : memref<98xf32, #tpu.memory_space<smem>>
      %c0_270 = arith.constant 0 : index
      %c0_271 = arith.constant 0 : index
      %c2_272 = arith.constant 2 : index
      %c1_273 = arith.constant 1 : index
      %270 = vector.load %arg7[%c0_270, %c0_271, %c2_272, %c1_273] : memref<1x2x22x22xf32, #tpu.memory_space<vmem>>, vector<1x1x16x16xf32>
      %271 = vector.shape_cast %270 : vector<1x1x16x16xf32> to vector<1x16x16xf32>
      %272 = vector.broadcast %269 : f32 to vector<1x16x16xf32>
      %273 = arith.mulf %272, %271 : vector<1x16x16xf32>
      %274 = arith.addf %268, %273 : vector<1x16x16xf32>
      %c16_274 = arith.constant 16 : index
      %275 = memref.load %arg2[%c16_274] : memref<98xf32, #tpu.memory_space<smem>>
      %c0_275 = arith.constant 0 : index
      %c0_276 = arith.constant 0 : index
      %c2_277 = arith.constant 2 : index
      %c2_278 = arith.constant 2 : index
      %276 = vector.load %arg7[%c0_275, %c0_276, %c2_277, %c2_278] : memref<1x2x22x22xf32, #tpu.memory_space<vmem>>, vector<1x1x16x16xf32>
      %277 = vector.shape_cast %276 : vector<1x1x16x16xf32> to vector<1x16x16xf32>
      %278 = vector.broadcast %275 : f32 to vector<1x16x16xf32>
      %279 = arith.mulf %278, %277 : vector<1x16x16xf32>
      %280 = arith.addf %274, %279 : vector<1x16x16xf32>
      %c17_279 = arith.constant 17 : index
      %281 = memref.load %arg2[%c17_279] : memref<98xf32, #tpu.memory_space<smem>>
      %c0_280 = arith.constant 0 : index
      %c0_281 = arith.constant 0 : index
      %c2_282 = arith.constant 2 : index
      %c3_283 = arith.constant 3 : index
      %282 = vector.load %arg7[%c0_280, %c0_281, %c2_282, %c3_283] : memref<1x2x22x22xf32, #tpu.memory_space<vmem>>, vector<1x1x16x16xf32>
      %283 = vector.shape_cast %282 : vector<1x1x16x16xf32> to vector<1x16x16xf32>
      %284 = vector.broadcast %281 : f32 to vector<1x16x16xf32>
      %285 = arith.mulf %284, %283 : vector<1x16x16xf32>
      %286 = arith.addf %280, %285 : vector<1x16x16xf32>
      %c18_284 = arith.constant 18 : index
      %287 = memref.load %arg2[%c18_284] : memref<98xf32, #tpu.memory_space<smem>>
      %c0_285 = arith.constant 0 : index
      %c0_286 = arith.constant 0 : index
      %c2_287 = arith.constant 2 : index
      %c4_288 = arith.constant 4 : index
      %288 = vector.load %arg7[%c0_285, %c0_286, %c2_287, %c4_288] : memref<1x2x22x22xf32, #tpu.memory_space<vmem>>, vector<1x1x16x16xf32>
      %289 = vector.shape_cast %288 : vector<1x1x16x16xf32> to vector<1x16x16xf32>
      %290 = vector.broadcast %287 : f32 to vector<1x16x16xf32>
      %291 = arith.mulf %290, %289 : vector<1x16x16xf32>
      %292 = arith.addf %286, %291 : vector<1x16x16xf32>
      %c19 = arith.constant 19 : index
      %293 = memref.load %arg2[%c19] : memref<98xf32, #tpu.memory_space<smem>>
      %c0_289 = arith.constant 0 : index
      %c0_290 = arith.constant 0 : index
      %c2_291 = arith.constant 2 : index
      %c5_292 = arith.constant 5 : index
      %294 = vector.load %arg7[%c0_289, %c0_290, %c2_291, %c5_292] : memref<1x2x22x22xf32, #tpu.memory_space<vmem>>, vector<1x1x16x16xf32>
      %295 = vector.shape_cast %294 : vector<1x1x16x16xf32> to vector<1x16x16xf32>
      %296 = vector.broadcast %293 : f32 to vector<1x16x16xf32>
      %297 = arith.mulf %296, %295 : vector<1x16x16xf32>
      %298 = arith.addf %292, %297 : vector<1x16x16xf32>
      %c20 = arith.constant 20 : index
      %299 = memref.load %arg2[%c20] : memref<98xf32, #tpu.memory_space<smem>>
      %c0_293 = arith.constant 0 : index
      %c0_294 = arith.constant 0 : index
      %c2_295 = arith.constant 2 : index
      %c6_296 = arith.constant 6 : index
      %300 = vector.load %arg7[%c0_293, %c0_294, %c2_295, %c6_296] : memref<1x2x22x22xf32, #tpu.memory_space<vmem>>, vector<1x1x16x16xf32>
      %301 = vector.shape_cast %300 : vector<1x1x16x16xf32> to vector<1x16x16xf32>
      %302 = vector.broadcast %299 : f32 to vector<1x16x16xf32>
      %303 = arith.mulf %302, %301 : vector<1x16x16xf32>
      %304 = arith.addf %298, %303 : vector<1x16x16xf32>
      %c21 = arith.constant 21 : index
      %305 = memref.load %arg2[%c21] : memref<98xf32, #tpu.memory_space<smem>>
      %c0_297 = arith.constant 0 : index
      %c0_298 = arith.constant 0 : index
      %c3_299 = arith.constant 3 : index
      %c0_300 = arith.constant 0 : index
      %306 = vector.load %arg7[%c0_297, %c0_298, %c3_299, %c0_300] : memref<1x2x22x22xf32, #tpu.memory_space<vmem>>, vector<1x1x16x16xf32>
      %307 = vector.shape_cast %306 : vector<1x1x16x16xf32> to vector<1x16x16xf32>
      %308 = vector.broadcast %305 : f32 to vector<1x16x16xf32>
      %309 = arith.mulf %308, %307 : vector<1x16x16xf32>
      %310 = arith.addf %262, %309 : vector<1x16x16xf32>
      %c22 = arith.constant 22 : index
      %311 = memref.load %arg2[%c22] : memref<98xf32, #tpu.memory_space<smem>>
      %c0_301 = arith.constant 0 : index
      %c0_302 = arith.constant 0 : index
      %c3_303 = arith.constant 3 : index
      %c1_304 = arith.constant 1 : index
      %312 = vector.load %arg7[%c0_301, %c0_302, %c3_303, %c1_304] : memref<1x2x22x22xf32, #tpu.memory_space<vmem>>, vector<1x1x16x16xf32>
      %313 = vector.shape_cast %312 : vector<1x1x16x16xf32> to vector<1x16x16xf32>
      %314 = vector.broadcast %311 : f32 to vector<1x16x16xf32>
      %315 = arith.mulf %314, %313 : vector<1x16x16xf32>
      %316 = arith.addf %310, %315 : vector<1x16x16xf32>
      %c23 = arith.constant 23 : index
      %317 = memref.load %arg2[%c23] : memref<98xf32, #tpu.memory_space<smem>>
      %c0_305 = arith.constant 0 : index
      %c0_306 = arith.constant 0 : index
      %c3_307 = arith.constant 3 : index
      %c2_308 = arith.constant 2 : index
      %318 = vector.load %arg7[%c0_305, %c0_306, %c3_307, %c2_308] : memref<1x2x22x22xf32, #tpu.memory_space<vmem>>, vector<1x1x16x16xf32>
      %319 = vector.shape_cast %318 : vector<1x1x16x16xf32> to vector<1x16x16xf32>
      %320 = vector.broadcast %317 : f32 to vector<1x16x16xf32>
      %321 = arith.mulf %320, %319 : vector<1x16x16xf32>
      %322 = arith.addf %316, %321 : vector<1x16x16xf32>
      %c24 = arith.constant 24 : index
      %323 = memref.load %arg2[%c24] : memref<98xf32, #tpu.memory_space<smem>>
      %c0_309 = arith.constant 0 : index
      %c0_310 = arith.constant 0 : index
      %c3_311 = arith.constant 3 : index
      %c3_312 = arith.constant 3 : index
      %324 = vector.load %arg7[%c0_309, %c0_310, %c3_311, %c3_312] : memref<1x2x22x22xf32, #tpu.memory_space<vmem>>, vector<1x1x16x16xf32>
      %325 = vector.shape_cast %324 : vector<1x1x16x16xf32> to vector<1x16x16xf32>
      %326 = vector.broadcast %323 : f32 to vector<1x16x16xf32>
      %327 = arith.mulf %326, %325 : vector<1x16x16xf32>
      %328 = arith.addf %322, %327 : vector<1x16x16xf32>
      %c25 = arith.constant 25 : index
      %329 = memref.load %arg2[%c25] : memref<98xf32, #tpu.memory_space<smem>>
      %c0_313 = arith.constant 0 : index
      %c0_314 = arith.constant 0 : index
      %c3_315 = arith.constant 3 : index
      %c4_316 = arith.constant 4 : index
      %330 = vector.load %arg7[%c0_313, %c0_314, %c3_315, %c4_316] : memref<1x2x22x22xf32, #tpu.memory_space<vmem>>, vector<1x1x16x16xf32>
      %331 = vector.shape_cast %330 : vector<1x1x16x16xf32> to vector<1x16x16xf32>
      %332 = vector.broadcast %329 : f32 to vector<1x16x16xf32>
      %333 = arith.mulf %332, %331 : vector<1x16x16xf32>
      %334 = arith.addf %328, %333 : vector<1x16x16xf32>
      %c26 = arith.constant 26 : index
      %335 = memref.load %arg2[%c26] : memref<98xf32, #tpu.memory_space<smem>>
      %c0_317 = arith.constant 0 : index
      %c0_318 = arith.constant 0 : index
      %c3_319 = arith.constant 3 : index
      %c5_320 = arith.constant 5 : index
      %336 = vector.load %arg7[%c0_317, %c0_318, %c3_319, %c5_320] : memref<1x2x22x22xf32, #tpu.memory_space<vmem>>, vector<1x1x16x16xf32>
      %337 = vector.shape_cast %336 : vector<1x1x16x16xf32> to vector<1x16x16xf32>
      %338 = vector.broadcast %335 : f32 to vector<1x16x16xf32>
      %339 = arith.mulf %338, %337 : vector<1x16x16xf32>
      %340 = arith.addf %334, %339 : vector<1x16x16xf32>
      %c27 = arith.constant 27 : index
      %341 = memref.load %arg2[%c27] : memref<98xf32, #tpu.memory_space<smem>>
      %c0_321 = arith.constant 0 : index
      %c0_322 = arith.constant 0 : index
      %c3_323 = arith.constant 3 : index
      %c6_324 = arith.constant 6 : index
      %342 = vector.load %arg7[%c0_321, %c0_322, %c3_323, %c6_324] : memref<1x2x22x22xf32, #tpu.memory_space<vmem>>, vector<1x1x16x16xf32>
      %343 = vector.shape_cast %342 : vector<1x1x16x16xf32> to vector<1x16x16xf32>
      %344 = vector.broadcast %341 : f32 to vector<1x16x16xf32>
      %345 = arith.mulf %344, %343 : vector<1x16x16xf32>
      %346 = arith.addf %340, %345 : vector<1x16x16xf32>
      %c28 = arith.constant 28 : index
      %347 = memref.load %arg2[%c28] : memref<98xf32, #tpu.memory_space<smem>>
      %c0_325 = arith.constant 0 : index
      %c0_326 = arith.constant 0 : index
      %c4_327 = arith.constant 4 : index
      %c0_328 = arith.constant 0 : index
      %348 = vector.load %arg7[%c0_325, %c0_326, %c4_327, %c0_328] : memref<1x2x22x22xf32, #tpu.memory_space<vmem>>, vector<1x1x16x16xf32>
      %349 = vector.shape_cast %348 : vector<1x1x16x16xf32> to vector<1x16x16xf32>
      %350 = vector.broadcast %347 : f32 to vector<1x16x16xf32>
      %351 = arith.mulf %350, %349 : vector<1x16x16xf32>
      %352 = arith.addf %304, %351 : vector<1x16x16xf32>
      %c29 = arith.constant 29 : index
      %353 = memref.load %arg2[%c29] : memref<98xf32, #tpu.memory_space<smem>>
      %c0_329 = arith.constant 0 : index
      %c0_330 = arith.constant 0 : index
      %c4_331 = arith.constant 4 : index
      %c1_332 = arith.constant 1 : index
      %354 = vector.load %arg7[%c0_329, %c0_330, %c4_331, %c1_332] : memref<1x2x22x22xf32, #tpu.memory_space<vmem>>, vector<1x1x16x16xf32>
      %355 = vector.shape_cast %354 : vector<1x1x16x16xf32> to vector<1x16x16xf32>
      %356 = vector.broadcast %353 : f32 to vector<1x16x16xf32>
      %357 = arith.mulf %356, %355 : vector<1x16x16xf32>
      %358 = arith.addf %352, %357 : vector<1x16x16xf32>
      %c30 = arith.constant 30 : index
      %359 = memref.load %arg2[%c30] : memref<98xf32, #tpu.memory_space<smem>>
      %c0_333 = arith.constant 0 : index
      %c0_334 = arith.constant 0 : index
      %c4_335 = arith.constant 4 : index
      %c2_336 = arith.constant 2 : index
      %360 = vector.load %arg7[%c0_333, %c0_334, %c4_335, %c2_336] : memref<1x2x22x22xf32, #tpu.memory_space<vmem>>, vector<1x1x16x16xf32>
      %361 = vector.shape_cast %360 : vector<1x1x16x16xf32> to vector<1x16x16xf32>
      %362 = vector.broadcast %359 : f32 to vector<1x16x16xf32>
      %363 = arith.mulf %362, %361 : vector<1x16x16xf32>
      %364 = arith.addf %358, %363 : vector<1x16x16xf32>
      %c31 = arith.constant 31 : index
      %365 = memref.load %arg2[%c31] : memref<98xf32, #tpu.memory_space<smem>>
      %c0_337 = arith.constant 0 : index
      %c0_338 = arith.constant 0 : index
      %c4_339 = arith.constant 4 : index
      %c3_340 = arith.constant 3 : index
      %366 = vector.load %arg7[%c0_337, %c0_338, %c4_339, %c3_340] : memref<1x2x22x22xf32, #tpu.memory_space<vmem>>, vector<1x1x16x16xf32>
      %367 = vector.shape_cast %366 : vector<1x1x16x16xf32> to vector<1x16x16xf32>
      %368 = vector.broadcast %365 : f32 to vector<1x16x16xf32>
      %369 = arith.mulf %368, %367 : vector<1x16x16xf32>
      %370 = arith.addf %364, %369 : vector<1x16x16xf32>
      %c32_341 = arith.constant 32 : index
      %371 = memref.load %arg2[%c32_341] : memref<98xf32, #tpu.memory_space<smem>>
      %c0_342 = arith.constant 0 : index
      %c0_343 = arith.constant 0 : index
      %c4_344 = arith.constant 4 : index
      %c4_345 = arith.constant 4 : index
      %372 = vector.load %arg7[%c0_342, %c0_343, %c4_344, %c4_345] : memref<1x2x22x22xf32, #tpu.memory_space<vmem>>, vector<1x1x16x16xf32>
      %373 = vector.shape_cast %372 : vector<1x1x16x16xf32> to vector<1x16x16xf32>
      %374 = vector.broadcast %371 : f32 to vector<1x16x16xf32>
      %375 = arith.mulf %374, %373 : vector<1x16x16xf32>
      %376 = arith.addf %370, %375 : vector<1x16x16xf32>
      %c33 = arith.constant 33 : index
      %377 = memref.load %arg2[%c33] : memref<98xf32, #tpu.memory_space<smem>>
      %c0_346 = arith.constant 0 : index
      %c0_347 = arith.constant 0 : index
      %c4_348 = arith.constant 4 : index
      %c5_349 = arith.constant 5 : index
      %378 = vector.load %arg7[%c0_346, %c0_347, %c4_348, %c5_349] : memref<1x2x22x22xf32, #tpu.memory_space<vmem>>, vector<1x1x16x16xf32>
      %379 = vector.shape_cast %378 : vector<1x1x16x16xf32> to vector<1x16x16xf32>
      %380 = vector.broadcast %377 : f32 to vector<1x16x16xf32>
      %381 = arith.mulf %380, %379 : vector<1x16x16xf32>
      %382 = arith.addf %376, %381 : vector<1x16x16xf32>
      %c34 = arith.constant 34 : index
      %383 = memref.load %arg2[%c34] : memref<98xf32, #tpu.memory_space<smem>>
      %c0_350 = arith.constant 0 : index
      %c0_351 = arith.constant 0 : index
      %c4_352 = arith.constant 4 : index
      %c6_353 = arith.constant 6 : index
      %384 = vector.load %arg7[%c0_350, %c0_351, %c4_352, %c6_353] : memref<1x2x22x22xf32, #tpu.memory_space<vmem>>, vector<1x1x16x16xf32>
      %385 = vector.shape_cast %384 : vector<1x1x16x16xf32> to vector<1x16x16xf32>
      %386 = vector.broadcast %383 : f32 to vector<1x16x16xf32>
      %387 = arith.mulf %386, %385 : vector<1x16x16xf32>
      %388 = arith.addf %382, %387 : vector<1x16x16xf32>
      %c35 = arith.constant 35 : index
      %389 = memref.load %arg2[%c35] : memref<98xf32, #tpu.memory_space<smem>>
      %c0_354 = arith.constant 0 : index
      %c0_355 = arith.constant 0 : index
      %c5_356 = arith.constant 5 : index
      %c0_357 = arith.constant 0 : index
      %390 = vector.load %arg7[%c0_354, %c0_355, %c5_356, %c0_357] : memref<1x2x22x22xf32, #tpu.memory_space<vmem>>, vector<1x1x16x16xf32>
      %391 = vector.shape_cast %390 : vector<1x1x16x16xf32> to vector<1x16x16xf32>
      %392 = vector.broadcast %389 : f32 to vector<1x16x16xf32>
      %393 = arith.mulf %392, %391 : vector<1x16x16xf32>
      %394 = arith.addf %346, %393 : vector<1x16x16xf32>
      %c36 = arith.constant 36 : index
      %395 = memref.load %arg2[%c36] : memref<98xf32, #tpu.memory_space<smem>>
      %c0_358 = arith.constant 0 : index
      %c0_359 = arith.constant 0 : index
      %c5_360 = arith.constant 5 : index
      %c1_361 = arith.constant 1 : index
      %396 = vector.load %arg7[%c0_358, %c0_359, %c5_360, %c1_361] : memref<1x2x22x22xf32, #tpu.memory_space<vmem>>, vector<1x1x16x16xf32>
      %397 = vector.shape_cast %396 : vector<1x1x16x16xf32> to vector<1x16x16xf32>
      %398 = vector.broadcast %395 : f32 to vector<1x16x16xf32>
      %399 = arith.mulf %398, %397 : vector<1x16x16xf32>
      %400 = arith.addf %394, %399 : vector<1x16x16xf32>
      %c37 = arith.constant 37 : index
      %401 = memref.load %arg2[%c37] : memref<98xf32, #tpu.memory_space<smem>>
      %c0_362 = arith.constant 0 : index
      %c0_363 = arith.constant 0 : index
      %c5_364 = arith.constant 5 : index
      %c2_365 = arith.constant 2 : index
      %402 = vector.load %arg7[%c0_362, %c0_363, %c5_364, %c2_365] : memref<1x2x22x22xf32, #tpu.memory_space<vmem>>, vector<1x1x16x16xf32>
      %403 = vector.shape_cast %402 : vector<1x1x16x16xf32> to vector<1x16x16xf32>
      %404 = vector.broadcast %401 : f32 to vector<1x16x16xf32>
      %405 = arith.mulf %404, %403 : vector<1x16x16xf32>
      %406 = arith.addf %400, %405 : vector<1x16x16xf32>
      %c38 = arith.constant 38 : index
      %407 = memref.load %arg2[%c38] : memref<98xf32, #tpu.memory_space<smem>>
      %c0_366 = arith.constant 0 : index
      %c0_367 = arith.constant 0 : index
      %c5_368 = arith.constant 5 : index
      %c3_369 = arith.constant 3 : index
      %408 = vector.load %arg7[%c0_366, %c0_367, %c5_368, %c3_369] : memref<1x2x22x22xf32, #tpu.memory_space<vmem>>, vector<1x1x16x16xf32>
      %409 = vector.shape_cast %408 : vector<1x1x16x16xf32> to vector<1x16x16xf32>
      %410 = vector.broadcast %407 : f32 to vector<1x16x16xf32>
      %411 = arith.mulf %410, %409 : vector<1x16x16xf32>
      %412 = arith.addf %406, %411 : vector<1x16x16xf32>
      %c39 = arith.constant 39 : index
      %413 = memref.load %arg2[%c39] : memref<98xf32, #tpu.memory_space<smem>>
      %c0_370 = arith.constant 0 : index
      %c0_371 = arith.constant 0 : index
      %c5_372 = arith.constant 5 : index
      %c4_373 = arith.constant 4 : index
      %414 = vector.load %arg7[%c0_370, %c0_371, %c5_372, %c4_373] : memref<1x2x22x22xf32, #tpu.memory_space<vmem>>, vector<1x1x16x16xf32>
      %415 = vector.shape_cast %414 : vector<1x1x16x16xf32> to vector<1x16x16xf32>
      %416 = vector.broadcast %413 : f32 to vector<1x16x16xf32>
      %417 = arith.mulf %416, %415 : vector<1x16x16xf32>
      %418 = arith.addf %412, %417 : vector<1x16x16xf32>
      %c40 = arith.constant 40 : index
      %419 = memref.load %arg2[%c40] : memref<98xf32, #tpu.memory_space<smem>>
      %c0_374 = arith.constant 0 : index
      %c0_375 = arith.constant 0 : index
      %c5_376 = arith.constant 5 : index
      %c5_377 = arith.constant 5 : index
      %420 = vector.load %arg7[%c0_374, %c0_375, %c5_376, %c5_377] : memref<1x2x22x22xf32, #tpu.memory_space<vmem>>, vector<1x1x16x16xf32>
      %421 = vector.shape_cast %420 : vector<1x1x16x16xf32> to vector<1x16x16xf32>
      %422 = vector.broadcast %419 : f32 to vector<1x16x16xf32>
      %423 = arith.mulf %422, %421 : vector<1x16x16xf32>
      %424 = arith.addf %418, %423 : vector<1x16x16xf32>
      %c41 = arith.constant 41 : index
      %425 = memref.load %arg2[%c41] : memref<98xf32, #tpu.memory_space<smem>>
      %c0_378 = arith.constant 0 : index
      %c0_379 = arith.constant 0 : index
      %c5_380 = arith.constant 5 : index
      %c6_381 = arith.constant 6 : index
      %426 = vector.load %arg7[%c0_378, %c0_379, %c5_380, %c6_381] : memref<1x2x22x22xf32, #tpu.memory_space<vmem>>, vector<1x1x16x16xf32>
      %427 = vector.shape_cast %426 : vector<1x1x16x16xf32> to vector<1x16x16xf32>
      %428 = vector.broadcast %425 : f32 to vector<1x16x16xf32>
      %429 = arith.mulf %428, %427 : vector<1x16x16xf32>
      %430 = arith.addf %424, %429 : vector<1x16x16xf32>
      %c42 = arith.constant 42 : index
      %431 = memref.load %arg2[%c42] : memref<98xf32, #tpu.memory_space<smem>>
      %c0_382 = arith.constant 0 : index
      %c0_383 = arith.constant 0 : index
      %c6_384 = arith.constant 6 : index
      %c0_385 = arith.constant 0 : index
      %432 = vector.load %arg7[%c0_382, %c0_383, %c6_384, %c0_385] : memref<1x2x22x22xf32, #tpu.memory_space<vmem>>, vector<1x1x16x16xf32>
      %433 = vector.shape_cast %432 : vector<1x1x16x16xf32> to vector<1x16x16xf32>
      %434 = vector.broadcast %431 : f32 to vector<1x16x16xf32>
      %435 = arith.mulf %434, %433 : vector<1x16x16xf32>
      %436 = arith.addf %388, %435 : vector<1x16x16xf32>
      %c43 = arith.constant 43 : index
      %437 = memref.load %arg2[%c43] : memref<98xf32, #tpu.memory_space<smem>>
      %c0_386 = arith.constant 0 : index
      %c0_387 = arith.constant 0 : index
      %c6_388 = arith.constant 6 : index
      %c1_389 = arith.constant 1 : index
      %438 = vector.load %arg7[%c0_386, %c0_387, %c6_388, %c1_389] : memref<1x2x22x22xf32, #tpu.memory_space<vmem>>, vector<1x1x16x16xf32>
      %439 = vector.shape_cast %438 : vector<1x1x16x16xf32> to vector<1x16x16xf32>
      %440 = vector.broadcast %437 : f32 to vector<1x16x16xf32>
      %441 = arith.mulf %440, %439 : vector<1x16x16xf32>
      %442 = arith.addf %436, %441 : vector<1x16x16xf32>
      %c44 = arith.constant 44 : index
      %443 = memref.load %arg2[%c44] : memref<98xf32, #tpu.memory_space<smem>>
      %c0_390 = arith.constant 0 : index
      %c0_391 = arith.constant 0 : index
      %c6_392 = arith.constant 6 : index
      %c2_393 = arith.constant 2 : index
      %444 = vector.load %arg7[%c0_390, %c0_391, %c6_392, %c2_393] : memref<1x2x22x22xf32, #tpu.memory_space<vmem>>, vector<1x1x16x16xf32>
      %445 = vector.shape_cast %444 : vector<1x1x16x16xf32> to vector<1x16x16xf32>
      %446 = vector.broadcast %443 : f32 to vector<1x16x16xf32>
      %447 = arith.mulf %446, %445 : vector<1x16x16xf32>
      %448 = arith.addf %442, %447 : vector<1x16x16xf32>
      %c45 = arith.constant 45 : index
      %449 = memref.load %arg2[%c45] : memref<98xf32, #tpu.memory_space<smem>>
      %c0_394 = arith.constant 0 : index
      %c0_395 = arith.constant 0 : index
      %c6_396 = arith.constant 6 : index
      %c3_397 = arith.constant 3 : index
      %450 = vector.load %arg7[%c0_394, %c0_395, %c6_396, %c3_397] : memref<1x2x22x22xf32, #tpu.memory_space<vmem>>, vector<1x1x16x16xf32>
      %451 = vector.shape_cast %450 : vector<1x1x16x16xf32> to vector<1x16x16xf32>
      %452 = vector.broadcast %449 : f32 to vector<1x16x16xf32>
      %453 = arith.mulf %452, %451 : vector<1x16x16xf32>
      %454 = arith.addf %448, %453 : vector<1x16x16xf32>
      %c46 = arith.constant 46 : index
      %455 = memref.load %arg2[%c46] : memref<98xf32, #tpu.memory_space<smem>>
      %c0_398 = arith.constant 0 : index
      %c0_399 = arith.constant 0 : index
      %c6_400 = arith.constant 6 : index
      %c4_401 = arith.constant 4 : index
      %456 = vector.load %arg7[%c0_398, %c0_399, %c6_400, %c4_401] : memref<1x2x22x22xf32, #tpu.memory_space<vmem>>, vector<1x1x16x16xf32>
      %457 = vector.shape_cast %456 : vector<1x1x16x16xf32> to vector<1x16x16xf32>
      %458 = vector.broadcast %455 : f32 to vector<1x16x16xf32>
      %459 = arith.mulf %458, %457 : vector<1x16x16xf32>
      %460 = arith.addf %454, %459 : vector<1x16x16xf32>
      %c47 = arith.constant 47 : index
      %461 = memref.load %arg2[%c47] : memref<98xf32, #tpu.memory_space<smem>>
      %c0_402 = arith.constant 0 : index
      %c0_403 = arith.constant 0 : index
      %c6_404 = arith.constant 6 : index
      %c5_405 = arith.constant 5 : index
      %462 = vector.load %arg7[%c0_402, %c0_403, %c6_404, %c5_405] : memref<1x2x22x22xf32, #tpu.memory_space<vmem>>, vector<1x1x16x16xf32>
      %463 = vector.shape_cast %462 : vector<1x1x16x16xf32> to vector<1x16x16xf32>
      %464 = vector.broadcast %461 : f32 to vector<1x16x16xf32>
      %465 = arith.mulf %464, %463 : vector<1x16x16xf32>
      %466 = arith.addf %460, %465 : vector<1x16x16xf32>
      %c48_406 = arith.constant 48 : index
      %467 = memref.load %arg2[%c48_406] : memref<98xf32, #tpu.memory_space<smem>>
      %c0_407 = arith.constant 0 : index
      %c0_408 = arith.constant 0 : index
      %c6_409 = arith.constant 6 : index
      %c6_410 = arith.constant 6 : index
      %468 = vector.load %arg7[%c0_407, %c0_408, %c6_409, %c6_410] : memref<1x2x22x22xf32, #tpu.memory_space<vmem>>, vector<1x1x16x16xf32>
      %469 = vector.shape_cast %468 : vector<1x1x16x16xf32> to vector<1x16x16xf32>
      %470 = vector.broadcast %467 : f32 to vector<1x16x16xf32>
      %471 = arith.mulf %470, %469 : vector<1x16x16xf32>
      %472 = arith.addf %466, %471 : vector<1x16x16xf32>
      %c49 = arith.constant 49 : index
      %473 = memref.load %arg2[%c49] : memref<98xf32, #tpu.memory_space<smem>>
      %c0_411 = arith.constant 0 : index
      %c1_412 = arith.constant 1 : index
      %c0_413 = arith.constant 0 : index
      %c0_414 = arith.constant 0 : index
      %474 = vector.load %arg7[%c0_411, %c1_412, %c0_413, %c0_414] : memref<1x2x22x22xf32, #tpu.memory_space<vmem>>, vector<1x1x16x16xf32>
      %475 = vector.shape_cast %474 : vector<1x1x16x16xf32> to vector<1x16x16xf32>
      %476 = vector.broadcast %473 : f32 to vector<1x16x16xf32>
      %477 = arith.mulf %476, %475 : vector<1x16x16xf32>
      %478 = arith.addf %177, %477 : vector<1x16x16xf32>
      %c50 = arith.constant 50 : index
      %479 = memref.load %arg2[%c50] : memref<98xf32, #tpu.memory_space<smem>>
      %c0_415 = arith.constant 0 : index
      %c1_416 = arith.constant 1 : index
      %c0_417 = arith.constant 0 : index
      %c1_418 = arith.constant 1 : index
      %480 = vector.load %arg7[%c0_415, %c1_416, %c0_417, %c1_418] : memref<1x2x22x22xf32, #tpu.memory_space<vmem>>, vector<1x1x16x16xf32>
      %481 = vector.shape_cast %480 : vector<1x1x16x16xf32> to vector<1x16x16xf32>
      %482 = vector.broadcast %479 : f32 to vector<1x16x16xf32>
      %483 = arith.mulf %482, %481 : vector<1x16x16xf32>
      %484 = arith.addf %478, %483 : vector<1x16x16xf32>
      %c51 = arith.constant 51 : index
      %485 = memref.load %arg2[%c51] : memref<98xf32, #tpu.memory_space<smem>>
      %c0_419 = arith.constant 0 : index
      %c1_420 = arith.constant 1 : index
      %c0_421 = arith.constant 0 : index
      %c2_422 = arith.constant 2 : index
      %486 = vector.load %arg7[%c0_419, %c1_420, %c0_421, %c2_422] : memref<1x2x22x22xf32, #tpu.memory_space<vmem>>, vector<1x1x16x16xf32>
      %487 = vector.shape_cast %486 : vector<1x1x16x16xf32> to vector<1x16x16xf32>
      %488 = vector.broadcast %485 : f32 to vector<1x16x16xf32>
      %489 = arith.mulf %488, %487 : vector<1x16x16xf32>
      %490 = arith.addf %484, %489 : vector<1x16x16xf32>
      %c52 = arith.constant 52 : index
      %491 = memref.load %arg2[%c52] : memref<98xf32, #tpu.memory_space<smem>>
      %c0_423 = arith.constant 0 : index
      %c1_424 = arith.constant 1 : index
      %c0_425 = arith.constant 0 : index
      %c3_426 = arith.constant 3 : index
      %492 = vector.load %arg7[%c0_423, %c1_424, %c0_425, %c3_426] : memref<1x2x22x22xf32, #tpu.memory_space<vmem>>, vector<1x1x16x16xf32>
      %493 = vector.shape_cast %492 : vector<1x1x16x16xf32> to vector<1x16x16xf32>
      %494 = vector.broadcast %491 : f32 to vector<1x16x16xf32>
      %495 = arith.mulf %494, %493 : vector<1x16x16xf32>
      %496 = arith.addf %490, %495 : vector<1x16x16xf32>
      %c53 = arith.constant 53 : index
      %497 = memref.load %arg2[%c53] : memref<98xf32, #tpu.memory_space<smem>>
      %c0_427 = arith.constant 0 : index
      %c1_428 = arith.constant 1 : index
      %c0_429 = arith.constant 0 : index
      %c4_430 = arith.constant 4 : index
      %498 = vector.load %arg7[%c0_427, %c1_428, %c0_429, %c4_430] : memref<1x2x22x22xf32, #tpu.memory_space<vmem>>, vector<1x1x16x16xf32>
      %499 = vector.shape_cast %498 : vector<1x1x16x16xf32> to vector<1x16x16xf32>
      %500 = vector.broadcast %497 : f32 to vector<1x16x16xf32>
      %501 = arith.mulf %500, %499 : vector<1x16x16xf32>
      %502 = arith.addf %496, %501 : vector<1x16x16xf32>
      %c54 = arith.constant 54 : index
      %503 = memref.load %arg2[%c54] : memref<98xf32, #tpu.memory_space<smem>>
      %c0_431 = arith.constant 0 : index
      %c1_432 = arith.constant 1 : index
      %c0_433 = arith.constant 0 : index
      %c5_434 = arith.constant 5 : index
      %504 = vector.load %arg7[%c0_431, %c1_432, %c0_433, %c5_434] : memref<1x2x22x22xf32, #tpu.memory_space<vmem>>, vector<1x1x16x16xf32>
      %505 = vector.shape_cast %504 : vector<1x1x16x16xf32> to vector<1x16x16xf32>
      %506 = vector.broadcast %503 : f32 to vector<1x16x16xf32>
      %507 = arith.mulf %506, %505 : vector<1x16x16xf32>
      %508 = arith.addf %502, %507 : vector<1x16x16xf32>
      %c55 = arith.constant 55 : index
      %509 = memref.load %arg2[%c55] : memref<98xf32, #tpu.memory_space<smem>>
      %c0_435 = arith.constant 0 : index
      %c1_436 = arith.constant 1 : index
      %c0_437 = arith.constant 0 : index
      %c6_438 = arith.constant 6 : index
      %510 = vector.load %arg7[%c0_435, %c1_436, %c0_437, %c6_438] : memref<1x2x22x22xf32, #tpu.memory_space<vmem>>, vector<1x1x16x16xf32>
      %511 = vector.shape_cast %510 : vector<1x1x16x16xf32> to vector<1x16x16xf32>
      %512 = vector.broadcast %509 : f32 to vector<1x16x16xf32>
      %513 = arith.mulf %512, %511 : vector<1x16x16xf32>
      %514 = arith.addf %508, %513 : vector<1x16x16xf32>
      %c56 = arith.constant 56 : index
      %515 = memref.load %arg2[%c56] : memref<98xf32, #tpu.memory_space<smem>>
      %c0_439 = arith.constant 0 : index
      %c1_440 = arith.constant 1 : index
      %c1_441 = arith.constant 1 : index
      %c0_442 = arith.constant 0 : index
      %516 = vector.load %arg7[%c0_439, %c1_440, %c1_441, %c0_442] : memref<1x2x22x22xf32, #tpu.memory_space<vmem>>, vector<1x1x16x16xf32>
      %517 = vector.shape_cast %516 : vector<1x1x16x16xf32> to vector<1x16x16xf32>
      %518 = vector.broadcast %515 : f32 to vector<1x16x16xf32>
      %519 = arith.mulf %518, %517 : vector<1x16x16xf32>
      %520 = arith.addf %178, %519 : vector<1x16x16xf32>
      %c57 = arith.constant 57 : index
      %521 = memref.load %arg2[%c57] : memref<98xf32, #tpu.memory_space<smem>>
      %c0_443 = arith.constant 0 : index
      %c1_444 = arith.constant 1 : index
      %c1_445 = arith.constant 1 : index
      %c1_446 = arith.constant 1 : index
      %522 = vector.load %arg7[%c0_443, %c1_444, %c1_445, %c1_446] : memref<1x2x22x22xf32, #tpu.memory_space<vmem>>, vector<1x1x16x16xf32>
      %523 = vector.shape_cast %522 : vector<1x1x16x16xf32> to vector<1x16x16xf32>
      %524 = vector.broadcast %521 : f32 to vector<1x16x16xf32>
      %525 = arith.mulf %524, %523 : vector<1x16x16xf32>
      %526 = arith.addf %520, %525 : vector<1x16x16xf32>
      %c58 = arith.constant 58 : index
      %527 = memref.load %arg2[%c58] : memref<98xf32, #tpu.memory_space<smem>>
      %c0_447 = arith.constant 0 : index
      %c1_448 = arith.constant 1 : index
      %c1_449 = arith.constant 1 : index
      %c2_450 = arith.constant 2 : index
      %528 = vector.load %arg7[%c0_447, %c1_448, %c1_449, %c2_450] : memref<1x2x22x22xf32, #tpu.memory_space<vmem>>, vector<1x1x16x16xf32>
      %529 = vector.shape_cast %528 : vector<1x1x16x16xf32> to vector<1x16x16xf32>
      %530 = vector.broadcast %527 : f32 to vector<1x16x16xf32>
      %531 = arith.mulf %530, %529 : vector<1x16x16xf32>
      %532 = arith.addf %526, %531 : vector<1x16x16xf32>
      %c59 = arith.constant 59 : index
      %533 = memref.load %arg2[%c59] : memref<98xf32, #tpu.memory_space<smem>>
      %c0_451 = arith.constant 0 : index
      %c1_452 = arith.constant 1 : index
      %c1_453 = arith.constant 1 : index
      %c3_454 = arith.constant 3 : index
      %534 = vector.load %arg7[%c0_451, %c1_452, %c1_453, %c3_454] : memref<1x2x22x22xf32, #tpu.memory_space<vmem>>, vector<1x1x16x16xf32>
      %535 = vector.shape_cast %534 : vector<1x1x16x16xf32> to vector<1x16x16xf32>
      %536 = vector.broadcast %533 : f32 to vector<1x16x16xf32>
      %537 = arith.mulf %536, %535 : vector<1x16x16xf32>
      %538 = arith.addf %532, %537 : vector<1x16x16xf32>
      %c60 = arith.constant 60 : index
      %539 = memref.load %arg2[%c60] : memref<98xf32, #tpu.memory_space<smem>>
      %c0_455 = arith.constant 0 : index
      %c1_456 = arith.constant 1 : index
      %c1_457 = arith.constant 1 : index
      %c4_458 = arith.constant 4 : index
      %540 = vector.load %arg7[%c0_455, %c1_456, %c1_457, %c4_458] : memref<1x2x22x22xf32, #tpu.memory_space<vmem>>, vector<1x1x16x16xf32>
      %541 = vector.shape_cast %540 : vector<1x1x16x16xf32> to vector<1x16x16xf32>
      %542 = vector.broadcast %539 : f32 to vector<1x16x16xf32>
      %543 = arith.mulf %542, %541 : vector<1x16x16xf32>
      %544 = arith.addf %538, %543 : vector<1x16x16xf32>
      %c61 = arith.constant 61 : index
      %545 = memref.load %arg2[%c61] : memref<98xf32, #tpu.memory_space<smem>>
      %c0_459 = arith.constant 0 : index
      %c1_460 = arith.constant 1 : index
      %c1_461 = arith.constant 1 : index
      %c5_462 = arith.constant 5 : index
      %546 = vector.load %arg7[%c0_459, %c1_460, %c1_461, %c5_462] : memref<1x2x22x22xf32, #tpu.memory_space<vmem>>, vector<1x1x16x16xf32>
      %547 = vector.shape_cast %546 : vector<1x1x16x16xf32> to vector<1x16x16xf32>
      %548 = vector.broadcast %545 : f32 to vector<1x16x16xf32>
      %549 = arith.mulf %548, %547 : vector<1x16x16xf32>
      %550 = arith.addf %544, %549 : vector<1x16x16xf32>
      %c62 = arith.constant 62 : index
      %551 = memref.load %arg2[%c62] : memref<98xf32, #tpu.memory_space<smem>>
      %c0_463 = arith.constant 0 : index
      %c1_464 = arith.constant 1 : index
      %c1_465 = arith.constant 1 : index
      %c6_466 = arith.constant 6 : index
      %552 = vector.load %arg7[%c0_463, %c1_464, %c1_465, %c6_466] : memref<1x2x22x22xf32, #tpu.memory_space<vmem>>, vector<1x1x16x16xf32>
      %553 = vector.shape_cast %552 : vector<1x1x16x16xf32> to vector<1x16x16xf32>
      %554 = vector.broadcast %551 : f32 to vector<1x16x16xf32>
      %555 = arith.mulf %554, %553 : vector<1x16x16xf32>
      %556 = arith.addf %550, %555 : vector<1x16x16xf32>
      %c63 = arith.constant 63 : index
      %557 = memref.load %arg2[%c63] : memref<98xf32, #tpu.memory_space<smem>>
      %c0_467 = arith.constant 0 : index
      %c1_468 = arith.constant 1 : index
      %c2_469 = arith.constant 2 : index
      %c0_470 = arith.constant 0 : index
      %558 = vector.load %arg7[%c0_467, %c1_468, %c2_469, %c0_470] : memref<1x2x22x22xf32, #tpu.memory_space<vmem>>, vector<1x1x16x16xf32>
      %559 = vector.shape_cast %558 : vector<1x1x16x16xf32> to vector<1x16x16xf32>
      %560 = vector.broadcast %557 : f32 to vector<1x16x16xf32>
      %561 = arith.mulf %560, %559 : vector<1x16x16xf32>
      %562 = arith.addf %514, %561 : vector<1x16x16xf32>
      %c64_471 = arith.constant 64 : index
      %563 = memref.load %arg2[%c64_471] : memref<98xf32, #tpu.memory_space<smem>>
      %c0_472 = arith.constant 0 : index
      %c1_473 = arith.constant 1 : index
      %c2_474 = arith.constant 2 : index
      %c1_475 = arith.constant 1 : index
      %564 = vector.load %arg7[%c0_472, %c1_473, %c2_474, %c1_475] : memref<1x2x22x22xf32, #tpu.memory_space<vmem>>, vector<1x1x16x16xf32>
      %565 = vector.shape_cast %564 : vector<1x1x16x16xf32> to vector<1x16x16xf32>
      %566 = vector.broadcast %563 : f32 to vector<1x16x16xf32>
      %567 = arith.mulf %566, %565 : vector<1x16x16xf32>
      %568 = arith.addf %562, %567 : vector<1x16x16xf32>
      %c65 = arith.constant 65 : index
      %569 = memref.load %arg2[%c65] : memref<98xf32, #tpu.memory_space<smem>>
      %c0_476 = arith.constant 0 : index
      %c1_477 = arith.constant 1 : index
      %c2_478 = arith.constant 2 : index
      %c2_479 = arith.constant 2 : index
      %570 = vector.load %arg7[%c0_476, %c1_477, %c2_478, %c2_479] : memref<1x2x22x22xf32, #tpu.memory_space<vmem>>, vector<1x1x16x16xf32>
      %571 = vector.shape_cast %570 : vector<1x1x16x16xf32> to vector<1x16x16xf32>
      %572 = vector.broadcast %569 : f32 to vector<1x16x16xf32>
      %573 = arith.mulf %572, %571 : vector<1x16x16xf32>
      %574 = arith.addf %568, %573 : vector<1x16x16xf32>
      %c66 = arith.constant 66 : index
      %575 = memref.load %arg2[%c66] : memref<98xf32, #tpu.memory_space<smem>>
      %c0_480 = arith.constant 0 : index
      %c1_481 = arith.constant 1 : index
      %c2_482 = arith.constant 2 : index
      %c3_483 = arith.constant 3 : index
      %576 = vector.load %arg7[%c0_480, %c1_481, %c2_482, %c3_483] : memref<1x2x22x22xf32, #tpu.memory_space<vmem>>, vector<1x1x16x16xf32>
      %577 = vector.shape_cast %576 : vector<1x1x16x16xf32> to vector<1x16x16xf32>
      %578 = vector.broadcast %575 : f32 to vector<1x16x16xf32>
      %579 = arith.mulf %578, %577 : vector<1x16x16xf32>
      %580 = arith.addf %574, %579 : vector<1x16x16xf32>
      %c67 = arith.constant 67 : index
      %581 = memref.load %arg2[%c67] : memref<98xf32, #tpu.memory_space<smem>>
      %c0_484 = arith.constant 0 : index
      %c1_485 = arith.constant 1 : index
      %c2_486 = arith.constant 2 : index
      %c4_487 = arith.constant 4 : index
      %582 = vector.load %arg7[%c0_484, %c1_485, %c2_486, %c4_487] : memref<1x2x22x22xf32, #tpu.memory_space<vmem>>, vector<1x1x16x16xf32>
      %583 = vector.shape_cast %582 : vector<1x1x16x16xf32> to vector<1x16x16xf32>
      %584 = vector.broadcast %581 : f32 to vector<1x16x16xf32>
      %585 = arith.mulf %584, %583 : vector<1x16x16xf32>
      %586 = arith.addf %580, %585 : vector<1x16x16xf32>
      %c68 = arith.constant 68 : index
      %587 = memref.load %arg2[%c68] : memref<98xf32, #tpu.memory_space<smem>>
      %c0_488 = arith.constant 0 : index
      %c1_489 = arith.constant 1 : index
      %c2_490 = arith.constant 2 : index
      %c5_491 = arith.constant 5 : index
      %588 = vector.load %arg7[%c0_488, %c1_489, %c2_490, %c5_491] : memref<1x2x22x22xf32, #tpu.memory_space<vmem>>, vector<1x1x16x16xf32>
      %589 = vector.shape_cast %588 : vector<1x1x16x16xf32> to vector<1x16x16xf32>
      %590 = vector.broadcast %587 : f32 to vector<1x16x16xf32>
      %591 = arith.mulf %590, %589 : vector<1x16x16xf32>
      %592 = arith.addf %586, %591 : vector<1x16x16xf32>
      %c69 = arith.constant 69 : index
      %593 = memref.load %arg2[%c69] : memref<98xf32, #tpu.memory_space<smem>>
      %c0_492 = arith.constant 0 : index
      %c1_493 = arith.constant 1 : index
      %c2_494 = arith.constant 2 : index
      %c6_495 = arith.constant 6 : index
      %594 = vector.load %arg7[%c0_492, %c1_493, %c2_494, %c6_495] : memref<1x2x22x22xf32, #tpu.memory_space<vmem>>, vector<1x1x16x16xf32>
      %595 = vector.shape_cast %594 : vector<1x1x16x16xf32> to vector<1x16x16xf32>
      %596 = vector.broadcast %593 : f32 to vector<1x16x16xf32>
      %597 = arith.mulf %596, %595 : vector<1x16x16xf32>
      %598 = arith.addf %592, %597 : vector<1x16x16xf32>
      %c70 = arith.constant 70 : index
      %599 = memref.load %arg2[%c70] : memref<98xf32, #tpu.memory_space<smem>>
      %c0_496 = arith.constant 0 : index
      %c1_497 = arith.constant 1 : index
      %c3_498 = arith.constant 3 : index
      %c0_499 = arith.constant 0 : index
      %600 = vector.load %arg7[%c0_496, %c1_497, %c3_498, %c0_499] : memref<1x2x22x22xf32, #tpu.memory_space<vmem>>, vector<1x1x16x16xf32>
      %601 = vector.shape_cast %600 : vector<1x1x16x16xf32> to vector<1x16x16xf32>
      %602 = vector.broadcast %599 : f32 to vector<1x16x16xf32>
      %603 = arith.mulf %602, %601 : vector<1x16x16xf32>
      %604 = arith.addf %556, %603 : vector<1x16x16xf32>
      %c71 = arith.constant 71 : index
      %605 = memref.load %arg2[%c71] : memref<98xf32, #tpu.memory_space<smem>>
      %c0_500 = arith.constant 0 : index
      %c1_501 = arith.constant 1 : index
      %c3_502 = arith.constant 3 : index
      %c1_503 = arith.constant 1 : index
      %606 = vector.load %arg7[%c0_500, %c1_501, %c3_502, %c1_503] : memref<1x2x22x22xf32, #tpu.memory_space<vmem>>, vector<1x1x16x16xf32>
      %607 = vector.shape_cast %606 : vector<1x1x16x16xf32> to vector<1x16x16xf32>
      %608 = vector.broadcast %605 : f32 to vector<1x16x16xf32>
      %609 = arith.mulf %608, %607 : vector<1x16x16xf32>
      %610 = arith.addf %604, %609 : vector<1x16x16xf32>
      %c72 = arith.constant 72 : index
      %611 = memref.load %arg2[%c72] : memref<98xf32, #tpu.memory_space<smem>>
      %c0_504 = arith.constant 0 : index
      %c1_505 = arith.constant 1 : index
      %c3_506 = arith.constant 3 : index
      %c2_507 = arith.constant 2 : index
      %612 = vector.load %arg7[%c0_504, %c1_505, %c3_506, %c2_507] : memref<1x2x22x22xf32, #tpu.memory_space<vmem>>, vector<1x1x16x16xf32>
      %613 = vector.shape_cast %612 : vector<1x1x16x16xf32> to vector<1x16x16xf32>
      %614 = vector.broadcast %611 : f32 to vector<1x16x16xf32>
      %615 = arith.mulf %614, %613 : vector<1x16x16xf32>
      %616 = arith.addf %610, %615 : vector<1x16x16xf32>
      %c73 = arith.constant 73 : index
      %617 = memref.load %arg2[%c73] : memref<98xf32, #tpu.memory_space<smem>>
      %c0_508 = arith.constant 0 : index
      %c1_509 = arith.constant 1 : index
      %c3_510 = arith.constant 3 : index
      %c3_511 = arith.constant 3 : index
      %618 = vector.load %arg7[%c0_508, %c1_509, %c3_510, %c3_511] : memref<1x2x22x22xf32, #tpu.memory_space<vmem>>, vector<1x1x16x16xf32>
      %619 = vector.shape_cast %618 : vector<1x1x16x16xf32> to vector<1x16x16xf32>
      %620 = vector.broadcast %617 : f32 to vector<1x16x16xf32>
      %621 = arith.mulf %620, %619 : vector<1x16x16xf32>
      %622 = arith.addf %616, %621 : vector<1x16x16xf32>
      %c74 = arith.constant 74 : index
      %623 = memref.load %arg2[%c74] : memref<98xf32, #tpu.memory_space<smem>>
      %c0_512 = arith.constant 0 : index
      %c1_513 = arith.constant 1 : index
      %c3_514 = arith.constant 3 : index
      %c4_515 = arith.constant 4 : index
      %624 = vector.load %arg7[%c0_512, %c1_513, %c3_514, %c4_515] : memref<1x2x22x22xf32, #tpu.memory_space<vmem>>, vector<1x1x16x16xf32>
      %625 = vector.shape_cast %624 : vector<1x1x16x16xf32> to vector<1x16x16xf32>
      %626 = vector.broadcast %623 : f32 to vector<1x16x16xf32>
      %627 = arith.mulf %626, %625 : vector<1x16x16xf32>
      %628 = arith.addf %622, %627 : vector<1x16x16xf32>
      %c75 = arith.constant 75 : index
      %629 = memref.load %arg2[%c75] : memref<98xf32, #tpu.memory_space<smem>>
      %c0_516 = arith.constant 0 : index
      %c1_517 = arith.constant 1 : index
      %c3_518 = arith.constant 3 : index
      %c5_519 = arith.constant 5 : index
      %630 = vector.load %arg7[%c0_516, %c1_517, %c3_518, %c5_519] : memref<1x2x22x22xf32, #tpu.memory_space<vmem>>, vector<1x1x16x16xf32>
      %631 = vector.shape_cast %630 : vector<1x1x16x16xf32> to vector<1x16x16xf32>
      %632 = vector.broadcast %629 : f32 to vector<1x16x16xf32>
      %633 = arith.mulf %632, %631 : vector<1x16x16xf32>
      %634 = arith.addf %628, %633 : vector<1x16x16xf32>
      %c76 = arith.constant 76 : index
      %635 = memref.load %arg2[%c76] : memref<98xf32, #tpu.memory_space<smem>>
      %c0_520 = arith.constant 0 : index
      %c1_521 = arith.constant 1 : index
      %c3_522 = arith.constant 3 : index
      %c6_523 = arith.constant 6 : index
      %636 = vector.load %arg7[%c0_520, %c1_521, %c3_522, %c6_523] : memref<1x2x22x22xf32, #tpu.memory_space<vmem>>, vector<1x1x16x16xf32>
      %637 = vector.shape_cast %636 : vector<1x1x16x16xf32> to vector<1x16x16xf32>
      %638 = vector.broadcast %635 : f32 to vector<1x16x16xf32>
      %639 = arith.mulf %638, %637 : vector<1x16x16xf32>
      %640 = arith.addf %634, %639 : vector<1x16x16xf32>
      %c77 = arith.constant 77 : index
      %641 = memref.load %arg2[%c77] : memref<98xf32, #tpu.memory_space<smem>>
      %c0_524 = arith.constant 0 : index
      %c1_525 = arith.constant 1 : index
      %c4_526 = arith.constant 4 : index
      %c0_527 = arith.constant 0 : index
      %642 = vector.load %arg7[%c0_524, %c1_525, %c4_526, %c0_527] : memref<1x2x22x22xf32, #tpu.memory_space<vmem>>, vector<1x1x16x16xf32>
      %643 = vector.shape_cast %642 : vector<1x1x16x16xf32> to vector<1x16x16xf32>
      %644 = vector.broadcast %641 : f32 to vector<1x16x16xf32>
      %645 = arith.mulf %644, %643 : vector<1x16x16xf32>
      %646 = arith.addf %598, %645 : vector<1x16x16xf32>
      %c78 = arith.constant 78 : index
      %647 = memref.load %arg2[%c78] : memref<98xf32, #tpu.memory_space<smem>>
      %c0_528 = arith.constant 0 : index
      %c1_529 = arith.constant 1 : index
      %c4_530 = arith.constant 4 : index
      %c1_531 = arith.constant 1 : index
      %648 = vector.load %arg7[%c0_528, %c1_529, %c4_530, %c1_531] : memref<1x2x22x22xf32, #tpu.memory_space<vmem>>, vector<1x1x16x16xf32>
      %649 = vector.shape_cast %648 : vector<1x1x16x16xf32> to vector<1x16x16xf32>
      %650 = vector.broadcast %647 : f32 to vector<1x16x16xf32>
      %651 = arith.mulf %650, %649 : vector<1x16x16xf32>
      %652 = arith.addf %646, %651 : vector<1x16x16xf32>
      %c79 = arith.constant 79 : index
      %653 = memref.load %arg2[%c79] : memref<98xf32, #tpu.memory_space<smem>>
      %c0_532 = arith.constant 0 : index
      %c1_533 = arith.constant 1 : index
      %c4_534 = arith.constant 4 : index
      %c2_535 = arith.constant 2 : index
      %654 = vector.load %arg7[%c0_532, %c1_533, %c4_534, %c2_535] : memref<1x2x22x22xf32, #tpu.memory_space<vmem>>, vector<1x1x16x16xf32>
      %655 = vector.shape_cast %654 : vector<1x1x16x16xf32> to vector<1x16x16xf32>
      %656 = vector.broadcast %653 : f32 to vector<1x16x16xf32>
      %657 = arith.mulf %656, %655 : vector<1x16x16xf32>
      %658 = arith.addf %652, %657 : vector<1x16x16xf32>
      %c80_536 = arith.constant 80 : index
      %659 = memref.load %arg2[%c80_536] : memref<98xf32, #tpu.memory_space<smem>>
      %c0_537 = arith.constant 0 : index
      %c1_538 = arith.constant 1 : index
      %c4_539 = arith.constant 4 : index
      %c3_540 = arith.constant 3 : index
      %660 = vector.load %arg7[%c0_537, %c1_538, %c4_539, %c3_540] : memref<1x2x22x22xf32, #tpu.memory_space<vmem>>, vector<1x1x16x16xf32>
      %661 = vector.shape_cast %660 : vector<1x1x16x16xf32> to vector<1x16x16xf32>
      %662 = vector.broadcast %659 : f32 to vector<1x16x16xf32>
      %663 = arith.mulf %662, %661 : vector<1x16x16xf32>
      %664 = arith.addf %658, %663 : vector<1x16x16xf32>
      %c81 = arith.constant 81 : index
      %665 = memref.load %arg2[%c81] : memref<98xf32, #tpu.memory_space<smem>>
      %c0_541 = arith.constant 0 : index
      %c1_542 = arith.constant 1 : index
      %c4_543 = arith.constant 4 : index
      %c4_544 = arith.constant 4 : index
      %666 = vector.load %arg7[%c0_541, %c1_542, %c4_543, %c4_544] : memref<1x2x22x22xf32, #tpu.memory_space<vmem>>, vector<1x1x16x16xf32>
      %667 = vector.shape_cast %666 : vector<1x1x16x16xf32> to vector<1x16x16xf32>
      %668 = vector.broadcast %665 : f32 to vector<1x16x16xf32>
      %669 = arith.mulf %668, %667 : vector<1x16x16xf32>
      %670 = arith.addf %664, %669 : vector<1x16x16xf32>
      %c82 = arith.constant 82 : index
      %671 = memref.load %arg2[%c82] : memref<98xf32, #tpu.memory_space<smem>>
      %c0_545 = arith.constant 0 : index
      %c1_546 = arith.constant 1 : index
      %c4_547 = arith.constant 4 : index
      %c5_548 = arith.constant 5 : index
      %672 = vector.load %arg7[%c0_545, %c1_546, %c4_547, %c5_548] : memref<1x2x22x22xf32, #tpu.memory_space<vmem>>, vector<1x1x16x16xf32>
      %673 = vector.shape_cast %672 : vector<1x1x16x16xf32> to vector<1x16x16xf32>
      %674 = vector.broadcast %671 : f32 to vector<1x16x16xf32>
      %675 = arith.mulf %674, %673 : vector<1x16x16xf32>
      %676 = arith.addf %670, %675 : vector<1x16x16xf32>
      %c83 = arith.constant 83 : index
      %677 = memref.load %arg2[%c83] : memref<98xf32, #tpu.memory_space<smem>>
      %c0_549 = arith.constant 0 : index
      %c1_550 = arith.constant 1 : index
      %c4_551 = arith.constant 4 : index
      %c6_552 = arith.constant 6 : index
      %678 = vector.load %arg7[%c0_549, %c1_550, %c4_551, %c6_552] : memref<1x2x22x22xf32, #tpu.memory_space<vmem>>, vector<1x1x16x16xf32>
      %679 = vector.shape_cast %678 : vector<1x1x16x16xf32> to vector<1x16x16xf32>
      %680 = vector.broadcast %677 : f32 to vector<1x16x16xf32>
      %681 = arith.mulf %680, %679 : vector<1x16x16xf32>
      %682 = arith.addf %676, %681 : vector<1x16x16xf32>
      %c84 = arith.constant 84 : index
      %683 = memref.load %arg2[%c84] : memref<98xf32, #tpu.memory_space<smem>>
      %c0_553 = arith.constant 0 : index
      %c1_554 = arith.constant 1 : index
      %c5_555 = arith.constant 5 : index
      %c0_556 = arith.constant 0 : index
      %684 = vector.load %arg7[%c0_553, %c1_554, %c5_555, %c0_556] : memref<1x2x22x22xf32, #tpu.memory_space<vmem>>, vector<1x1x16x16xf32>
      %685 = vector.shape_cast %684 : vector<1x1x16x16xf32> to vector<1x16x16xf32>
      %686 = vector.broadcast %683 : f32 to vector<1x16x16xf32>
      %687 = arith.mulf %686, %685 : vector<1x16x16xf32>
      %688 = arith.addf %640, %687 : vector<1x16x16xf32>
      %c85 = arith.constant 85 : index
      %689 = memref.load %arg2[%c85] : memref<98xf32, #tpu.memory_space<smem>>
      %c0_557 = arith.constant 0 : index
      %c1_558 = arith.constant 1 : index
      %c5_559 = arith.constant 5 : index
      %c1_560 = arith.constant 1 : index
      %690 = vector.load %arg7[%c0_557, %c1_558, %c5_559, %c1_560] : memref<1x2x22x22xf32, #tpu.memory_space<vmem>>, vector<1x1x16x16xf32>
      %691 = vector.shape_cast %690 : vector<1x1x16x16xf32> to vector<1x16x16xf32>
      %692 = vector.broadcast %689 : f32 to vector<1x16x16xf32>
      %693 = arith.mulf %692, %691 : vector<1x16x16xf32>
      %694 = arith.addf %688, %693 : vector<1x16x16xf32>
      %c86 = arith.constant 86 : index
      %695 = memref.load %arg2[%c86] : memref<98xf32, #tpu.memory_space<smem>>
      %c0_561 = arith.constant 0 : index
      %c1_562 = arith.constant 1 : index
      %c5_563 = arith.constant 5 : index
      %c2_564 = arith.constant 2 : index
      %696 = vector.load %arg7[%c0_561, %c1_562, %c5_563, %c2_564] : memref<1x2x22x22xf32, #tpu.memory_space<vmem>>, vector<1x1x16x16xf32>
      %697 = vector.shape_cast %696 : vector<1x1x16x16xf32> to vector<1x16x16xf32>
      %698 = vector.broadcast %695 : f32 to vector<1x16x16xf32>
      %699 = arith.mulf %698, %697 : vector<1x16x16xf32>
      %700 = arith.addf %694, %699 : vector<1x16x16xf32>
      %c87 = arith.constant 87 : index
      %701 = memref.load %arg2[%c87] : memref<98xf32, #tpu.memory_space<smem>>
      %c0_565 = arith.constant 0 : index
      %c1_566 = arith.constant 1 : index
      %c5_567 = arith.constant 5 : index
      %c3_568 = arith.constant 3 : index
      %702 = vector.load %arg7[%c0_565, %c1_566, %c5_567, %c3_568] : memref<1x2x22x22xf32, #tpu.memory_space<vmem>>, vector<1x1x16x16xf32>
      %703 = vector.shape_cast %702 : vector<1x1x16x16xf32> to vector<1x16x16xf32>
      %704 = vector.broadcast %701 : f32 to vector<1x16x16xf32>
      %705 = arith.mulf %704, %703 : vector<1x16x16xf32>
      %706 = arith.addf %700, %705 : vector<1x16x16xf32>
      %c88 = arith.constant 88 : index
      %707 = memref.load %arg2[%c88] : memref<98xf32, #tpu.memory_space<smem>>
      %c0_569 = arith.constant 0 : index
      %c1_570 = arith.constant 1 : index
      %c5_571 = arith.constant 5 : index
      %c4_572 = arith.constant 4 : index
      %708 = vector.load %arg7[%c0_569, %c1_570, %c5_571, %c4_572] : memref<1x2x22x22xf32, #tpu.memory_space<vmem>>, vector<1x1x16x16xf32>
      %709 = vector.shape_cast %708 : vector<1x1x16x16xf32> to vector<1x16x16xf32>
      %710 = vector.broadcast %707 : f32 to vector<1x16x16xf32>
      %711 = arith.mulf %710, %709 : vector<1x16x16xf32>
      %712 = arith.addf %706, %711 : vector<1x16x16xf32>
      %c89 = arith.constant 89 : index
      %713 = memref.load %arg2[%c89] : memref<98xf32, #tpu.memory_space<smem>>
      %c0_573 = arith.constant 0 : index
      %c1_574 = arith.constant 1 : index
      %c5_575 = arith.constant 5 : index
      %c5_576 = arith.constant 5 : index
      %714 = vector.load %arg7[%c0_573, %c1_574, %c5_575, %c5_576] : memref<1x2x22x22xf32, #tpu.memory_space<vmem>>, vector<1x1x16x16xf32>
      %715 = vector.shape_cast %714 : vector<1x1x16x16xf32> to vector<1x16x16xf32>
      %716 = vector.broadcast %713 : f32 to vector<1x16x16xf32>
      %717 = arith.mulf %716, %715 : vector<1x16x16xf32>
      %718 = arith.addf %712, %717 : vector<1x16x16xf32>
      %c90 = arith.constant 90 : index
      %719 = memref.load %arg2[%c90] : memref<98xf32, #tpu.memory_space<smem>>
      %c0_577 = arith.constant 0 : index
      %c1_578 = arith.constant 1 : index
      %c5_579 = arith.constant 5 : index
      %c6_580 = arith.constant 6 : index
      %720 = vector.load %arg7[%c0_577, %c1_578, %c5_579, %c6_580] : memref<1x2x22x22xf32, #tpu.memory_space<vmem>>, vector<1x1x16x16xf32>
      %721 = vector.shape_cast %720 : vector<1x1x16x16xf32> to vector<1x16x16xf32>
      %722 = vector.broadcast %719 : f32 to vector<1x16x16xf32>
      %723 = arith.mulf %722, %721 : vector<1x16x16xf32>
      %724 = arith.addf %718, %723 : vector<1x16x16xf32>
      %c91 = arith.constant 91 : index
      %725 = memref.load %arg2[%c91] : memref<98xf32, #tpu.memory_space<smem>>
      %c0_581 = arith.constant 0 : index
      %c1_582 = arith.constant 1 : index
      %c6_583 = arith.constant 6 : index
      %c0_584 = arith.constant 0 : index
      %726 = vector.load %arg7[%c0_581, %c1_582, %c6_583, %c0_584] : memref<1x2x22x22xf32, #tpu.memory_space<vmem>>, vector<1x1x16x16xf32>
      %727 = vector.shape_cast %726 : vector<1x1x16x16xf32> to vector<1x16x16xf32>
      %728 = vector.broadcast %725 : f32 to vector<1x16x16xf32>
      %729 = arith.mulf %728, %727 : vector<1x16x16xf32>
      %730 = arith.addf %682, %729 : vector<1x16x16xf32>
      %c92 = arith.constant 92 : index
      %731 = memref.load %arg2[%c92] : memref<98xf32, #tpu.memory_space<smem>>
      %c0_585 = arith.constant 0 : index
      %c1_586 = arith.constant 1 : index
      %c6_587 = arith.constant 6 : index
      %c1_588 = arith.constant 1 : index
      %732 = vector.load %arg7[%c0_585, %c1_586, %c6_587, %c1_588] : memref<1x2x22x22xf32, #tpu.memory_space<vmem>>, vector<1x1x16x16xf32>
      %733 = vector.shape_cast %732 : vector<1x1x16x16xf32> to vector<1x16x16xf32>
      %734 = vector.broadcast %731 : f32 to vector<1x16x16xf32>
      %735 = arith.mulf %734, %733 : vector<1x16x16xf32>
      %736 = arith.addf %730, %735 : vector<1x16x16xf32>
      %c93 = arith.constant 93 : index
      %737 = memref.load %arg2[%c93] : memref<98xf32, #tpu.memory_space<smem>>
      %c0_589 = arith.constant 0 : index
      %c1_590 = arith.constant 1 : index
      %c6_591 = arith.constant 6 : index
      %c2_592 = arith.constant 2 : index
      %738 = vector.load %arg7[%c0_589, %c1_590, %c6_591, %c2_592] : memref<1x2x22x22xf32, #tpu.memory_space<vmem>>, vector<1x1x16x16xf32>
      %739 = vector.shape_cast %738 : vector<1x1x16x16xf32> to vector<1x16x16xf32>
      %740 = vector.broadcast %737 : f32 to vector<1x16x16xf32>
      %741 = arith.mulf %740, %739 : vector<1x16x16xf32>
      %742 = arith.addf %736, %741 : vector<1x16x16xf32>
      %c94 = arith.constant 94 : index
      %743 = memref.load %arg2[%c94] : memref<98xf32, #tpu.memory_space<smem>>
      %c0_593 = arith.constant 0 : index
      %c1_594 = arith.constant 1 : index
      %c6_595 = arith.constant 6 : index
      %c3_596 = arith.constant 3 : index
      %744 = vector.load %arg7[%c0_593, %c1_594, %c6_595, %c3_596] : memref<1x2x22x22xf32, #tpu.memory_space<vmem>>, vector<1x1x16x16xf32>
      %745 = vector.shape_cast %744 : vector<1x1x16x16xf32> to vector<1x16x16xf32>
      %746 = vector.broadcast %743 : f32 to vector<1x16x16xf32>
      %747 = arith.mulf %746, %745 : vector<1x16x16xf32>
      %748 = arith.addf %742, %747 : vector<1x16x16xf32>
      %c95 = arith.constant 95 : index
      %749 = memref.load %arg2[%c95] : memref<98xf32, #tpu.memory_space<smem>>
      %c0_597 = arith.constant 0 : index
      %c1_598 = arith.constant 1 : index
      %c6_599 = arith.constant 6 : index
      %c4_600 = arith.constant 4 : index
      %750 = vector.load %arg7[%c0_597, %c1_598, %c6_599, %c4_600] : memref<1x2x22x22xf32, #tpu.memory_space<vmem>>, vector<1x1x16x16xf32>
      %751 = vector.shape_cast %750 : vector<1x1x16x16xf32> to vector<1x16x16xf32>
      %752 = vector.broadcast %749 : f32 to vector<1x16x16xf32>
      %753 = arith.mulf %752, %751 : vector<1x16x16xf32>
      %754 = arith.addf %748, %753 : vector<1x16x16xf32>
      %c96_601 = arith.constant 96 : index
      %755 = memref.load %arg2[%c96_601] : memref<98xf32, #tpu.memory_space<smem>>
      %c0_602 = arith.constant 0 : index
      %c1_603 = arith.constant 1 : index
      %c6_604 = arith.constant 6 : index
      %c5_605 = arith.constant 5 : index
      %756 = vector.load %arg7[%c0_602, %c1_603, %c6_604, %c5_605] : memref<1x2x22x22xf32, #tpu.memory_space<vmem>>, vector<1x1x16x16xf32>
      %757 = vector.shape_cast %756 : vector<1x1x16x16xf32> to vector<1x16x16xf32>
      %758 = vector.broadcast %755 : f32 to vector<1x16x16xf32>
      %759 = arith.mulf %758, %757 : vector<1x16x16xf32>
      %760 = arith.addf %754, %759 : vector<1x16x16xf32>
      %c97 = arith.constant 97 : index
      %761 = memref.load %arg2[%c97] : memref<98xf32, #tpu.memory_space<smem>>
      %c0_606 = arith.constant 0 : index
      %c1_607 = arith.constant 1 : index
      %c6_608 = arith.constant 6 : index
      %c6_609 = arith.constant 6 : index
      %762 = vector.load %arg7[%c0_606, %c1_607, %c6_608, %c6_609] : memref<1x2x22x22xf32, #tpu.memory_space<vmem>>, vector<1x1x16x16xf32>
      %763 = vector.shape_cast %762 : vector<1x1x16x16xf32> to vector<1x16x16xf32>
      %764 = vector.broadcast %761 : f32 to vector<1x16x16xf32>
      %765 = arith.mulf %764, %763 : vector<1x16x16xf32>
      %766 = arith.addf %760, %765 : vector<1x16x16xf32>
      %767 = arith.addf %472, %430 : vector<1x16x16xf32>
      %768 = arith.addf %766, %724 : vector<1x16x16xf32>
      %769 = arith.addf %767, %768 : vector<1x16x16xf32>
      %770 = arith.negf %769 : vector<1x16x16xf32>
      %771 = math.exp %770 : vector<1x16x16xf32>
      %cst_610 = arith.constant 1.000000e+00 : f32
      %772 = vector.broadcast %cst_610 : f32 to vector<1x16x16xf32>
      %773 = arith.addf %772, %771 : vector<1x16x16xf32>
      %774 = arith.divf %772, %773 : vector<1x16x16xf32>
      %c0_611 = arith.constant 0 : index
      %c0_612 = arith.constant 0 : index
      %c0_613 = arith.constant 0 : index
      %c0_614 = arith.constant 0 : index
      %775 = vector.load %arg4[%c0_611, %c0_612, %c0_613, %c0_614] : memref<1x1x16x16xf32, #tpu.memory_space<vmem>>, vector<1x1x16x16xf32>
      %776 = vector.shape_cast %775 : vector<1x1x16x16xf32> to vector<1x16x16xf32>
      %777 = vector.shape_cast %774 : vector<1x16x16xf32> to vector<1x1x16x16xf32>
      tpu.vector_store %arg4[%c0_611, %c0_612, %c0_613, %c0_614], %777 {strides = array<i32>} : memref<1x1x16x16xf32, #tpu.memory_space<vmem>>, vector<1x1x16x16xf32>,
    } else {
    }
    return
  }
  func.func @transform_0(%arg0: i32, %arg1: i32) -> i32 {
    %c0_i32 = arith.constant 0 : i32
    %c0_i32_0 = arith.constant 0 : i32
    return %c0_i32 : i32
  }
  func.func @transform_1(%arg0: i32, %arg1: i32) -> (i32, i32, i32) {
    %c0_i32 = arith.constant 0 : i32
    %c0_i32_0 = arith.constant 0 : i32
    return %arg0, %arg1, %c0_i32 : i32, i32, i32
  }
  func.func @transform_2(%arg0: i32, %arg1: i32) -> (i32, i32, i32, i32) {
    %c0_i32 = arith.constant 0 : i32
    %c0_i32_0 = arith.constant 0 : i32
    %c0_i32_1 = arith.constant 0 : i32
    %c0_i32_2 = arith.constant 0 : i32
    return %arg0, %c0_i32, %c0_i32_0, %c0_i32_1 : i32, i32, i32, i32
  }
}

</mosaic_0001>

<bundles_post_ra>
// kernel: tpu_custom_call.1
= control target key start
LH: loop header
LB: loop body
LE: loop exit
PB: predicated region body
PF: predicated region fallthrough
CT: control target
= control target key end

     0   :  { %7 = vsyncpa [#allocation8], 0  ;;  %s3557_s0 = inlined_call_operand.hbm [shape: f32[98], index: 0, kind: input, shape index: {}]   ;;  %s3558_s1 = inlined_call_operand.hbm [shape: f32[2,4,256], index: 1, kind: input, shape index: {}]   ;;  %s3559_s2 = inlined_call_operand.hbm [shape: f32[2,1,16,16], index: 2, kind: output, shape index: {}]  }
   0x1   :  { %8 = vsyncpa [#allocation6], 0 }
   0x2   :  { %10 = vsyncpa [#allocation6 + $0x1], 0 }
   0x3   :  { %11 = vsyncpa [#allocation7], 0 }
   0x4   :  { %13 = vsyncpa [#allocation7 + $0x1], 0  ;;  %s2461_s9 = smov 0   ;;  %s2463_s10 = smov 0  }
   0x5   :  { %s2465_s11 = smov 0   ;;  %s2467_s12 = smov 0  }
   0x6   :  { %s2469_s13 = smov 0   ;;  %s2471_s14 = smov 0  }
   0x7 LB: > { %s2058_s15 = sadd.s32 4294967295, %s2422_s14   ;;  %s2059_s16 = sadd.s32 4294967294, %s2422_s14   ;;  %s2422_s14 = sphi %s2471_s14, %s19_s14   ;;  %s2418_s13 = sphi %s2469_s13, %s3585_s13   ;;  %s2414_s12 = sphi %s2467_s12, %s3584_s12   ;;  %s2410_s11 = sphi %s2465_s11, %s3583_s11   ;;  %s2406_s10 = sphi %s2463_s10, %s3582_s10   ;;  %s2402_s9 = sphi %s2461_s9, %s3581_s9  }
   0x8   : > { %p74_p0 = scmp.ne.s32.totalorder %s2406_s10, %s2402_s9  ;;  %p2495_p1 = scmp.eq.s32.totalorder %s2058_s15, 0 }
   0x9   : > { %p2499_p2 = scmp.eq.s32.totalorder %s2058_s15, 1  ;;  %p104_p3 = scmp.eq.s32.totalorder %s2059_s16, 1 }
   0xa   : > { %s3564_s17 = scalar_select %p2495_p1, 1, 0 }
   0xb   : > { %p2505_p4 = por %p2495_p1, %p74_p0  ;;  %p2060_p5 = scmp.ge.s32.totalorder %s2422_s14, 1 }
   0xc   : > { %p2510_p6 = por %p104_p3, %p74_p0  ;;  %p111_p7 = scmp.lt.s32.totalorder %s2422_s14, 3 }
   0xd   : > { %s3566_s19 = scalar_select %p2505_p4, 1, 0 }
   0xe   : > { %s3567_s20 = scalar_select %p2510_p6, 1, 0 }
   0xf   : > { %p2515_p8 = pnand %p2060_p5, %p111_p7  ;;  %s31_s22 = sadd.s32 1, %s2418_s13 }
  0x10   : > { %p2529_p12 = scmp.ge.s32.totalorder %s31_s22, 2  ;;  %s61_s25 = sadd.s32 1, %s2410_s11 }
  0x11   : > { %p2200_p10 = pneg %p2515_p8  ;;  %p68_p13 = scmp.ne.s32.totalorder %s2410_s11, %s2406_s10 }
  0x12   : > { %p69_p0 = scmp.eq.s32.totalorder %s2422_s14, 0  ;;  %s2293_s28 = scalar_lea.hbm %s3557_s0, 16 }
  0x13   : > { %p2525_p11 = pnand %p2200_p10, %p2495_p1  ;;  %p2294_p3 = scmp.ne.s32.totalorder %s3557_s0, %s2293_s28 }
  0x14   : > { %p2300_p9 = scmp.lt.u32.totalorder %s2293_s28, %s3557_s0 }
  0x15   : > { %p2295_p5 = pneg %p2525_p11 }
  0x17   : > { %p2296_p7 = pnand %p2295_p5, %p2294_p3 }
  0x19   : > { %p2297_p10 = pneg %p2296_p7 }
  0x1b   : > { %p2302_p6 = pnand %p2300_p9, %p2297_p10 }
  0x1d   : > { %2305 = shalt.err (!%p2302_p6)
}
  0x1e   : > { %s2424_s5 = smov [#allocation5]   ;;  %s3587_s22 = smov (%p2529_p12, %s31_s22), 0 }
  0x1f   : > { %2203 = dma.hbm_to_smem (!%p2525_p11), %s3557_s0, 16, %s2424_s5, [#allocation8]  }
  0x20   : > { %p2560_p6 = por %p69_p0, %p68_p13  ;;  %p2569_p9 = por %p2499_p2, %p68_p13 }
  0x21   : > { %s56_s16 = ssub.s32 %s2418_s13, %s3587_s22  ;;  %p2213_p3 = scmp.lt.s32.totalorder %s2422_s14, 2 }
  0x22   : > { %s3572_s15 = scalar_select %p2569_p9, 1, 0 }
  0x23   : > { %p59_p5 = scmp.eq.s32.totalorder %s56_s16, 0  ;;  %s133_s23 = sand.u32 1, %s2410_s11  }
  0x24   : > { %s2063_s24 = sshll.u32 %s133_s23, 3  ;;  %s2190_s27 = sshll.u32 %s2418_s13, 7 }
  0x25   : > { %s2578_s26 = scalar_select %p59_p5, %s2410_s11, %s61_s25  }
  0x26   : > { %s2584_s30 = scalar_lea.hbm %s3558_s1, %s2190_s27  ;;  %s137_s18 = scalar_lea.vmem [#allocation9], %s2063_s24 }
  0x27   : > { %s147_s3 = sshll.u32 %s137_s18, 4  ;;  %p2590_p2 = pnand %p2213_p3, %p2560_p6  ;;  %s2586_s3 = int_to_ptr.vmem [resolvable:$true] %s147_s3 }
  0x28   : > { %s134_s25 = scalar_lea.sflag [#allocation6], %s133_s23  ;;  %s2306_s5 = scalar_lea.hbm %s2584_s30, 128 }
  0x29   : > { %p2307_p11 = scmp.ne.s32.totalorder %s2584_s30, %s2306_s5  ;;  %p2308_p12 = pneg %p2590_p2 }
  0x2a   : > { %s2311_s16 = scalar_lea.hbm %s3558_s1, 256  ;;  %p2312_p7 = scmp.lt.u32.totalorder %s2584_s30, %s3558_s1 }
  0x2b   : > { %p2309_p13 = pnand %p2308_p12, %p2307_p11  ;;  %p2313_p10 = scmp.lt.u32.totalorder %s2311_s16, %s2306_s5 }
  0x2c   : > { %p2315_p3 = scmp.lt.u32.totalorder %s2306_s5, %s2584_s30 }
  0x2d   : > { %p2310_p0 = pneg %p2309_p13  ;;  %p2314_p6 = por %p2313_p10, %p2312_p7 }
  0x2f   : > { %p2316_p5 = por %p2315_p3, %p2314_p6 }
  0x31   : > { %p2317_p9 = pnand %p2316_p5, %p2310_p0 }
  0x33   : > { %2320 = shalt.err (!%p2317_p9)
}
  0x34   : > { %s2321_s23 = scalar_lea.vmem %s2586_s3, 128  ;;  %s2425_s27 = smov [#allocation9]  }
  0x35   : > { %p2322_p11 = scmp.ne.s32.totalorder %s2586_s3, %s2321_s23  ;;  %s2326_s28 = sshll.u32 %s2425_s27, 4  ;;  %s2327_s28 = int_to_ptr.vmem [resolvable:$false] %s2326_s28 }
  0x36   : > { %s2328_s29 = scalar_lea.vmem %s2327_s28, 256  ;;  %p2329_p1 = scmp.lt.s32.totalorder %s2586_s3, %s2327_s28 }
  0x37   : > { %p2324_p13 = pnand %p2322_p11, %p2308_p12  ;;  %p2330_p7 = scmp.lt.s32.totalorder %s2328_s29, %s2321_s23 }
  0x39   : > { %p2325_p4 = pneg %p2324_p13  ;;  %p2331_p10 = por %p2330_p7, %p2329_p1 }
  0x3b   : > { %p2332_p6 = pnand %p2331_p10, %p2325_p4 }
  0x3d   : > { %2335 = shalt.err (!%p2332_p6)
}
  0x3e   : > { %2207 = dma.hbm_to_vmem [thread:$0]  (!%p2590_p2), %s2584_s30, 128, %s2586_s3, %s134_s25  }
  0x3f   : > { %156 = sbr.rel (%p2515_p8) target bundleno = 776 (0x308), region = 28  ;;  %p3574_p9 = scmp.ne.s32.totalorder (!%p2515_p8), %s3564_s17, 0 }
  0x46   : > { %2389 = dma.done.wait (%p3574_p9), [#allocation8], 16  }
  0x47   : > { %2391 = vsyncadd (%p3574_p9), [#allocation8], 4294967280  ;;  %s2626_s18 = sand.u32 1, %s2406_s10   ;;  %p3575_p1 = scmp.ne.s32.totalorder %s3566_s19, 0 }
  0x48   : > { %s2068_s5 = sshll.u32 %s2626_s18, 3  ;;  %s163_s4 = scalar_lea.sflag [#allocation6], %s2626_s18 }
  0x49   : > { %s166_s6 = scalar_lea.vmem [#allocation9], %s2068_s5 }
  0x4a   : > { %2393 = dma.done.wait (%p3575_p1), %s163_s4, 128  }
  0x4b   : > { %2395 = vsyncadd (%p3575_p1), %s163_s4, 4294967168 }
  0x4c   : > { %171 = sfence }
  0x4d   : > { %v192_v0 = vlaneseq  ;;  %v219_v1 = vld [vmem:[%s166_s6] sm:$0xff]  ;;  %vm224_vm0 = vcmask 1043456   ;;  %v2426_v7 = vmov -inf   ;;  %v2427_v11 = vmov 0.0   ;;  %s2429_s17 = smov 115   ;;  %s2430_s19 = smov 3  }
  0x4e   : > { %v222_v2 = vcombine.high %v219_v1, %v219_v1  ;;  %v225_v3 = vsel %vm224_vm0, %v219_v1, 0.0  ;;  %v264_v4 = vsel %vm224_vm0, %v219_v1, -inf  ;;  %vm198_vm2 = vcmask 174080   ;;  %s2431_s21 = smov 99   ;;  %s2432_s30 = smov 83  }
  0x4f   : > { %vm2634_vm1 = vcmp.lt.s32.totalorder %v192_v0, 256  ;;  %v226_v6 = vrot.slane %v225_v3, 4  ;;  %v265_v9 = vrot.slane %v264_v4, 4  ;;  %200 = vst.msk [vmem:[#allocation4 + $0x18] sm:$0x7] %vm198_vm2, %v2427_v11  ;;  %vm203_vm3 = vcmask 23552  }
  0x50   : > { %197 = vst.msk [vmem:[#allocation3] sm:$0x3] %vm2634_vm1, %v2426_v7  ;;  %v232_v8 = vsel %vm224_vm0, %v222_v2, 0.0  ;;  %v271_v10 = vsel %vm224_vm0, %v222_v2, -inf  ;;  %196 = vst.msk [vmem:[#allocation2] sm:$0x3] %vm2634_vm1, %v2427_v11 }
  0x51   : > { %v233_v12 = vrot.slane %v232_v8, 4  ;;  %v272_v13 = vrot.slane %v271_v10, 4  ;;  %199 = vst.msk [vmem:[#allocation4] sm:$0x7] %vm198_vm2, %v2427_v11  ;;  %201 = vst.msk [vmem:[#allocation4 + $0x13] sm:$0x7] %vm198_vm2, %v2427_v11  ;;  %v266_v14 = vmax.f32 %v264_v4, %v265_v9  ;;  %v227_v15 = vadd.f32 %v226_v6, %v225_v3 }
  0x52   : > { %202 = vst.msk [vmem:[#allocation4 + $0x2b] sm:$0x7] %vm198_vm2, %v2427_v11  ;;  %vm211_vm4 = vcmask 179352   ;;  %v2428_v16 = vmov 1966171168   ;;  %v246_v27 = vshrl.u32 %v192_v0, 7 }
  0x53   : > { %v243_v17 = vunpack.c.l.s4 %v2428_v16  ;;  %v273_v18 = vmax.f32 %v271_v10, %v272_v13  ;;  %v234_v19 = vadd.f32 %v233_v12, %v232_v8  ;;  %208 = vst.msk [vmem:[#allocation4 + $0x18] sm:$0xff] %vm203_vm3, %v2427_v11  ;;  %205 = vst.msk [vmem:[#allocation4 + $0x8] sm:$0xff] %vm203_vm3, %v2427_v11  ;;  %v267_v20 = vrot.slane %v266_v14, 2  ;;  %s2433_s3 = smov 67   ;;  %s2434_s25 = smov 51  }
  0x54   : > { %209 = vst.msk [vmem:[#allocation4 + $0x20] sm:$0xff] %vm203_vm3, %v2427_v11  ;;  %204 = vst.msk [vmem:[#allocation4] sm:$0xff] %vm203_vm3, %v2427_v11  ;;  %v228_v21 = vrot.slane %v227_v15, 2  ;;  %v2659_v49 = vsub.s32 0, %v246_v27  ;;  %s2435_s7 = smov 35   ;;  %s2436_s16 = smov 19  }
  0x55   : > { %216 = vst.msk [vmem:[#allocation4 + $0x18] sm:$0xff] %vm211_vm4, %v2427_v11  ;;  %213 = vst.msk [vmem:[#allocation4 + $0x8] sm:$0xff] %vm211_vm4, %v2427_v11  ;;  %v274_v22 = vrot.slane %v273_v18, 2  ;;  %v235_v23 = vrot.slane %v234_v19, 2  ;;  %v268_v24 = vmax.f32 %v266_v14, %v267_v20  ;;  %v244_v26 = vunpack.c.0.s8 %v243_v17  ;;  %s2731_s8 = sld [smem:[#allocation5 + $0x1]]  ;;  %s2735_s24 = sld [smem:[#allocation5 + $0x2]] }
  0x56   : > { %217 = vst.msk [vmem:[#allocation4 + $0x20] sm:$0xff] %vm211_vm4, %v2427_v11  ;;  %212 = vst.msk [vmem:[#allocation4] sm:$0xff] %vm211_vm4, %v2427_v11  ;;  %v229_v25 = vadd.f32 %v228_v21, %v227_v15  ;;  %vm206_vm5 = vcmask 21504   ;;  %vm214_vm6 = vcmask 177304   ;;  %vm311_vm7 = vcmask 147480   ;;  %s2740_s23 = sld [smem:[#allocation5 + $0x3]] }
  0x57   : > { %v275_v28 = vmax.f32 %v273_v18, %v274_v22  ;;  %v236_v29 = vadd.f32 %v235_v23, %v234_v19  ;;  %v269_v30 = vrot.slane %v268_v24, 1  ;;  %v247_v36 = vsub.s32 %v244_v26, %v246_v27  ;;  %v263_v43 = vld [vmem:[#allocation3] sm:$0x3]  ;;  %v220_v44 = vld [vmem:[#allocation2] sm:$0x3]  ;;  %s2748_s27 = sld [smem:[#allocation5 + $0x4]] }
  0x58   : > { %v230_v31 = vrot.slane %v229_v25, 1  ;;  %210 = vst.msk [vmem:[#allocation4 + $0x28] sm:$0x3f] %vm206_vm5, %v2427_v11  ;;  %207 = vst.msk [vmem:[#allocation4 + $0x10] sm:$0x3f] %vm206_vm5, %v2427_v11  ;;  %s2437_s28 = smov 127  }
  0x59   : > { %v276_v32 = vrot.slane %v275_v28, 1  ;;  %v237_v33 = vrot.slane %v236_v29, 1  ;;  %v270_v34 = vmax.f32 %v268_v24, %v269_v30  ;;  %218 = vst.msk [vmem:[#allocation4 + $0x28] sm:$0x3f] %vm214_vm6, %v2427_v11  ;;  %215 = vst.msk [vmem:[#allocation4 + $0x10] sm:$0x3f] %vm214_vm6, %v2427_v11 }
  0x5a   : > { %v231_v35 = vadd.f32 %v230_v31, %v229_v25  ;;  %s2755_s29 = sld [smem:[#allocation5 + $0x5]]  ;;  %s2438_s5 = smov 126   ;;  %vm1945_vm8 = vcmask 130048  }
  0x5b   : > { %v277_v37 = vmax.f32 %v275_v28, %v276_v32  ;;  %v238_v38 = vadd.f32 %v237_v33, %v236_v29  ;;  %s2762_s4 = sld [smem:[#allocation5 + $0x6]]  ;;  %s2439_s6 = smov 125  }
  0x5c   : > { %p3578_p8 = scmp.ne.s32.totalorder %s3572_s15, 0 }
  0x5d   : > { %v280_v39 = vcombine.low %v270_v34, %v277_v37  ;;  %v241_v40 = vcombine.low %v231_v35, %v238_v38 }
  0x5f   : > { %v287_v41 = vrot.slane %v280_v39, %v247_v36  ;;  %v248_v42 = vrot.slane %v241_v40, %v247_v36 }
  0x61   : > { %v294_v45 = vrot.slane %v287_v41, %v247_v36  ;;  %v255_v46 = vrot.slane %v248_v42, %v247_v36 }
  0x63   : > { %v296_v47 = vmax.f32 %v263_v43, %v294_v45  ;;  %v257_v48 = vadd.f32 %v255_v46, %v220_v44 }
  0x65   : > { %297 = vst.msk [vmem:[#allocation3] sm:$0x3] %vm2634_vm1, %v296_v47  ;;  %262 = vst.msk [vmem:[#allocation2] sm:$0x3] %vm2634_vm1, %v257_v48 }
  0x6c   : > { %v2071_v50 = vld [vmem:[#allocation3] ss:$0 sm:$0xff]  ;;  %v301_v51 = vld [vmem:[#allocation2] sm:$0x1]  ;;  %v471_v7 = vld [vmem:[#allocation2 + $0x1] sm:$0x1] }
  0x6d   : > { %v345_v52 = vld [vmem:[#allocation2] sm:$0x1]  ;;  %341 = vrot.lane.b32.xlu1 %v2071_v50, %s2429_s17  ;;  %319 = vrot.lane.b32.xlu0 %v2071_v50, %s2430_s19  ;;  %v302_v53 = vmul.f32 0.25, %v301_v51  ;;  %v472_v9 = vmul.f32 0.25, %v471_v7  ;;  %v2078_v10 = vld [vmem:[#allocation3 + $0x1] ss:$0 sm:$0xff]  ;;  %v690_v7 = vstv %s2748_s27 }
  0x6e   : > { %v346_v54 = vmul.f32 0.25, %v345_v52  ;;  %v366_v55 = vld [vmem:[#allocation2] sm:$0x1]  ;;  %v492_v13 = vld [vmem:[#allocation2 + $0x1] sm:$0x1]  ;;  %s2836_s27 = sld [smem:[#allocation5 + $0x11]] }
  0x6f   : > { %v307_v56 = vrot.slane %v302_v53, %v2659_v49  ;;  %v367_v58 = vmul.f32 0.25, %v366_v55  ;;  %v387_v59 = vld [vmem:[#allocation2] sm:$0x1]  ;;  %v477_v14 = vrot.slane %v472_v9, %v2659_v49  ;;  %v493_v16 = vmul.f32 0.25, %v492_v13  ;;  %v513_v17 = vld [vmem:[#allocation2 + $0x1] sm:$0x1] }
  0x70   : > { %v351_v57 = vrot.slane %v346_v54, %v2659_v49  ;;  %v388_v61 = vmul.f32 0.25, %v387_v59  ;;  %v408_v62 = vld [vmem:[#allocation2] sm:$0x1]  ;;  %v514_v20 = vmul.f32 0.25, %v513_v17  ;;  %v534_v21 = vld [vmem:[#allocation2 + $0x1] sm:$0x1] }
  0x71   : > { %362 = vrot.lane.b32.xlu1 %v2071_v50, %s2431_s21  ;;  %308 = vrot.lane.b32.xlu0 %v307_v56, %s2430_s19  ;;  %v372_v60 = vrot.slane %v367_v58, %v2659_v49  ;;  %v409_v0 = vmul.f32 0.25, %v408_v62  ;;  %v429_v1 = vld [vmem:[#allocation2] sm:$0x1]  ;;  %v498_v19 = vrot.slane %v493_v16, %v2659_v49  ;;  %v535_v23 = vmul.f32 0.25, %v534_v21  ;;  %v555_v24 = vld [vmem:[#allocation2 + $0x1] sm:$0x1] }
  0x72   : > { %v393_v63 = vrot.slane %v388_v61, %v2659_v49  ;;  %v430_v3 = vmul.f32 0.25, %v429_v1  ;;  %v450_v4 = vld [vmem:[#allocation2] sm:$0x1]  ;;  %v519_v22 = vrot.slane %v514_v20, %v2659_v49  ;;  %v556_v26 = vmul.f32 0.25, %v555_v24  ;;  %v576_v27 = vld [vmem:[#allocation2 + $0x1] sm:$0x1] }
  0x73   : > { %v414_v2 = vrot.slane %v409_v0, %v2659_v49  ;;  %v451_v6 = vmul.f32 0.25, %v450_v4  ;;  %v324_v12 = vld [vmem:[#allocation2] sm:$0x1]  ;;  %v540_v25 = vrot.slane %v535_v23, %v2659_v49  ;;  %v577_v29 = vmul.f32 0.25, %v576_v27  ;;  %v597_v30 = vld [vmem:[#allocation2 + $0x1] sm:$0x1] }
  0x74   : > { %v435_v5 = vrot.slane %v430_v3, %v2659_v49  ;;  %v325_v15 = vmul.f32 0.25, %v324_v12  ;;  %v561_v28 = vrot.slane %v556_v26, %v2659_v49  ;;  %v598_v31 = vmul.f32 0.25, %v597_v30  ;;  %v618_v32 = vld [vmem:[#allocation2 + $0x1] sm:$0x1] }
  0x75   : > { %383 = vrot.lane.b32.xlu1 %v2071_v50, %s2432_s30  ;;  %352 = vrot.lane.b32.xlu0 %v351_v57, %s2431_s21  ;;  %v456_v8 = vrot.slane %v451_v6, %v2659_v49  ;;  %v582_v11 = vrot.slane %v577_v29, %v2659_v49  ;;  %v619_v34 = vmul.f32 0.25, %v618_v32  ;;  %v648_v58 = vstv %s2731_s8  ;;  %s2813_s8 = sld [smem:[#allocation5 + $0xd]] }
  0x76   : > { %v330_v18 = vrot.slane %v325_v15, %v2659_v49  ;;  %v603_v33 = vrot.slane %v598_v31, %v2659_v49  ;;  %v676_v3 = vstv %s2740_s23  ;;  %s2827_s23 = sld [smem:[#allocation5 + $0x10]] }
  0x77   : > { %v624_v35 = vrot.slane %v619_v34, %v2659_v49 }
  0x79   : > { %404 = vrot.lane.b32.xlu1 %v2071_v50, %s2433_s3  ;;  %373 = vrot.lane.b32.xlu0 %v372_v60, %s2432_s30 }
  0x7d   : > { %425 = vrot.lane.b32.xlu1 %v2071_v50, %s2434_s25  ;;  %394 = vrot.lane.b32.xlu0 %v393_v63, %s2433_s3  ;;  %v662_v63 = vstv %s2735_s24  ;;  %s2820_s24 = sld [smem:[#allocation5 + $0xf]] }
  0x81   : > { %446 = vrot.lane.b32.xlu1 %v2071_v50, %s2435_s7  ;;  %415 = vrot.lane.b32.xlu0 %v414_v2, %s2434_s25 }
  0x85   : > { %467 = vrot.lane.b32.xlu1 %v2071_v50, %s2436_s16  ;;  %436 = vrot.lane.b32.xlu0 %v435_v5, %s2435_s7 }
  0x89   : > { %488 = vrot.lane.b32.xlu1 %v2078_v10, %s2430_s19  ;;  %457 = vrot.lane.b32.xlu0 %v456_v8, %s2436_s16 }
  0x8d   : > { %509 = vrot.lane.b32.xlu1 %v2078_v10, %s2429_s17  ;;  %478 = vrot.lane.b32.xlu0 %v477_v14, %s2430_s19  ;;  %v704_v14 = vstv %s2755_s29  ;;  %s2440_s19 = smov 124   ;;  %s2843_s29 = sld [smem:[#allocation5 + $0x12]] }
  0x91   : > { %331 = vrot.lane.b32.xlu1 %v330_v18, %s2429_s17  ;;  %499 = vrot.lane.b32.xlu0 %v498_v19, %s2429_s17  ;;  %s2772_s17 = sld [smem:[#allocation5 + $0x8]]  ;;  %v718_v19 = vstv %s2762_s4  ;;  %s2850_s4 = sld [smem:[#allocation5 + $0x13]] }
  0x95   : > { %530 = vrot.lane.b32.xlu1 %v2078_v10, %s2431_s21  ;;  %520 = vrot.lane.b32.xlu0 %v519_v22, %s2431_s21  ;;  %s2781_s21 = sld [smem:[#allocation5 + $0x9]] }
  0x97   : > { %v740_v23 = vstv %s2772_s17  ;;  %s2859_s17 = sld [smem:[#allocation5 + $0x14]] }
  0x99   : > { %551 = vrot.lane.b32.xlu1 %v2078_v10, %s2432_s30  ;;  %541 = vrot.lane.b32.xlu0 %v540_v25, %s2432_s30  ;;  %s2441_s30 = smov 123  }
  0x9b   : > { %v754_v26 = vstv %s2781_s21  ;;  %s2866_s21 = sld [smem:[#allocation5 + $0x16]] }
  0x9d   : > { %572 = vrot.lane.b32.xlu1 %v2078_v10, %s2433_s3  ;;  %562 = vrot.lane.b32.xlu0 %v561_v28, %s2433_s3  ;;  %s2790_s3 = sld [smem:[#allocation5 + $0xa]] }
  0xa1   : > { %593 = vrot.lane.b32.xlu1 %v2078_v10, %s2434_s25  ;;  %583 = vrot.lane.b32.xlu0 %v582_v11, %s2434_s25  ;;  %s2442_s25 = smov 122  }
  0xa3   : > { %v768_v29 = vstv %s2790_s3  ;;  %s2873_s3 = sld [smem:[#allocation5 + $0x17]] }
  0xa5   : > { %614 = vrot.lane.b32.xlu1 %v2078_v10, %s2435_s7  ;;  %604 = vrot.lane.b32.xlu0 %v603_v33, %s2435_s7  ;;  %s2797_s7 = sld [smem:[#allocation5 + $0xb]] }
  0xa9   : > { %635 = vrot.lane.b32.xlu1 %v2078_v10, %s2436_s16  ;;  %625 = vrot.lane.b32.xlu0 %v624_v35, %s2436_s16  ;;  %s2804_s16 = sld [smem:[#allocation5 + $0xc]] }
  0xab   : > { %v782_v31 = vstv %s2797_s7  ;;  %s2882_s7 = sld [smem:[#allocation5 + $0x18]] }
  0xaf   : > { %v796_v35 = vstv %s2804_s16  ;;  %s2889_s16 = sld [smem:[#allocation5 + $0x19]] }
  0xdf   : > { %v342_v36 = vpop.permute.xlu1 %341  ;;  %v320_v37 = vpop.permute.xlu0 %319 }
  0xe0   : > { %344 = vst.msk [vmem:[#allocation4 + $0x1c] sm:$0x1] %vm311_vm7, %v342_v36  ;;  %323 = vst.msk [vmem:[#allocation4 + $0x1b] sm:$0x1] %vm311_vm7, %v320_v37 }
  0xe3   : > { %v363_v38 = vpop.permute.xlu1 %362  ;;  %v309_v39 = vpop.permute.xlu0 %308 }
  0xe4   : > { %365 = vst.msk [vmem:[#allocation4 + $0x1d] sm:$0x1] %vm311_vm7, %v363_v38  ;;  %312 = vst.msk [vmem:[#allocation4 + $0x3] sm:$0x1] %vm311_vm7, %v309_v39  ;;  %v810_v38 = vstv %s2813_s8  ;;  %s2896_s8 = sld [smem:[#allocation5 + $0x1a]] }
  0xe7   : > { %v384_v40 = vpop.permute.xlu1 %383  ;;  %v353_v41 = vpop.permute.xlu0 %352 }
  0xe8   : > { %386 = vst.msk [vmem:[#allocation4 + $0x1e] sm:$0x1] %vm311_vm7, %v384_v40  ;;  %355 = vst.msk [vmem:[#allocation4 + $0x5] sm:$0x1] %vm311_vm7, %v353_v41 }
  0xeb   : > { %v405_v42 = vpop.permute.xlu1 %404  ;;  %v374_v43 = vpop.permute.xlu0 %373 }
  0xec   : > { %407 = vst.msk [vmem:[#allocation4 + $0x1f] sm:$0x1] %vm311_vm7, %v405_v42  ;;  %376 = vst.msk [vmem:[#allocation4 + $0x6] sm:$0x1] %vm311_vm7, %v374_v43  ;;  %v832_v42 = vstv %s2820_s24  ;;  %s2905_s24 = sld [smem:[#allocation5 + $0x1b]] }
  0xef   : > { %v426_v44 = vpop.permute.xlu1 %425  ;;  %v395_v45 = vpop.permute.xlu0 %394 }
  0xf0   : > { %428 = vst.msk [vmem:[#allocation4 + $0x20] sm:$0x1] %vm311_vm7, %v426_v44  ;;  %397 = vst.msk [vmem:[#allocation4 + $0x7] sm:$0x1] %vm311_vm7, %v395_v45  ;;  %v846_v45 = vstv %s2827_s23  ;;  %s2912_s23 = sld [smem:[#allocation5 + $0x1d]] }
  0xf3   : > { %v447_v46 = vpop.permute.xlu1 %446  ;;  %v416_v47 = vpop.permute.xlu0 %415 }
  0xf4   : > { %449 = vst.msk [vmem:[#allocation4 + $0x21] sm:$0x1] %vm311_vm7, %v447_v46  ;;  %418 = vst.msk [vmem:[#allocation4 + $0x8] sm:$0x1] %vm311_vm7, %v416_v47 }
  0xf7   : > { %v468_v48 = vpop.permute.xlu1 %467  ;;  %v437_v49 = vpop.permute.xlu0 %436 }
  0xf8   : > { %470 = vst.msk [vmem:[#allocation4 + $0x22] sm:$0x1] %vm311_vm7, %v468_v48  ;;  %439 = vst.msk [vmem:[#allocation4 + $0x9] sm:$0x1] %vm311_vm7, %v437_v49  ;;  %v860_v48 = vstv %s2836_s27  ;;  %s2919_s27 = sld [smem:[#allocation5 + $0x1e]] }
  0xfb   : > { %v489_v50 = vpop.permute.xlu1 %488  ;;  %v458_v51 = vpop.permute.xlu0 %457 }
  0xfc   : > { %491 = vst.msk [vmem:[#allocation4 + $0x23] sm:$0x1] %vm311_vm7, %v489_v50  ;;  %460 = vst.msk [vmem:[#allocation4 + $0xa] sm:$0x1] %vm311_vm7, %v458_v51  ;;  %v874_v51 = vstv %s2843_s29  ;;  %s2928_s29 = sld [smem:[#allocation5 + $0x1f]] }
  0xff   : > { %v510_v52 = vpop.permute.xlu1 %509  ;;  %v479_v53 = vpop.permute.xlu0 %478 }
 0x100   : > { %512 = vst.msk [vmem:[#allocation4 + $0x24] sm:$0x1] %vm311_vm7, %v510_v52  ;;  %481 = vst.msk [vmem:[#allocation4 + $0xb] sm:$0x1] %vm311_vm7, %v479_v53 }
 0x103   : > { %v332_v54 = vpop.permute.xlu1 %331  ;;  %v500_v55 = vpop.permute.xlu0 %499 }
 0x104   : > { %334 = vst.msk [vmem:[#allocation4 + $0x4] sm:$0x1] %vm311_vm7, %v332_v54  ;;  %502 = vst.msk [vmem:[#allocation4 + $0xc] sm:$0x1] %vm311_vm7, %v500_v55  ;;  %v888_v55 = vstv %s2850_s4  ;;  %s2935_s4 = sld [smem:[#allocation5 + $0x20]] }
 0x107   : > { %v531_v56 = vpop.permute.xlu1 %530  ;;  %v521_v57 = vpop.permute.xlu0 %520 }
 0x108   : > { %533 = vst.msk [vmem:[#allocation4 + $0x25] sm:$0x1] %vm311_vm7, %v531_v56  ;;  %523 = vst.msk [vmem:[#allocation4 + $0xd] sm:$0x1] %vm311_vm7, %v521_v57 }
 0x10b   : > { %v552_v59 = vpop.permute.xlu1 %551  ;;  %v542_v60 = vpop.permute.xlu0 %541  ;;  %v2742_v61 = vld [vmem:[#allocation4] sm:$0xff] }
 0x10c   : > { %554 = vst.msk [vmem:[#allocation4 + $0x26] sm:$0x1] %vm311_vm7, %v552_v59  ;;  %544 = vst.msk [vmem:[#allocation4 + $0xe] sm:$0x1] %vm311_vm7, %v542_v60  ;;  %v649_v62 = vmul.f32 %v648_v58, %v2742_v61  ;;  %v663_v2 = vmul.f32 %v662_v63, %v2742_v61  ;;  %v677_v6 = vmul.f32 %v676_v3, %v2742_v61  ;;  %v2787_v22 = vld [vmem:[#allocation4 + $0x1] sm:$0xff] }
 0x10d   : > { %v691_v12 = vmul.f32 %v690_v7, %v2742_v61  ;;  %v705_v17 = vmul.f32 %v704_v14, %v2742_v61  ;;  %v719_v20 = vmul.f32 %v718_v19, %v2742_v61  ;;  %v741_v24 = vmul.f32 %v740_v23, %v2787_v22  ;;  %v2833_v41 = vld [vmem:[#allocation4 + $0x2] sm:$0xff] }
 0x10e   : > { %653 = vrot.lane.b32.xlu0 %v649_v62, %s2437_s28  ;;  %v755_v27 = vmul.f32 %v754_v26, %v2787_v22  ;;  %v769_v30 = vmul.f32 %v768_v29, %v2787_v22  ;;  %v783_v33 = vmul.f32 %v782_v31, %v2787_v22  ;;  %v797_v36 = vmul.f32 %v796_v35, %v2787_v22  ;;  %v2879_v62 = vld [vmem:[#allocation4 + $0x3] sm:$0xff] }
 0x10f   : > { %v573_v0 = vpop.permute.xlu1 %572  ;;  %v563_v1 = vpop.permute.xlu0 %562  ;;  %v811_v39 = vmul.f32 %v810_v38, %v2787_v22  ;;  %v833_v43 = vmul.f32 %v832_v42, %v2833_v41  ;;  %v847_v46 = vmul.f32 %v846_v45, %v2833_v41  ;;  %v861_v49 = vmul.f32 %v860_v48, %v2833_v41 }
 0x110   : > { %575 = vst.msk [vmem:[#allocation4 + $0x27] sm:$0x1] %vm311_vm7, %v573_v0  ;;  %565 = vst.msk [vmem:[#allocation4 + $0xf] sm:$0x1] %vm311_vm7, %v563_v1  ;;  %v875_v53 = vmul.f32 %v874_v51, %v2833_v41  ;;  %v889_v56 = vmul.f32 %v888_v55, %v2833_v41 }
 0x112   : > { %667 = vrot.lane.b32.xlu0 %v663_v2, %s2438_s5  ;;  %v938_v2 = vstv %s2873_s3  ;;  %s2958_s3 = sld [smem:[#allocation5 + $0x24]] }
 0x113   : > { %v594_v4 = vpop.permute.xlu1 %593  ;;  %v584_v5 = vpop.permute.xlu0 %583 }
 0x114   : > { %596 = vst.msk [vmem:[#allocation4 + $0x28] sm:$0x1] %vm311_vm7, %v594_v4  ;;  %586 = vst.msk [vmem:[#allocation4 + $0x10] sm:$0x1] %vm311_vm7, %v584_v5  ;;  %v952_v5 = vstv %s2882_s7  ;;  %s2965_s7 = sld [smem:[#allocation5 + $0x25]] }
 0x116   : > { %681 = vrot.lane.b32.xlu0 %v677_v6, %s2439_s6  ;;  %v953_v6 = vmul.f32 %v952_v5, %v2879_v62 }
 0x117   : > { %v615_v8 = vpop.permute.xlu1 %614  ;;  %v605_v9 = vpop.permute.xlu0 %604  ;;  %v2765_v10 = vld [vmem:[#allocation4 + $0x8] sm:$0xff] }
 0x118   : > { %617 = vst.msk [vmem:[#allocation4 + $0x29] sm:$0x1] %vm311_vm7, %v615_v8  ;;  %607 = vst.msk [vmem:[#allocation4 + $0x11] sm:$0x1] %vm311_vm7, %v605_v9  ;;  %v650_v13 = vmul.f32 %v648_v58, %v2765_v10  ;;  %v664_v18 = vmul.f32 %v662_v63, %v2765_v10  ;;  %v678_v21 = vmul.f32 %v676_v3, %v2765_v10  ;;  %v902_v58 = vstv %s2859_s17  ;;  %s2942_s17 = sld [smem:[#allocation5 + $0x21]] }
 0x119   : > { %v692_v25 = vmul.f32 %v690_v7, %v2765_v10  ;;  %v706_v28 = vmul.f32 %v704_v14, %v2765_v10  ;;  %v720_v11 = vmul.f32 %v718_v19, %v2765_v10  ;;  %v903_v59 = vmul.f32 %v902_v58, %v2833_v41 }
 0x11a   : > { %695 = vrot.lane.b32.xlu0 %v691_v12, %s2440_s19  ;;  %655 = vrot.lane.b32.xlu1 %v650_v13, %s2437_s28  ;;  %v924_v63 = vstv %s2866_s21  ;;  %v939_v3 = vmul.f32 %v938_v2, %v2879_v62  ;;  %v966_v8 = vstv %s2889_s16  ;;  %s2951_s21 = sld [smem:[#allocation5 + $0x22]]  ;;  %s2969_s16 = sld [smem:[#allocation5]] }
 0x11b   : > { %v636_v15 = vpop.permute.xlu1 %635  ;;  %v626_v16 = vpop.permute.xlu0 %625  ;;  %v2811_v32 = vld [vmem:[#allocation4 + $0x9] sm:$0xff]  ;;  %v925_v0 = vmul.f32 %v924_v63, %v2879_v62  ;;  %v967_v12 = vmul.f32 %v966_v8, %v2879_v62  ;;  %v980_v14 = vstv %s2896_s8  ;;  %s2976_s8 = sld [smem:[#allocation5 + $0x26]] }
 0x11c   : > { %638 = vst.msk [vmem:[#allocation4 + $0x2a] sm:$0x1] %vm311_vm7, %v636_v15  ;;  %628 = vst.msk [vmem:[#allocation4 + $0x12] sm:$0x1] %vm311_vm7, %v626_v16  ;;  %v742_v34 = vmul.f32 %v740_v23, %v2811_v32  ;;  %v756_v37 = vmul.f32 %v754_v26, %v2811_v32  ;;  %v770_v40 = vmul.f32 %v768_v29, %v2811_v32 }
 0x11d   : > { %v784_v44 = vmul.f32 %v782_v31, %v2811_v32  ;;  %v798_v47 = vmul.f32 %v796_v35, %v2811_v32  ;;  %v812_v50 = vmul.f32 %v810_v38, %v2811_v32  ;;  %v981_v15 = vmul.f32 %v980_v14, %v2879_v62 }
 0x11e   : > { %709 = vrot.lane.b32.xlu0 %v705_v17, %s2441_s30  ;;  %669 = vrot.lane.b32.xlu1 %v664_v18, %s2438_s5  ;;  %v994_v17 = vstv %s2905_s24  ;;  %v1072_v35 = vstv %s2942_s17  ;;  %s2983_s24 = sld [smem:[#allocation5 + $0x27]]  ;;  %s3019_s17 = sld [smem:[#allocation5 + $0x2c]] }
 0x11f   : > { %v2857_v52 = vld [vmem:[#allocation4 + $0xa] sm:$0xff]  ;;  %v995_v18 = vmul.f32 %v994_v17, %v2879_v62 }
 0x120   : > { %v834_v54 = vmul.f32 %v832_v42, %v2857_v52  ;;  %v848_v57 = vmul.f32 %v846_v45, %v2857_v52  ;;  %v862_v60 = vmul.f32 %v860_v48, %v2857_v52  ;;  %v876_v1 = vmul.f32 %v874_v51, %v2857_v52 }
 0x121   : > { %v890_v4 = vmul.f32 %v888_v55, %v2857_v52  ;;  %v904_v7 = vmul.f32 %v902_v58, %v2857_v52  ;;  %v1086_v38 = vstv %s2951_s21  ;;  %v1122_v48 = vstv %s2965_s7  ;;  %s3024_s21 = sld [smem:[#allocation5 + $0x7]]  ;;  %s3040_s7 = sld [smem:[#allocation5 + $0x2e]] }
 0x122   : > { %723 = vrot.lane.b32.xlu0 %v719_v20, %s2442_s25  ;;  %683 = vrot.lane.b32.xlu1 %v678_v21, %s2439_s6  ;;  %v2925_v20 = vld [vmem:[#allocation4 + $0x4] sm:$0xff]  ;;  %v1016_v21 = vstv %s2912_s23  ;;  %v1136_v55 = vstv %s2976_s8  ;;  %s2992_s23 = sld [smem:[#allocation5 + $0x28]]  ;;  %s3054_s8 = sld [smem:[#allocation5 + $0x15]] }
 0x123   : > { %v2903_v9 = vld [vmem:[#allocation4 + $0xb] sm:$0xff]  ;;  %v1017_v23 = vmul.f32 %v1016_v21, %v2925_v20 }
 0x124   : > { %v926_v13 = vmul.f32 %v924_v63, %v2903_v9  ;;  %v940_v16 = vmul.f32 %v938_v2, %v2903_v9  ;;  %v954_v19 = vmul.f32 %v952_v5, %v2903_v9  ;;  %v2949_v31 = vld [vmem:[#allocation4 + $0xc] sm:$0xff] }
 0x126   : > { %745 = vrot.lane.b32.xlu0 %v741_v24, %s2437_s28  ;;  %697 = vrot.lane.b32.xlu1 %v692_v25, %s2440_s19  ;;  %v968_v24 = vmul.f32 %v966_v8, %v2903_v9  ;;  %v1030_v25 = vstv %s2919_s27  ;;  %s2996_s27 = sld [smem:[#allocation5 + $0xe]] }
 0x127   : > { %v1031_v26 = vmul.f32 %v1030_v25, %v2925_v20 }
 0x12a   : > { %759 = vrot.lane.b32.xlu0 %v755_v27, %s2438_s5  ;;  %711 = vrot.lane.b32.xlu1 %v706_v28, %s2441_s30  ;;  %v982_v27 = vmul.f32 %v980_v14, %v2903_v9  ;;  %v1044_v28 = vstv %s2928_s29  ;;  %s3003_s29 = sld [smem:[#allocation5 + $0x29]] }
 0x12b   : > { %v1045_v29 = vmul.f32 %v1044_v28, %v2925_v20  ;;  %v1046_v42 = vmul.f32 %v1044_v28, %v2949_v31 }
 0x12c   : > { %v826_v8 = vstv %s2996_s27  ;;  %s3079_s27 = sld [smem:[#allocation5 + $0x33]] }
 0x12e   : > { %773 = vrot.lane.b32.xlu0 %v769_v30, %s2439_s6  ;;  %725 = vrot.lane.b32.xlu1 %v720_v11, %s2442_s25  ;;  %v996_v30 = vmul.f32 %v994_v17, %v2903_v9  ;;  %v1058_v11 = vstv %s2935_s4  ;;  %s3010_s4 = sld [smem:[#allocation5 + $0x2b]] }
 0x132   : > { %787 = vrot.lane.b32.xlu0 %v783_v33, %s2440_s19  ;;  %747 = vrot.lane.b32.xlu1 %v742_v34, %s2437_s28  ;;  %v1059_v33 = vmul.f32 %v1058_v11, %v2925_v20  ;;  %v1018_v34 = vmul.f32 %v1016_v21, %v2949_v31  ;;  %v827_v21 = vmul.f32 %v826_v8, %v2833_v41 }
 0x134   : > { %v1200_v41 = vstv %s3010_s4  ;;  %s3098_s4 = sld [smem:[#allocation5 + $0x35]] }
 0x136   : > { %801 = vrot.lane.b32.xlu0 %v797_v36, %s2441_s30  ;;  %761 = vrot.lane.b32.xlu1 %v756_v37, %s2438_s5  ;;  %v1073_v36 = vmul.f32 %v1072_v35, %v2925_v20  ;;  %v1032_v37 = vmul.f32 %v1030_v25, %v2949_v31 }
 0x13a   : > { %815 = vrot.lane.b32.xlu0 %v811_v39, %s2442_s25  ;;  %775 = vrot.lane.b32.xlu1 %v770_v40, %s2439_s6  ;;  %v1087_v40 = vmul.f32 %v1086_v38, %v2925_v20 }
 0x13e   : > { %837 = vrot.lane.b32.xlu0 %v833_v43, %s2437_s28  ;;  %789 = vrot.lane.b32.xlu1 %v784_v44, %s2440_s19  ;;  %v2973_v43 = vld [vmem:[#allocation4 + $0x5] sm:$0xff]  ;;  %v1108_v44 = vstv %s2958_s3  ;;  %s3033_s3 = sld [smem:[#allocation5 + $0x2d]] }
 0x13f   : > { %v1123_v51 = vmul.f32 %v1122_v48, %v2973_v43 }
 0x142   : > { %851 = vrot.lane.b32.xlu0 %v847_v46, %s2438_s5  ;;  %803 = vrot.lane.b32.xlu1 %v798_v47, %s2441_s30  ;;  %v1109_v46 = vmul.f32 %v1108_v44, %v2973_v43  ;;  %v1060_v47 = vmul.f32 %v1058_v11, %v2949_v31 }
 0x146   : > { %865 = vrot.lane.b32.xlu0 %v861_v49, %s2439_s6  ;;  %817 = vrot.lane.b32.xlu1 %v812_v50, %s2442_s25  ;;  %v642_v49 = vstv %s2969_s16  ;;  %s3049_s16 = sld [smem:[#allocation5 + $0x2f]] }
 0x147   : > { %v644_v17 = vmul.f32 %v642_v49, %v2765_v10 }
 0x14a   : > { %879 = vrot.lane.b32.xlu0 %v875_v53, %s2440_s19  ;;  %839 = vrot.lane.b32.xlu1 %v834_v54, %s2437_s28  ;;  %v1074_v53 = vmul.f32 %v1072_v35, %v2949_v31  ;;  %v643_v54 = vmul.f32 %v642_v49, %v2742_v61  ;;  %v1150_v61 = vstv %s2983_s24  ;;  %v828_v49 = vmul.f32 %v826_v8, %v2857_v52  ;;  %v3061_v52 = vld [vmem:[#allocation4 + $0xe] sm:$0xff]  ;;  %s3063_s24 = sld [smem:[#allocation5 + $0x30]] }
 0x14e   : > { %893 = vrot.lane.b32.xlu0 %v889_v56, %s2441_s30  ;;  %853 = vrot.lane.b32.xlu1 %v848_v57, %s2438_s5 }
 0x152   : > { %907 = vrot.lane.b32.xlu0 %v903_v59, %s2442_s25  ;;  %867 = vrot.lane.b32.xlu1 %v862_v60, %s2439_s6  ;;  %v1137_v59 = vmul.f32 %v1136_v55, %v2973_v43  ;;  %v1088_v60 = vmul.f32 %v1086_v38, %v2949_v31  ;;  %v734_v38 = vstv %s3024_s21  ;;  %s3110_s21 = sld [smem:[#allocation5 + $0x1c]] }
 0x156   : > { %929 = vrot.lane.b32.xlu0 %v925_v0, %s2437_s28  ;;  %881 = vrot.lane.b32.xlu1 %v876_v1, %s2440_s19  ;;  %v3001_v0 = vld [vmem:[#allocation4 + $0xd] sm:$0xff] }
 0x157   : > { %v1110_v5 = vmul.f32 %v1108_v44, %v3001_v0  ;;  %v1152_v35 = vmul.f32 %v1150_v61, %v3001_v0 }
 0x15a   : > { %943 = vrot.lane.b32.xlu0 %v939_v3, %s2438_s5  ;;  %895 = vrot.lane.b32.xlu1 %v890_v4, %s2441_s30  ;;  %v1151_v4 = vmul.f32 %v1150_v61, %v2973_v43  ;;  %v1202_v61 = vmul.f32 %v1200_v41, %v3061_v52 }
 0x15e   : > { %957 = vrot.lane.b32.xlu0 %v953_v6, %s2439_s6  ;;  %909 = vrot.lane.b32.xlu1 %v904_v7, %s2442_s25  ;;  %v1164_v7 = vstv %s2992_s23  ;;  %s3070_s23 = sld [smem:[#allocation5 + $0x32]] }
 0x162   : > { %971 = vrot.lane.b32.xlu0 %v967_v12, %s2440_s19  ;;  %931 = vrot.lane.b32.xlu1 %v926_v13, %s2437_s28 }
 0x166   : > { %985 = vrot.lane.b32.xlu0 %v981_v15, %s2441_s30  ;;  %945 = vrot.lane.b32.xlu1 %v940_v16, %s2438_s5  ;;  %v1165_v15 = vmul.f32 %v1164_v7, %v2973_v43  ;;  %v1124_v16 = vmul.f32 %v1122_v48, %v3001_v0  ;;  %v1228_v48 = vstv %s3033_s3  ;;  %s3120_s3 = sld [smem:[#allocation5 + $0x37]] }
 0x16a   : > { %999 = vrot.lane.b32.xlu0 %v995_v18, %s2442_s25  ;;  %959 = vrot.lane.b32.xlu1 %v954_v19, %s2439_s6  ;;  %v1178_v19 = vstv %s3003_s29  ;;  %s3091_s29 = sld [smem:[#allocation5 + $0x34]] }
 0x16b   : > { %v1179_v10 = vmul.f32 %v1178_v19, %v2973_v43 }
 0x16e   : > { %1021 = vrot.lane.b32.xlu0 %v1017_v23, %s2437_s28  ;;  %973 = vrot.lane.b32.xlu1 %v968_v24, %s2440_s19 }
 0x172   : > { %1035 = vrot.lane.b32.xlu0 %v1031_v26, %s2438_s5  ;;  %987 = vrot.lane.b32.xlu1 %v982_v27, %s2441_s30  ;;  %v1138_v27 = vmul.f32 %v1136_v55, %v3001_v0  ;;  %v1180_v55 = vmul.f32 %v1178_v19, %v3001_v0 }
 0x176   : > { %1049 = vrot.lane.b32.xlu0 %v1045_v29, %s2439_s6  ;;  %1001 = vrot.lane.b32.xlu1 %v996_v30, %s2442_s25  ;;  %v3030_v29 = vld [vmem:[#allocation4 + $0x6] sm:$0xff] }
 0x17a   : > { %1063 = vrot.lane.b32.xlu0 %v1059_v33, %s2440_s19  ;;  %1023 = vrot.lane.b32.xlu1 %v1018_v34, %s2437_s28  ;;  %v1201_v34 = vmul.f32 %v1200_v41, %v3030_v29 }
 0x17e   : > { %1077 = vrot.lane.b32.xlu0 %v1073_v36, %s2441_s30  ;;  %1037 = vrot.lane.b32.xlu1 %v1032_v37, %s2438_s5  ;;  %v1214_v37 = vstv %s3019_s17  ;;  %s3105_s17 = sld [smem:[#allocation5 + $0x36]] }
 0x17f   : > { %v1215_v44 = vmul.f32 %v1214_v37, %v3030_v29  ;;  %v1216_v8 = vmul.f32 %v1214_v37, %v3061_v52 }
 0x180   : > { %v654_v39 = vpop.permute.xlu0 %653 }
 0x181   : > { %v659_v56 = vadd.f32 %v654_v39, %v643_v54 }
 0x182   : > { %1091 = vrot.lane.b32.xlu0 %v1087_v40, %s2442_s25  ;;  %1051 = vrot.lane.b32.xlu1 %v1046_v42, %s2439_s6 }
 0x184   : > { %v668_v45 = vpop.permute.xlu0 %667 }
 0x185   : > { %v673_v63 = vadd.f32 %v668_v45, %v659_v56  ;;  %v1166_v45 = vmul.f32 %v1164_v7, %v3001_v0 }
 0x186   : > { %1113 = vrot.lane.b32.xlu0 %v1109_v46, %s2437_s28  ;;  %1065 = vrot.lane.b32.xlu1 %v1060_v47, %s2440_s19  ;;  %v735_v46 = vmul.f32 %v734_v38, %v2787_v22  ;;  %v1229_v22 = vmul.f32 %v1228_v48, %v3030_v29 }
 0x188   : > { %v682_v50 = vpop.permute.xlu0 %681 }
 0x189   : > { %v687_v1 = vadd.f32 %v682_v50, %v673_v63 }
 0x18a   : > { %1127 = vrot.lane.b32.xlu0 %v1123_v51, %s2438_s5  ;;  %1079 = vrot.lane.b32.xlu1 %v1074_v53, %s2441_s30 }
 0x18c   : > { %v656_v57 = vpop.permute.xlu1 %655  ;;  %v696_v58 = vpop.permute.xlu0 %695 }
 0x18d   : > { %v701_v6 = vadd.f32 %v696_v58, %v687_v1  ;;  %v660_v23 = vadd.f32 %v656_v57, %v644_v17  ;;  %v1242_v57 = vstv %s3040_s7  ;;  %s3127_s7 = sld [smem:[#allocation5 + $0x39]] }
 0x18e   : > { %1141 = vrot.lane.b32.xlu0 %v1137_v59, %s2439_s6  ;;  %1093 = vrot.lane.b32.xlu1 %v1088_v60, %s2442_s25  ;;  %v1243_v63 = vmul.f32 %v1242_v57, %v3030_v29  ;;  %v1244_v41 = vmul.f32 %v1242_v57, %v3061_v52  ;;  %v1348_v57 = vstv %s3105_s17  ;;  %s3194_s17 = sld [smem:[#allocation5 + $0x43]] }
 0x190   : > { %v670_v2 = vpop.permute.xlu1 %669  ;;  %v710_v3 = vpop.permute.xlu0 %709 }
 0x191   : > { %v715_v12 = vadd.f32 %v710_v3, %v701_v6  ;;  %v674_v28 = vadd.f32 %v670_v2, %v660_v23  ;;  %v1256_v2 = vstv %s3049_s16  ;;  %v918_v3 = vstv %s3054_s8  ;;  %s3135_s16 = sld [smem:[#allocation5 + $0x3a]]  ;;  %s3148_s8 = sld [smem:[#allocation5 + $0x3b]] }
 0x192   : > { %1155 = vrot.lane.b32.xlu0 %v1151_v4, %s2440_s19  ;;  %1115 = vrot.lane.b32.xlu1 %v1110_v5, %s2437_s28  ;;  %v1257_v7 = vmul.f32 %v1256_v2, %v3030_v29  ;;  %v1258_v37 = vmul.f32 %v1256_v2, %v3061_v52 }
 0x194   : > { %v684_v13 = vpop.permute.xlu1 %683  ;;  %v724_v14 = vpop.permute.xlu0 %723 }
 0x195   : > { %v729_v18 = vadd.f32 %v724_v14, %v715_v12  ;;  %v688_v30 = vadd.f32 %v684_v13, %v674_v28  ;;  %v736_v12 = vmul.f32 %v734_v38, %v2811_v32  ;;  %v1270_v14 = vstv %s3063_s24  ;;  %s3155_s24 = sld [smem:[#allocation5 + $0x3c]] }
 0x196   : > { %1169 = vrot.lane.b32.xlu0 %v1165_v15, %s2441_s30  ;;  %1129 = vrot.lane.b32.xlu1 %v1124_v16, %s2438_s5  ;;  %v919_v15 = vmul.f32 %v918_v3, %v2879_v62  ;;  %v1230_v32 = vmul.f32 %v1228_v48, %v3061_v52  ;;  %v1272_v48 = vmul.f32 %v1270_v14, %v3061_v52 }
 0x197   : > { %v3026_v24 = vadd.f32 %v827_v21, %v729_v18  ;;  %v1271_v21 = vmul.f32 %v1270_v14, %v3030_v29 }
 0x198   : > { %v698_v25 = vpop.permute.xlu1 %697  ;;  %v746_v26 = vpop.permute.xlu0 %745 }
 0x199   : > { %v702_v36 = vadd.f32 %v698_v25, %v688_v30  ;;  %v751_v50 = vadd.f32 %v746_v26, %v735_v46  ;;  %v3088_v25 = vld [vmem:[#allocation4 + $0x18] sm:$0xff]  ;;  %v1292_v26 = vstv %s3070_s23  ;;  %s3162_s23 = sld [smem:[#allocation5 + $0x40]] }
 0x19a   : > { %1183 = vrot.lane.b32.xlu0 %v1179_v10, %s2442_s25  ;;  %1143 = vrot.lane.b32.xlu1 %v1138_v27, %s2439_s6  ;;  %v1293_v28 = vmul.f32 %v1292_v26, %v3088_v25 }
 0x19c   : > { %v712_v11 = vpop.permute.xlu1 %711  ;;  %v760_v33 = vpop.permute.xlu0 %759 }
 0x19d   : > { %v716_v39 = vadd.f32 %v712_v11, %v702_v36  ;;  %v765_v56 = vadd.f32 %v760_v33, %v751_v50  ;;  %v1306_v11 = vstv %s3079_s27  ;;  %v3118_v50 = vld [vmem:[#allocation4 + $0x20] sm:$0xff]  ;;  %s3167_s27 = sld [smem:[#allocation5 + $0x23]] }
 0x19e   : > { %1205 = vrot.lane.b32.xlu0 %v1201_v34, %s2437_s28  ;;  %1157 = vrot.lane.b32.xlu1 %v1152_v35, %s2440_s19  ;;  %v1307_v36 = vmul.f32 %v1306_v11, %v3088_v25 }
 0x1a0   : > { %v726_v40 = vpop.permute.xlu1 %725  ;;  %v774_v42 = vpop.permute.xlu0 %773 }
 0x1a1   : > { %v730_v47 = vadd.f32 %v726_v40, %v716_v39  ;;  %v779_v58 = vadd.f32 %v774_v42, %v765_v56  ;;  %v1320_v39 = vstv %s3091_s29  ;;  %v920_v40 = vmul.f32 %v918_v3, %v2903_v9  ;;  %s3177_s29 = sld [smem:[#allocation5 + $0x41]] }
 0x1a2   : > { %1219 = vrot.lane.b32.xlu0 %v1215_v44, %s2438_s5  ;;  %1171 = vrot.lane.b32.xlu1 %v1166_v45, %s2441_s30  ;;  %v1334_v9 = vstv %s3098_s4  ;;  %v1362_v3 = vstv %s3120_s3  ;;  %s3186_s4 = sld [smem:[#allocation5 + $0x42]]  ;;  %s3214_s3 = sld [smem:[#allocation5 + $0x44]] }
 0x1a3   : > { %v3056_v51 = vadd.f32 %v828_v49, %v730_v47  ;;  %v1321_v47 = vmul.f32 %v1320_v39, %v3088_v25 }
 0x1a4   : > { %v748_v53 = vpop.permute.xlu1 %747  ;;  %v788_v54 = vpop.permute.xlu0 %787 }
 0x1a5   : > { %v793_v1 = vadd.f32 %v788_v54, %v779_v58  ;;  %v752_v16 = vadd.f32 %v748_v53, %v736_v12  ;;  %v1010_v58 = vstv %s3110_s21  ;;  %v1363_v12 = vmul.f32 %v1362_v3, %v3088_v25  ;;  %s3205_s21 = sld [smem:[#allocation5 + $0x3d]] }
 0x1a6   : > { %1233 = vrot.lane.b32.xlu0 %v1229_v22, %s2439_s6  ;;  %1185 = vrot.lane.b32.xlu1 %v1180_v55, %s2442_s25  ;;  %v1335_v22 = vmul.f32 %v1334_v9, %v3088_v25  ;;  %v1294_v55 = vmul.f32 %v1292_v26, %v3118_v50 }
 0x1a8   : > { %v762_v59 = vpop.permute.xlu1 %761  ;;  %v802_v60 = vpop.permute.xlu0 %801 }
 0x1a9   : > { %v807_v4 = vadd.f32 %v802_v60, %v793_v1  ;;  %v766_v23 = vadd.f32 %v762_v59, %v752_v16  ;;  %v1308_v1 = vmul.f32 %v1306_v11, %v3118_v50  ;;  %v1384_v16 = vstv %s3127_s7  ;;  %s3221_s7 = sld [smem:[#allocation5 + $0x3e]] }
 0x1aa   : > { %1247 = vrot.lane.b32.xlu0 %v1243_v63, %s2440_s19  ;;  %1207 = vrot.lane.b32.xlu1 %v1202_v61, %s2437_s28  ;;  %v1349_v61 = vmul.f32 %v1348_v57, %v3088_v25  ;;  %v1012_v11 = vmul.f32 %v1010_v58, %v2949_v31  ;;  %v1426_v31 = vstv %s3155_s24  ;;  %s3241_s24 = sld [smem:[#allocation5 + $0x47]] }
 0x1ac   : > { %v776_v5 = vpop.permute.xlu1 %775  ;;  %v816_v6 = vpop.permute.xlu0 %815 }
 0x1ad   : > { %v821_v13 = vadd.f32 %v816_v6, %v807_v4  ;;  %v780_v62 = vadd.f32 %v776_v5, %v766_v23  ;;  %v1011_v4 = vmul.f32 %v1010_v58, %v2925_v20  ;;  %v1398_v23 = vstv %s3135_s16  ;;  %s3226_s16 = sld [smem:[#allocation5 + $0x2a]] }
 0x1ae   : > { %1261 = vrot.lane.b32.xlu0 %v1257_v7, %s2441_s30  ;;  %1221 = vrot.lane.b32.xlu1 %v1216_v8, %s2438_s5  ;;  %v1490_v58 = vstv %s3177_s29  ;;  %s3271_s29 = sld [smem:[#allocation5 + $0x4f]] }
 0x1af   : > { %v3084_v17 = vadd.f32 %v919_v15, %v821_v13  ;;  %v1322_v13 = vmul.f32 %v1320_v39, %v3118_v50  ;;  %v3145_v15 = vld [vmem:[#allocation4 + $0x19] sm:$0xff] }
 0x1b0   : > { %v790_v18 = vpop.permute.xlu1 %789  ;;  %v838_v19 = vpop.permute.xlu0 %837 }
 0x1b1   : > { %v794_v30 = vadd.f32 %v790_v18, %v780_v62  ;;  %v843_v42 = vadd.f32 %v838_v19, %v3026_v24  ;;  %v1336_v19 = vmul.f32 %v1334_v9, %v3118_v50  ;;  %v1476_v9 = vstv %s3162_s23  ;;  %s3249_s23 = sld [smem:[#allocation5 + $0x4e]] }
 0x1b2   : > { %1275 = vrot.lane.b32.xlu0 %v1271_v21, %s2442_s25  ;;  %1235 = vrot.lane.b32.xlu1 %v1230_v32, %s2439_s6  ;;  %v1385_v21 = vmul.f32 %v1384_v16, %v3145_v15 }
 0x1b4   : > { %v804_v10 = vpop.permute.xlu1 %803  ;;  %v852_v27 = vpop.permute.xlu0 %851 }
 0x1b5   : > { %v808_v33 = vadd.f32 %v804_v10, %v794_v30  ;;  %v857_v49 = vadd.f32 %v852_v27, %v843_v42  ;;  %v1350_v27 = vmul.f32 %v1348_v57, %v3118_v50  ;;  %v1412_v30 = vstv %s3148_s8  ;;  %s3234_s8 = sld [smem:[#allocation5 + $0x45]] }
 0x1b6   : > { %1297 = vrot.lane.b32.xlu0 %v1293_v28, %s2437_s28  ;;  %1249 = vrot.lane.b32.xlu1 %v1244_v41, %s2440_s19  ;;  %v1399_v28 = vmul.f32 %v1398_v23, %v3145_v15 }
 0x1b8   : > { %v818_v34 = vpop.permute.xlu1 %817  ;;  %v866_v35 = vpop.permute.xlu0 %865 }
 0x1b9   : > { %v822_v38 = vadd.f32 %v818_v34, %v808_v33  ;;  %v871_v24 = vadd.f32 %v866_v35, %v857_v49  ;;  %v3183_v49 = vld [vmem:[#allocation4 + $0x1a] sm:$0xff] }
 0x1ba   : > { %1311 = vrot.lane.b32.xlu0 %v1307_v36, %s2438_s5  ;;  %1263 = vrot.lane.b32.xlu1 %v1258_v37, %s2441_s30  ;;  %v1364_v37 = vmul.f32 %v1362_v3, %v3118_v50  ;;  %v1491_v3 = vmul.f32 %v1490_v58, %v3183_v49 }
 0x1bb   : > { %v3113_v44 = vadd.f32 %v920_v40, %v822_v38  ;;  %v1413_v38 = vmul.f32 %v1412_v30, %v3145_v15  ;;  %v3174_v40 = vld [vmem:[#allocation4 + $0x21] sm:$0xff] }
 0x1bc   : > { %v840_v45 = vpop.permute.xlu1 %839  ;;  %v880_v46 = vpop.permute.xlu0 %879 }
 0x1bd   : > { %v885_v56 = vadd.f32 %v880_v46, %v871_v24  ;;  %v844_v5 = vadd.f32 %v840_v45, %v3056_v51  ;;  %v1386_v46 = vmul.f32 %v1384_v16, %v3174_v40  ;;  %v1102_v24 = vstv %s3167_s27  ;;  %s3262_s27 = sld [smem:[#allocation5 + $0x48]] }
 0x1be   : > { %1325 = vrot.lane.b32.xlu0 %v1321_v47, %s2439_s6  ;;  %1277 = vrot.lane.b32.xlu1 %v1272_v48, %s2442_s25  ;;  %v1427_v47 = vmul.f32 %v1426_v31, %v3145_v15  ;;  %v1518_v16 = vstv %s3194_s17  ;;  %s3291_s17 = sld [smem:[#allocation5 + $0x50]] }
 0x1c0   : > { %v854_v53 = vpop.permute.xlu1 %853  ;;  %v894_v54 = vpop.permute.xlu0 %893 }
 0x1c1   : > { %v899_v59 = vadd.f32 %v894_v54, %v885_v56  ;;  %v858_v14 = vadd.f32 %v854_v53, %v844_v5  ;;  %v1477_v56 = vmul.f32 %v1476_v9, %v3183_v49  ;;  %v1504_v5 = vstv %s3186_s4  ;;  %s3278_s4 = sld [smem:[#allocation5 + $0x49]] }
 0x1c2   : > { %1339 = vrot.lane.b32.xlu0 %v1335_v22, %s2440_s19  ;;  %1299 = vrot.lane.b32.xlu1 %v1294_v55, %s2437_s28  ;;  %v1400_v55 = vmul.f32 %v1398_v23, %v3174_v40  ;;  %v1440_v23 = vstv %s3205_s21  ;;  %s3300_s21 = sld [smem:[#allocation5 + $0x4a]] }
 0x1c4   : > { %v868_v60 = vpop.permute.xlu1 %867  ;;  %v908_v63 = vpop.permute.xlu0 %907 }
 0x1c5   : > { %v913_v2 = vadd.f32 %v908_v63, %v899_v59  ;;  %v872_v20 = vadd.f32 %v868_v60, %v858_v14  ;;  %v1103_v59 = vmul.f32 %v1102_v24, %v2973_v43  ;;  %v3211_v14 = vld [vmem:[#allocation4 + $0x22] sm:$0xff] }
 0x1c6   : > { %1353 = vrot.lane.b32.xlu0 %v1349_v61, %s2441_s30  ;;  %1313 = vrot.lane.b32.xlu1 %v1308_v1, %s2438_s5 }
 0x1c7   : > { %v3141_v6 = vadd.f32 %v1011_v4, %v913_v2  ;;  %v1414_v2 = vmul.f32 %v1412_v30, %v3174_v40  ;;  %v1441_v30 = vmul.f32 %v1440_v23, %v3145_v15 }
 0x1c8   : > { %v882_v7 = vpop.permute.xlu1 %881  ;;  %v930_v8 = vpop.permute.xlu0 %929 }
 0x1c9   : > { %v886_v32 = vadd.f32 %v882_v7, %v872_v20  ;;  %v935_v33 = vadd.f32 %v930_v8, %v3084_v17  ;;  %v1428_v8 = vmul.f32 %v1426_v31, %v3174_v40  ;;  %v1194_v31 = vstv %s3226_s16  ;;  %s3325_s16 = sld [smem:[#allocation5 + $0x52]] }
 0x1ca   : > { %1367 = vrot.lane.b32.xlu0 %v1363_v12, %s2442_s25  ;;  %1327 = vrot.lane.b32.xlu1 %v1322_v13, %s2439_s6  ;;  %v1505_v12 = vmul.f32 %v1504_v5, %v3183_v49 }
 0x1cc   : > { %v896_v51 = vpop.permute.xlu1 %895  ;;  %v944_v18 = vpop.permute.xlu0 %943 }
 0x1cd   : > { %v900_v26 = vadd.f32 %v896_v51, %v886_v32  ;;  %v949_v39 = vadd.f32 %v944_v18, %v935_v33 }
 0x1ce   : > { %1341 = vrot.lane.b32.xlu1 %v1336_v19, %s2440_s19  ;;  %1389 = vrot.lane.b32.xlu0 %v1385_v21, %s2437_s28  ;;  %v1478_v19 = vmul.f32 %v1476_v9, %v3211_v14  ;;  %v1519_v21 = vmul.f32 %v1518_v16, %v3183_v49  ;;  %v1546_v9 = vstv %s3234_s8  ;;  %s3334_s8 = sld [smem:[#allocation5 + $0x4c]] }
 0x1d0   : > { %v910_v62 = vpop.permute.xlu1 %909  ;;  %v958_v10 = vpop.permute.xlu0 %957 }
 0x1d1   : > { %v914_v41 = vadd.f32 %v910_v62, %v900_v26  ;;  %v963_v17 = vadd.f32 %v958_v10, %v949_v39  ;;  %v1104_v26 = vmul.f32 %v1102_v24, %v3001_v0  ;;  %v1532_v0 = vstv %s3214_s3  ;;  %s3309_s3 = sld [smem:[#allocation5 + $0x51]] }
 0x1d2   : > { %1355 = vrot.lane.b32.xlu1 %v1350_v27, %s2441_s30  ;;  %1403 = vrot.lane.b32.xlu0 %v1399_v28, %s2438_s5  ;;  %v1454_v39 = vstv %s3221_s7  ;;  %v1195_v24 = vmul.f32 %v1194_v31, %v3030_v29  ;;  %s3318_s7 = sld [smem:[#allocation5 + $0x4b]] }
 0x1d3   : > { %v3170_v34 = vadd.f32 %v1012_v11, %v914_v41  ;;  %v1492_v41 = vmul.f32 %v1490_v58, %v3211_v14 }
 0x1d4   : > { %v932_v35 = vpop.permute.xlu1 %931  ;;  %v972_v36 = vpop.permute.xlu0 %971 }
 0x1d5   : > { %v977_v48 = vadd.f32 %v972_v36, %v963_v17  ;;  %v936_v60 = vadd.f32 %v932_v35, %v3113_v44  ;;  %v1506_v36 = vmul.f32 %v1504_v5, %v3211_v14  ;;  %v1660_v5 = vstv %s3249_s23  ;;  %s3344_s23 = sld [smem:[#allocation5 + $0x53]] }
 0x1d6   : > { %1369 = vrot.lane.b32.xlu1 %v1364_v37, %s2442_s25  ;;  %1417 = vrot.lane.b32.xlu0 %v1413_v38, %s2439_s6  ;;  %v1533_v37 = vmul.f32 %v1532_v0, %v3183_v49 }
 0x1d8   : > { %v946_v42 = vpop.permute.xlu1 %945  ;;  %v986_v45 = vpop.permute.xlu0 %985 }
 0x1d9   : > { %v991_v53 = vadd.f32 %v986_v45, %v977_v48  ;;  %v950_v4 = vadd.f32 %v946_v42, %v936_v60  ;;  %v1568_v60 = vstv %s3241_s24  ;;  %s3340_s24 = sld [smem:[#allocation5 + $0x31]] }
 0x1da   : > { %1391 = vrot.lane.b32.xlu1 %v1386_v46, %s2437_s28  ;;  %1431 = vrot.lane.b32.xlu0 %v1427_v47, %s2440_s19  ;;  %v1520_v46 = vmul.f32 %v1518_v16, %v3211_v14  ;;  %v1455_v47 = vmul.f32 %v1454_v39, %v3145_v15  ;;  %v1582_v16 = vstv %s3262_s27  ;;  %s3351_s27 = sld [smem:[#allocation5 + $0x55]] }
 0x1dc   : > { %v960_v54 = vpop.permute.xlu1 %959  ;;  %v1000_v22 = vpop.permute.xlu0 %999 }
 0x1dd   : > { %v1005_v57 = vadd.f32 %v1000_v22, %v991_v53  ;;  %v964_v43 = vadd.f32 %v960_v54, %v950_v4  ;;  %v3268_v4 = vld [vmem:[#allocation4 + $0x1c] sm:$0xff] }
 0x1de   : > { %1405 = vrot.lane.b32.xlu1 %v1400_v55, %s2438_s5  ;;  %1481 = vrot.lane.b32.xlu0 %v1477_v56, %s2437_s28  ;;  %v1442_v56 = vmul.f32 %v1440_v23, %v3174_v40 }
 0x1df   : > { %v3200_v63 = vadd.f32 %v1103_v59, %v1005_v57  ;;  %v1547_v57 = vmul.f32 %v1546_v9, %v3183_v49  ;;  %v3259_v59 = vld [vmem:[#allocation4 + $0x1b] sm:$0xff] }
 0x1e0   : > { %v974_v61 = vpop.permute.xlu1 %973  ;;  %v1022_v1 = vpop.permute.xlu0 %1021  ;;  %v1583_v23 = vmul.f32 %v1582_v16, %v3259_v59 }
 0x1e1   : > { %v978_v13 = vadd.f32 %v974_v61, %v964_v43  ;;  %v1027_v62 = vadd.f32 %v1022_v1, %v3141_v6  ;;  %v1534_v1 = vmul.f32 %v1532_v0, %v3211_v14  ;;  %v3297_v0 = vld [vmem:[#allocation4 + $0x24] sm:$0xff] }
 0x1e2   : > { %1419 = vrot.lane.b32.xlu1 %v1414_v2, %s2439_s6  ;;  %1495 = vrot.lane.b32.xlu0 %v1491_v3, %s2438_s5  ;;  %v1569_v2 = vmul.f32 %v1568_v60, %v3259_v59 }
 0x1e4   : > { %v988_v7 = vpop.permute.xlu1 %987  ;;  %v1036_v44 = vpop.permute.xlu0 %1035 }
 0x1e5   : > { %v992_v20 = vadd.f32 %v988_v7, %v978_v13  ;;  %v1041_v11 = vadd.f32 %v1036_v44, %v1027_v62  ;;  %v3288_v62 = vld [vmem:[#allocation4 + $0x23] sm:$0xff] }
 0x1e6   : > { %1433 = vrot.lane.b32.xlu1 %v1428_v8, %s2440_s19  ;;  %1509 = vrot.lane.b32.xlu0 %v1505_v12, %s2439_s6  ;;  %v1456_v8 = vmul.f32 %v1454_v39, %v3174_v40  ;;  %v1661_v12 = vmul.f32 %v1660_v5, %v3268_v4 }
 0x1e8   : > { %v1002_v51 = vpop.permute.xlu1 %1001  ;;  %v1050_v18 = vpop.permute.xlu0 %1049 }
 0x1e9   : > { %v1006_v32 = vadd.f32 %v1002_v51, %v992_v20  ;;  %v1055_v33 = vadd.f32 %v1050_v18, %v1041_v11  ;;  %v1196_v20 = vmul.f32 %v1194_v31, %v3061_v52  ;;  %v1688_v31 = vstv %s3291_s17  ;;  %s3381_s17 = sld [smem:[#allocation5 + $0x5d]] }
 0x1ea   : > { %1483 = vrot.lane.b32.xlu1 %v1478_v19, %s2437_s28  ;;  %1523 = vrot.lane.b32.xlu0 %v1519_v21, %s2440_s19 }
 0x1eb   : > { %v3229_v10 = vadd.f32 %v1104_v26, %v1006_v32  ;;  %v1548_v32 = vmul.f32 %v1546_v9, %v3211_v14 }
 0x1ec   : > { %v1024_v27 = vpop.permute.xlu1 %1023  ;;  %v1064_v28 = vpop.permute.xlu0 %1063 }
 0x1ed   : > { %v1069_v38 = vadd.f32 %v1064_v28, %v1055_v33  ;;  %v1028_v53 = vadd.f32 %v1024_v27, %v3170_v34  ;;  %v1674_v27 = vstv %s3271_s29  ;;  %v1596_v33 = vstv %s3278_s4  ;;  %s3359_s29 = sld [smem:[#allocation5 + $0x5c]]  ;;  %s3372_s4 = sld [smem:[#allocation5 + $0x56]] }
 0x1ee   : > { %1497 = vrot.lane.b32.xlu1 %v1492_v41, %s2438_s5  ;;  %1445 = vrot.lane.b32.xlu0 %v1441_v30, %s2441_s30  ;;  %v1570_v41 = vmul.f32 %v1568_v60, %v3288_v62  ;;  %v1675_v30 = vmul.f32 %v1674_v27, %v3268_v4  ;;  %v1702_v60 = vstv %s3309_s3  ;;  %s3392_s3 = sld [smem:[#allocation5 + $0x3f]] }
 0x1f0   : > { %v1038_v6 = vpop.permute.xlu1 %1037  ;;  %v1078_v35 = vpop.permute.xlu0 %1077 }
 0x1f1   : > { %v1083_v17 = vadd.f32 %v1078_v35, %v1069_v38  ;;  %v1042_v58 = vadd.f32 %v1038_v6, %v1028_v53  ;;  %v1597_v38 = vmul.f32 %v1596_v33, %v3259_v59 }
 0x1f2   : > { %1511 = vrot.lane.b32.xlu1 %v1506_v36, %s2439_s6  ;;  %1537 = vrot.lane.b32.xlu0 %v1533_v37, %s2441_s30  ;;  %v1662_v37 = vmul.f32 %v1660_v5, %v3297_v0  ;;  %v1624_v5 = vstv %s3318_s7  ;;  %s3400_s7 = sld [smem:[#allocation5 + $0x38]] }
 0x1f4   : > { %v1052_v42 = vpop.permute.xlu1 %1051  ;;  %v1092_v45 = vpop.permute.xlu0 %1091 }
 0x1f5   : > { %v1097_v48 = vadd.f32 %v1092_v45, %v1083_v17  ;;  %v1056_v29 = vadd.f32 %v1052_v42, %v1042_v58 }
 0x1f6   : > { %1525 = vrot.lane.b32.xlu1 %v1520_v46, %s2440_s19  ;;  %1459 = vrot.lane.b32.xlu0 %v1455_v47, %s2442_s25  ;;  %v1584_v46 = vmul.f32 %v1582_v16, %v3288_v62  ;;  %v1689_v47 = vmul.f32 %v1688_v31, %v3268_v4  ;;  %v1716_v16 = vstv %s3325_s16  ;;  %s3405_s16 = sld [smem:[#allocation5 + $0x5e]] }
 0x1f7   : > { %v3255_v54 = vadd.f32 %v1195_v24, %v1097_v48  ;;  %v1610_v24 = vstv %s3300_s21  ;;  %s3388_s21 = sld [smem:[#allocation5 + $0x57]] }
 0x1f8   : > { %v1066_v22 = vpop.permute.xlu1 %1065  ;;  %v1114_v55 = vpop.permute.xlu0 %1113 }
 0x1f9   : > { %v1070_v3 = vadd.f32 %v1066_v22, %v1056_v29  ;;  %v1119_v51 = vadd.f32 %v1114_v55, %v3200_v63  ;;  %v1676_v55 = vmul.f32 %v1674_v27, %v3297_v0 }
 0x1fa   : > { %1447 = vrot.lane.b32.xlu1 %v1442_v56, %s2441_s30  ;;  %1551 = vrot.lane.b32.xlu0 %v1547_v57, %s2442_s25  ;;  %v1611_v56 = vmul.f32 %v1610_v24, %v3259_v59 }
 0x1fc   : > { %v1080_v34 = vpop.permute.xlu1 %1079  ;;  %v1128_v61 = vpop.permute.xlu0 %1127 }
 0x1fd   : > { %v1084_v43 = vadd.f32 %v1080_v34, %v1070_v3  ;;  %v1133_v26 = vadd.f32 %v1128_v61, %v1119_v51  ;;  %v1598_v61 = vmul.f32 %v1596_v33, %v3288_v62 }
 0x1fe   : > { %1539 = vrot.lane.b32.xlu1 %v1534_v1, %s2441_s30  ;;  %1573 = vrot.lane.b32.xlu0 %v1569_v2, %s2437_s28  ;;  %v1703_v1 = vmul.f32 %v1702_v60, %v3268_v4 }
 0x200   : > { %v1094_v7 = vpop.permute.xlu1 %1093  ;;  %v1142_v44 = vpop.permute.xlu0 %1141 }
 0x201   : > { %v1098_v13 = vadd.f32 %v1094_v7, %v1084_v43  ;;  %v1147_v52 = vadd.f32 %v1142_v44, %v1133_v26  ;;  %v1690_v44 = vmul.f32 %v1688_v31, %v3297_v0  ;;  %v1638_v26 = vstv %s3334_s8  ;;  %s3414_s8 = sld [smem:[#allocation5 + $0x58]] }
 0x202   : > { %1461 = vrot.lane.b32.xlu1 %v1456_v8, %s2442_s25  ;;  %1665 = vrot.lane.b32.xlu0 %v1661_v12, %s2437_s28  ;;  %v1625_v8 = vmul.f32 %v1624_v5, %v3259_v59 }
 0x203   : > { %v3284_v18 = vadd.f32 %v1196_v20, %v1098_v13 }
 0x204   : > { %v1116_v19 = vpop.permute.xlu1 %1115  ;;  %v1156_v21 = vpop.permute.xlu0 %1155 }
 0x205   : > { %v1161_v11 = vadd.f32 %v1156_v21, %v1147_v52  ;;  %v1120_v17 = vadd.f32 %v1116_v19, %v3229_v10  ;;  %v1612_v19 = vmul.f32 %v1610_v24, %v3288_v62  ;;  %v1717_v21 = vmul.f32 %v1716_v16, %v3268_v4  ;;  %v3378_v24 = vld [vmem:[#allocation4 + $0x1e] sm:$0xff] }
 0x206   : > { %1553 = vrot.lane.b32.xlu1 %v1548_v32, %s2442_s25  ;;  %1587 = vrot.lane.b32.xlu0 %v1583_v23, %s2438_s5  ;;  %v1704_v52 = vmul.f32 %v1702_v60, %v3297_v0  ;;  %v1766_v60 = vstv %s3372_s4 }
 0x208   : > { %v1130_v63 = vpop.permute.xlu1 %1129  ;;  %v1170_v28 = vpop.permute.xlu0 %1169 }
 0x209   : > { %v1175_v6 = vadd.f32 %v1170_v28, %v1161_v11  ;;  %v1134_v48 = vadd.f32 %v1130_v63, %v1120_v17  ;;  %v1639_v63 = vmul.f32 %v1638_v26, %v3259_v59  ;;  %v1286_v28 = vstv %s3340_s24  ;;  %s3423_s24 = sld [smem:[#allocation5 + $0x5f]] }
 0x20a   : > { %1575 = vrot.lane.b32.xlu1 %v1570_v41, %s2437_s28  ;;  %1679 = vrot.lane.b32.xlu0 %v1675_v30, %s2438_s5  ;;  %v1730_v11 = vstv %s3344_s23  ;;  %s3432_s23 = sld [smem:[#allocation5 + $0x59]] }
 0x20c   : > { %v1144_v35 = vpop.permute.xlu1 %1143  ;;  %v1184_v36 = vpop.permute.xlu0 %1183 }
 0x20d   : > { %v3306_v39 = vadd.f32 %v1184_v36, %v1175_v6  ;;  %v1148_v53 = vadd.f32 %v1144_v35, %v1134_v48  ;;  %v1287_v6 = vmul.f32 %v1286_v28, %v3088_v25 }
 0x20e   : > { %1667 = vrot.lane.b32.xlu1 %v1662_v37, %s2437_s28  ;;  %1601 = vrot.lane.b32.xlu0 %v1597_v38, %s2439_s6  ;;  %v1626_v37 = vmul.f32 %v1624_v5, %v3288_v62  ;;  %v1731_v38 = vmul.f32 %v1730_v11, %v3268_v4 }
 0x210   : > { %v1158_v42 = vpop.permute.xlu1 %1157  ;;  %v1206_v45 = vpop.permute.xlu0 %1205 }
 0x211   : > { %v1211_v9 = vadd.f32 %v1206_v45, %v3255_v54  ;;  %v1162_v57 = vadd.f32 %v1158_v42, %v1148_v53  ;;  %v3369_v42 = vld [vmem:[#allocation4 + $0x1d] sm:$0xff]  ;;  %v1752_v45 = vstv %s3351_s27  ;;  %v1844_v53 = vstv %s3359_s29  ;;  %s3446_s27 = sld [smem:[#allocation5 + $0x5a]]  ;;  %s2069_s29 = sshll.u32 %s2626_s18, 4 }
 0x212   : > { %1589 = vrot.lane.b32.xlu1 %v1584_v46, %s2438_s5  ;;  %1693 = vrot.lane.b32.xlu0 %v1689_v47, %s2439_s6  ;;  %v1718_v46 = vmul.f32 %v1716_v16, %v3297_v0  ;;  %v1753_v47 = vmul.f32 %v1752_v45, %v3369_v42  ;;  %s187_s4 = scalar_lea.vmem [#allocation10], %s2069_s29 }
 0x214   : > { %v1172_v22 = vpop.permute.xlu1 %1171  ;;  %v1220_v10 = vpop.permute.xlu0 %1219 }
 0x215   : > { %v1225_v58 = vadd.f32 %v1220_v10, %v1211_v9  ;;  %v1176_v54 = vadd.f32 %v1172_v22, %v1162_v57 }
 0x216   : > { %1681 = vrot.lane.b32.xlu1 %v1676_v55, %s2438_s5  ;;  %1615 = vrot.lane.b32.xlu0 %v1611_v56, %s2440_s19  ;;  %v1640_v55 = vmul.f32 %v1638_v26, %v3288_v62  ;;  %v1845_v56 = vmul.f32 %v1844_v53, %v3378_v24 }
 0x218   : > { %v1186_v29 = vpop.permute.xlu1 %1185  ;;  %v1234_v34 = vpop.permute.xlu0 %1233 }
 0x219   : > { %v3331_v2 = vadd.f32 %v1186_v29, %v1176_v54  ;;  %v1239_v3 = vadd.f32 %v1234_v34, %v1225_v58  ;;  %v1288_v29 = vmul.f32 %v1286_v28, %v3118_v50 }
 0x21a   : > { %1603 = vrot.lane.b32.xlu1 %v1598_v61, %s2439_s6  ;;  %1707 = vrot.lane.b32.xlu0 %v1703_v1, %s2440_s19  ;;  %v1732_v1 = vmul.f32 %v1730_v11, %v3297_v0 }
 0x21c   : > { %v1208_v43 = vpop.permute.xlu1 %1207  ;;  %v1248_v7 = vpop.permute.xlu0 %1247 }
 0x21d   : > { %v1212_v12 = vadd.f32 %v1208_v43, %v3284_v18  ;;  %v1253_v13 = vadd.f32 %v1248_v7, %v1239_v3  ;;  %v1767_v3 = vmul.f32 %v1766_v60, %v3369_v42  ;;  %v3402_v7 = vld [vmem:[#allocation4 + $0x25] sm:$0xff] }
 0x21e   : > { %1695 = vrot.lane.b32.xlu1 %v1690_v44, %s2439_s6  ;;  %1629 = vrot.lane.b32.xlu0 %v1625_v8, %s2441_s30  ;;  %v1858_v44 = vstv %s3381_s17  ;;  %v1754_v8 = vmul.f32 %v1752_v45, %v3402_v7  ;;  %s2191_s17 = sshll.u32 %s2414_s12, 8  ;;  %s2443_s12 = smov [#allocation10]  }
 0x220   : > { %v1222_v20 = vpop.permute.xlu1 %1221  ;;  %v1262_v51 = vpop.permute.xlu0 %1261 }
 0x221   : > { %v1226_v32 = vadd.f32 %v1222_v20, %v1212_v12  ;;  %v1267_v23 = vadd.f32 %v1262_v51, %v1253_v13  ;;  %v1859_v12 = vmul.f32 %v1858_v44, %v3378_v24  ;;  %v3411_v20 = vld [vmem:[#allocation4 + $0x26] sm:$0xff]  ;;  %v1780_v51 = vstv %s3388_s21  ;;  %s1962_s21 = sshll.u32 %s187_s4, 4  ;;  %s3508_s21 = int_to_ptr.vmem [resolvable:$true] %s1962_s21 }
 0x222   : > { %1617 = vrot.lane.b32.xlu1 %v1612_v19, %s2440_s19  ;;  %1721 = vrot.lane.b32.xlu0 %v1717_v21, %s2441_s30  ;;  %v1470_v19 = vstv %s3392_s3  ;;  %v1781_v26 = vmul.f32 %v1780_v51, %v3369_v42 }
 0x223   : > { %v1471_v28 = vmul.f32 %v1470_v19, %v3183_v49 }
 0x224   : > { %v1236_v18 = vpop.permute.xlu1 %1235  ;;  %v1276_v27 = vpop.permute.xlu0 %1275 }
 0x225   : > { %v1240_v41 = vadd.f32 %v1236_v18, %v1226_v32  ;;  %v1281_v30 = vadd.f32 %v1276_v27, %v1267_v23  ;;  %v1846_v23 = vmul.f32 %v1844_v53, %v3411_v20  ;;  %v1378_v18 = vstv %s3400_s7 }
 0x226   : > { %1709 = vrot.lane.b32.xlu1 %v1704_v52, %s2440_s19  ;;  %1643 = vrot.lane.b32.xlu0 %v1639_v63, %s2442_s25  ;;  %v1872_v63 = vstv %s3405_s16  ;;  %s3506_s16 = scalar_lea.hbm %s3559_s2, %s2191_s17 }
 0x227   : > { %v3364_v33 = vadd.f32 %v1281_v30, %v3306_v39 }
 0x228   : > { %v1250_v35 = vpop.permute.xlu1 %1249  ;;  %v1298_v36 = vpop.permute.xlu0 %1297 }
 0x229   : > { %v1254_v31 = vadd.f32 %v1250_v35, %v1240_v41  ;;  %v1303_v17 = vadd.f32 %v1298_v36, %v1287_v6  ;;  %v1379_v41 = vmul.f32 %v1378_v18, %v3145_v15  ;;  %v1768_v35 = vmul.f32 %v1766_v60, %v3402_v7 }
 0x22a   : > { %1631 = vrot.lane.b32.xlu1 %v1626_v37, %s2441_s30  ;;  %1735 = vrot.lane.b32.xlu0 %v1731_v38, %s2442_s25  ;;  %v1873_v36 = vmul.f32 %v1872_v63, %v3378_v24 }
 0x22c   : > { %v1264_v39 = vpop.permute.xlu1 %1263  ;;  %v1312_v25 = vpop.permute.xlu0 %1311 }
 0x22d   : > { %v1268_v48 = vadd.f32 %v1264_v39, %v1254_v31  ;;  %v1317_v9 = vadd.f32 %v1312_v25, %v1303_v17  ;;  %v1794_v31 = vstv %s3414_s8  ;;  %v1860_v17 = vmul.f32 %v1858_v44, %v3411_v20  ;;  %s1949_s8 = scalar_lea.sflag [#allocation7], %s2626_s18 }
 0x22e   : > { %1723 = vrot.lane.b32.xlu1 %v1718_v46, %s2441_s30  ;;  %1757 = vrot.lane.b32.xlu0 %v1753_v47, %s2437_s28  ;;  %v1795_v45 = vmul.f32 %v1794_v31, %v3369_v42  ;;  %v1886_v46 = vstv %s3423_s24  ;;  %s2336_s24 = scalar_lea.vmem %s3508_s21, 256 }
 0x22f   : > { %v1887_v53 = vmul.f32 %v1886_v46, %v3378_v24  ;;  %p2337_p4 = scmp.ne.s32.totalorder %s3508_s21, %s2336_s24 }
 0x230   : > { %v1278_v22 = vpop.permute.xlu1 %1277  ;;  %v1326_v10 = vpop.permute.xlu0 %1325 }
 0x231   : > { %v1282_v57 = vadd.f32 %v1278_v22, %v1268_v48  ;;  %v1331_v58 = vadd.f32 %v1326_v10, %v1317_v9  ;;  %v1782_v9 = vmul.f32 %v1780_v51, %v3402_v7  ;;  %p2338_p2 = pnand %p2337_p4, %p3578_p8 }
 0x232   : > { %1645 = vrot.lane.b32.xlu1 %v1640_v55, %s2442_s25  ;;  %1849 = vrot.lane.b32.xlu0 %v1845_v56, %s2437_s28  ;;  %v1808_v55 = vstv %s3432_s23  ;;  %v1472_v56 = vmul.f32 %v1470_v19, %v3211_v14  ;;  %s2340_s23 = sshll.u32 %s2443_s12, 4  ;;  %s2341_s23 = int_to_ptr.vmem [resolvable:$false] %s2340_s23 }
 0x233   : > { %v3395_v54 = vadd.f32 %v1282_v57, %v3331_v2  ;;  %v1380_v57 = vmul.f32 %v1378_v18, %v3174_v40  ;;  %v1810_v18 = vmul.f32 %v1808_v55, %v3402_v7  ;;  %p2339_p12 = pneg %p2338_p2  ;;  %p2343_p0 = scmp.lt.s32.totalorder %s3508_s21, %s2341_s23 }
 0x234   : > { %v1300_v34 = vpop.permute.xlu1 %1299  ;;  %v1340_v61 = vpop.permute.xlu0 %1339 }
 0x235   : > { %v1304_v5 = vadd.f32 %v1300_v34, %v1288_v29  ;;  %v1345_v43 = vadd.f32 %v1340_v61, %v1331_v58  ;;  %v1874_v34 = vmul.f32 %v1872_v63, %v3411_v20  ;;  %v1809_v61 = vmul.f32 %v1808_v55, %v3369_v42 }
 0x236   : > { %1737 = vrot.lane.b32.xlu1 %v1732_v1, %s2442_s25  ;;  %1771 = vrot.lane.b32.xlu0 %v1767_v3, %s2438_s5 }
 0x238   : > { %v1314_v50 = vpop.permute.xlu1 %1313  ;;  %v1354_v2 = vpop.permute.xlu0 %1353 }
 0x239   : > { %v1318_v13 = vadd.f32 %v1314_v50, %v1304_v5  ;;  %v1359_v16 = vadd.f32 %v1354_v2, %v1345_v43  ;;  %v1796_v43 = vmul.f32 %v1794_v31, %v3402_v7 }
 0x23a   : > { %1759 = vrot.lane.b32.xlu1 %v1754_v8, %s2437_s28  ;;  %1863 = vrot.lane.b32.xlu0 %v1859_v12, %s2438_s5  ;;  %v1822_v8 = vstv %s3446_s27 }
 0x23b   : > { %v1823_v51 = vmul.f32 %v1822_v8, %v3369_v42 }
 0x23c   : > { %v1328_v21 = vpop.permute.xlu1 %1327  ;;  %v1368_v32 = vpop.permute.xlu0 %1367 }
 0x23d   : > { %v1332_v27 = vadd.f32 %v1328_v21, %v1318_v13  ;;  %v1373_v52 = vadd.f32 %v1368_v32, %v1359_v16  ;;  %v1888_v16 = vmul.f32 %v1886_v46, %v3411_v20 }
 0x23e   : > { %1851 = vrot.lane.b32.xlu1 %v1846_v23, %s2437_s28  ;;  %1785 = vrot.lane.b32.xlu0 %v1781_v26, %s2439_s6  ;;  %s3439_s28 = sld [smem:[#allocation5 + $0x60]] }
 0x23f   : > { %v1473_v30 = vadd.f32 %v1471_v28, %v1373_v52 }
 0x240   : > { %v1342_v11 = vpop.permute.xlu1 %1341  ;;  %v1390_v6 = vpop.permute.xlu0 %1389 }
 0x241   : > { %v1346_v37 = vadd.f32 %v1342_v11, %v1332_v27  ;;  %v1395_v38 = vadd.f32 %v1390_v6, %v1379_v41 }
 0x242   : > { %1773 = vrot.lane.b32.xlu1 %v1768_v35, %s2438_s5  ;;  %1877 = vrot.lane.b32.xlu0 %v1873_v36, %s2439_s6 }
 0x244   : > { %v1356_v49 = vpop.permute.xlu1 %1355  ;;  %v1404_v15 = vpop.permute.xlu0 %1403  ;;  %v1900_v5 = vstv %s3439_s28  ;;  %s2342_s28 = scalar_lea.vmem %s2341_s23, 512 }
 0x245   : > { %v1360_v39 = vadd.f32 %v1356_v49, %v1346_v37  ;;  %v1409_v25 = vadd.f32 %v1404_v15, %v1395_v38  ;;  %v1901_v44 = vmul.f32 %v1900_v5, %v3378_v24  ;;  %v1824_v37 = vmul.f32 %v1822_v8, %v3402_v7  ;;  %p2344_p3 = scmp.lt.s32.totalorder %s2342_s28, %s2336_s24 }
 0x246   : > { %1865 = vrot.lane.b32.xlu1 %v1860_v17, %s2438_s5  ;;  %1799 = vrot.lane.b32.xlu0 %v1795_v45, %s2440_s19  ;;  %s3455_s5 = sld [smem:[#allocation5 + $0x61]] }
 0x247   : > { %p2345_p5 = por %p2344_p3, %p2343_p0 }
 0x248   : > { %v1370_v47 = vpop.permute.xlu1 %1369  ;;  %v1418_v48 = vpop.permute.xlu0 %1417 }
 0x249   : > { %v1374_v22 = vadd.f32 %v1370_v47, %v1360_v39  ;;  %v1423_v10 = vadd.f32 %v1418_v48, %v1409_v25  ;;  %p2346_p11 = pnand %p2345_p5, %p2339_p12 }
 0x24a   : > { %1787 = vrot.lane.b32.xlu1 %v1782_v9, %s2439_s6  ;;  %1891 = vrot.lane.b32.xlu0 %v1887_v53, %s2440_s19 }
 0x24b   : > { %v1474_v58 = vadd.f32 %v1472_v56, %v1374_v22 }
 0x24c   : > { %v1392_v60 = vpop.permute.xlu1 %1391  ;;  %v1432_v29 = vpop.permute.xlu0 %1431  ;;  %v1914_v32 = vstv %s3455_s5 }
 0x24d   : > { %v1396_v1 = vadd.f32 %v1392_v60, %v1380_v57  ;;  %v1437_v3 = vadd.f32 %v1432_v29, %v1423_v10  ;;  %v1915_v27 = vmul.f32 %v1914_v32, %v3378_v24  ;;  %v1916_v17 = vmul.f32 %v1914_v32, %v3411_v20 }
 0x24e   : > { %1879 = vrot.lane.b32.xlu1 %v1874_v34, %s2439_s6  ;;  %1813 = vrot.lane.b32.xlu0 %v1809_v61, %s2441_s30  ;;  %s3475_s6 = sld [smem:[#allocation5 + $0x46]] }
 0x250   : > { %v1406_v14 = vpop.permute.xlu1 %1405  ;;  %v1482_v40 = vpop.permute.xlu0 %1481 }
 0x251   : > { %v1410_v50 = vadd.f32 %v1406_v14, %v1396_v1  ;;  %v1487_v2 = vadd.f32 %v1482_v40, %v1473_v30  ;;  %v1902_v30 = vmul.f32 %v1900_v5, %v3411_v20 }
 0x252   : > { %1801 = vrot.lane.b32.xlu1 %v1796_v43, %s2440_s19  ;;  %1905 = vrot.lane.b32.xlu0 %v1901_v44, %s2441_s30 }
 0x254   : > { %v1420_v12 = vpop.permute.xlu1 %1419  ;;  %v1496_v13 = vpop.permute.xlu0 %1495  ;;  %v1562_v25 = vstv %s3475_s6 }
 0x255   : > { %v1424_v19 = vadd.f32 %v1420_v12, %v1410_v50  ;;  %v1501_v21 = vadd.f32 %v1496_v13, %v1487_v2  ;;  %v1563_v53 = vmul.f32 %v1562_v25, %v3259_v59  ;;  %v1564_v44 = vmul.f32 %v1562_v25, %v3288_v62 }
 0x256   : > { %1893 = vrot.lane.b32.xlu1 %v1888_v16, %s2440_s19  ;;  %1827 = vrot.lane.b32.xlu0 %v1823_v51, %s2442_s25  ;;  %s3479_s19 = sld [smem:[#allocation5 + $0x4d]] }
 0x258   : > { %v1434_v23 = vpop.permute.xlu1 %1433  ;;  %v1510_v26 = vpop.permute.xlu0 %1509 }
 0x259   : > { %v1438_v52 = vadd.f32 %v1434_v23, %v1424_v19  ;;  %v1515_v63 = vadd.f32 %v1510_v26, %v1501_v21 }
 0x25a   : > { %1815 = vrot.lane.b32.xlu1 %v1810_v18, %s2441_s30  ;;  %1919 = vrot.lane.b32.xlu0 %v1915_v27, %s2442_s25 }
 0x25c   : > { %v1484_v28 = vpop.permute.xlu1 %1483  ;;  %v1524_v41 = vpop.permute.xlu0 %1523  ;;  %v1654_v22 = vstv %s3479_s19 }
 0x25d   : > { %v1488_v11 = vadd.f32 %v1484_v28, %v1474_v58  ;;  %v1529_v6 = vadd.f32 %v1524_v41, %v1515_v63  ;;  %v1655_v60 = vmul.f32 %v1654_v22, %v3268_v4  ;;  %v1656_v12 = vmul.f32 %v1654_v22, %v3297_v0 }
 0x25e   : > { %1907 = vrot.lane.b32.xlu1 %v1902_v30, %s2441_s30  ;;  %s3489_s30 = sld [smem:[#allocation5 + $0x54]] }
 0x260   : > { %v1498_v35 = vpop.permute.xlu1 %1497  ;;  %v1446_v36 = vpop.permute.xlu0 %1445 }
 0x261   : > { %v1502_v38 = vadd.f32 %v1498_v35, %v1488_v11  ;;  %v1451_v31 = vadd.f32 %v1446_v36, %v1437_v3 }
 0x262   : > { %1829 = vrot.lane.b32.xlu1 %v1824_v37, %s2442_s25 }
 0x264   : > { %v1512_v49 = vpop.permute.xlu1 %1511  ;;  %v1538_v15 = vpop.permute.xlu0 %1537  ;;  %v1746_v36 = vstv %s3489_s30 }
 0x265   : > { %v1516_v45 = vadd.f32 %v1512_v49, %v1502_v38  ;;  %v1543_v39 = vadd.f32 %v1538_v15, %v1529_v6 }
 0x266   : > { %1921 = vrot.lane.b32.xlu1 %v1916_v17, %s2442_s25  ;;  %s3491_s25 = sld [smem:[#allocation5 + $0x5b]] }
 0x268   : > { %v1526_v46 = vpop.permute.xlu1 %1525  ;;  %v1460_v47 = vpop.permute.xlu0 %1459 }
 0x269   : > { %v1530_v48 = vadd.f32 %v1526_v46, %v1516_v45  ;;  %v1465_v9 = vadd.f32 %v1460_v47, %v1451_v31  ;;  %v1747_v45 = vmul.f32 %v1746_v36, %v3369_v42 }
 0x26b   : > { %v1565_v10 = vadd.f32 %v1563_v53, %v1465_v9 }
 0x26c   : > { %v1448_v55 = vpop.permute.xlu1 %1447  ;;  %v1552_v56 = vpop.permute.xlu0 %1551 }
 0x26d   : > { %v1452_v57 = vadd.f32 %v1448_v55, %v1438_v52  ;;  %v1557_v58 = vadd.f32 %v1552_v56, %v1543_v39  ;;  %v1838_v39 = vstv %s3491_s25 }
 0x26e   : > { %v1839_v22 = vmul.f32 %v1838_v39, %v3378_v24  ;;  %v1840_v24 = vmul.f32 %v1838_v39, %v3411_v20 }
 0x26f   : > { %v1657_v29 = vadd.f32 %v1655_v60, %v1557_v58 }
 0x270   : > { %v1540_v34 = vpop.permute.xlu1 %1539  ;;  %v1574_v61 = vpop.permute.xlu0 %1573 }
 0x271   : > { %v1544_v1 = vadd.f32 %v1540_v34, %v1530_v48  ;;  %v1579_v3 = vadd.f32 %v1574_v61, %v1565_v10 }
 0x274   : > { %v1462_v5 = vpop.permute.xlu1 %1461  ;;  %v1666_v14 = vpop.permute.xlu0 %1665 }
 0x275   : > { %v1466_v40 = vadd.f32 %v1462_v5, %v1452_v57  ;;  %v1671_v43 = vadd.f32 %v1666_v14, %v1657_v29  ;;  %v1748_v5 = vmul.f32 %v1746_v36, %v3402_v7 }
 0x277   : > { %v1566_v59 = vadd.f32 %v1564_v44, %v1466_v40 }
 0x278   : > { %v1554_v50 = vpop.permute.xlu1 %1553  ;;  %v1588_v2 = vpop.permute.xlu0 %1587 }
 0x279   : > { %v1558_v8 = vadd.f32 %v1554_v50, %v1544_v1  ;;  %v1593_v41 = vadd.f32 %v1588_v2, %v1579_v3 }
 0x27b   : > { %v1658_v13 = vadd.f32 %v1656_v12, %v1558_v8 }
 0x27c   : > { %v1576_v16 = vpop.permute.xlu1 %1575  ;;  %v1680_v4 = vpop.permute.xlu0 %1679 }
 0x27d   : > { %v1580_v51 = vadd.f32 %v1576_v16, %v1566_v59  ;;  %v1685_v6 = vadd.f32 %v1680_v4, %v1671_v43 }
 0x280   : > { %v1668_v19 = vpop.permute.xlu1 %1667  ;;  %v1602_v21 = vpop.permute.xlu0 %1601 }
 0x281   : > { %v1672_v32 = vadd.f32 %v1668_v19, %v1658_v13  ;;  %v1607_v0 = vadd.f32 %v1602_v21, %v1593_v41 }
 0x284   : > { %v1590_v23 = vpop.permute.xlu1 %1589  ;;  %v1694_v26 = vpop.permute.xlu0 %1693 }
 0x285   : > { %v1699_v37 = vadd.f32 %v1694_v26, %v1685_v6  ;;  %v1594_v9 = vadd.f32 %v1590_v23, %v1580_v51 }
 0x288   : > { %v1682_v18 = vpop.permute.xlu1 %1681  ;;  %v1616_v27 = vpop.permute.xlu0 %1615 }
 0x289   : > { %v1621_v35 = vadd.f32 %v1616_v27, %v1607_v0  ;;  %v1686_v58 = vadd.f32 %v1682_v18, %v1672_v32 }
 0x28c   : > { %v1604_v52 = vpop.permute.xlu1 %1603  ;;  %v1708_v63 = vpop.permute.xlu0 %1707 }
 0x28d   : > { %v1713_v15 = vadd.f32 %v1708_v63, %v1699_v37  ;;  %v1608_v10 = vadd.f32 %v1604_v52, %v1594_v9 }
 0x290   : > { %v1696_v62 = vpop.permute.xlu1 %1695  ;;  %v1630_v28 = vpop.permute.xlu0 %1629 }
 0x291   : > { %v1635_v38 = vadd.f32 %v1630_v28, %v1621_v35  ;;  %v1700_v29 = vadd.f32 %v1696_v62, %v1686_v58 }
 0x294   : > { %v1618_v30 = vpop.permute.xlu1 %1617  ;;  %v1722_v11 = vpop.permute.xlu0 %1721 }
 0x295   : > { %v1727_v25 = vadd.f32 %v1722_v11, %v1713_v15  ;;  %v1622_v60 = vadd.f32 %v1618_v30, %v1608_v10 }
 0x298   : > { %v1710_v31 = vpop.permute.xlu1 %1709  ;;  %v1644_v49 = vpop.permute.xlu0 %1643 }
 0x299   : > { %v1649_v17 = vadd.f32 %v1644_v49, %v1635_v38  ;;  %v1714_v42 = vadd.f32 %v1710_v31, %v1700_v29 }
 0x29b   : > { %v1749_v46 = vadd.f32 %v1747_v45, %v1649_v17 }
 0x29c   : > { %v1632_v47 = vpop.permute.xlu1 %1631  ;;  %v1736_v48 = vpop.permute.xlu0 %1735 }
 0x29d   : > { %v1741_v53 = vadd.f32 %v1736_v48, %v1727_v25  ;;  %v1636_v34 = vadd.f32 %v1632_v47, %v1622_v60 }
 0x29f   : > { %v1841_v55 = vadd.f32 %v1839_v22, %v1741_v53 }
 0x2a0   : > { %v1724_v56 = vpop.permute.xlu1 %1723  ;;  %v1758_v57 = vpop.permute.xlu0 %1757 }
 0x2a1   : > { %v1728_v14 = vadd.f32 %v1724_v56, %v1714_v42  ;;  %v1763_v26 = vadd.f32 %v1758_v57, %v1749_v46 }
 0x2a4   : > { %v1646_v61 = vpop.permute.xlu1 %1645  ;;  %v1850_v1 = vpop.permute.xlu0 %1849 }
 0x2a5   : > { %v1650_v3 = vadd.f32 %v1646_v61, %v1636_v34  ;;  %v1855_v18 = vadd.f32 %v1850_v1, %v1841_v55 }
 0x2a7   : > { %v1750_v40 = vadd.f32 %v1748_v5, %v1650_v3 }
 0x2a8   : > { %v1738_v43 = vpop.permute.xlu1 %1737  ;;  %v1772_v44 = vpop.permute.xlu0 %1771 }
 0x2a9   : > { %v1742_v59 = vadd.f32 %v1738_v43, %v1728_v14  ;;  %v1777_v63 = vadd.f32 %v1772_v44, %v1763_v26 }
 0x2ab   : > { %v1842_v50 = vadd.f32 %v1840_v24, %v1742_v59 }
 0x2ac   : > { %v1760_v2 = vpop.permute.xlu1 %1759  ;;  %v1864_v8 = vpop.permute.xlu0 %1863 }
 0x2ad   : > { %v1869_v62 = vadd.f32 %v1864_v8, %v1855_v18  ;;  %v1764_v49 = vadd.f32 %v1760_v2, %v1750_v40 }
 0x2b0   : > { %v1852_v12 = vpop.permute.xlu1 %1851  ;;  %v1786_v13 = vpop.permute.xlu0 %1785 }
 0x2b1   : > { %v1791_v20 = vadd.f32 %v1786_v13, %v1777_v63  ;;  %v1856_v15 = vadd.f32 %v1852_v12, %v1842_v50 }
 0x2b4   : > { %v1774_v16 = vpop.permute.xlu1 %1773  ;;  %v1878_v4 = vpop.permute.xlu0 %1877 }
 0x2b5   : > { %v1883_v28 = vadd.f32 %v1878_v4, %v1869_v62  ;;  %v1778_v39 = vadd.f32 %v1774_v16, %v1764_v49 }
 0x2b8   : > { %v1866_v51 = vpop.permute.xlu1 %1865  ;;  %v1800_v19 = vpop.permute.xlu0 %1799 }
 0x2b9   : > { %v1805_v30 = vadd.f32 %v1800_v19, %v1791_v20  ;;  %v1870_v25 = vadd.f32 %v1866_v51, %v1856_v15 }
 0x2bc   : > { %v1788_v21 = vpop.permute.xlu1 %1787  ;;  %v1892_v32 = vpop.permute.xlu0 %1891 }
 0x2bd   : > { %v1897_v11 = vadd.f32 %v1892_v32, %v1883_v28  ;;  %v1792_v47 = vadd.f32 %v1788_v21, %v1778_v39 }
 0x2c0   : > { %v1880_v23 = vpop.permute.xlu1 %1879  ;;  %v1814_v7 = vpop.permute.xlu0 %1813 }
 0x2c1   : > { %v1819_v6 = vadd.f32 %v1814_v7, %v1805_v30  ;;  %v1884_v48 = vadd.f32 %v1880_v23, %v1870_v25 }
 0x2c4   : > { %v1802_v27 = vpop.permute.xlu1 %1801  ;;  %v1906_v52 = vpop.permute.xlu0 %1905 }
 0x2c5   : > { %v1911_v35 = vadd.f32 %v1906_v52, %v1897_v11  ;;  %v1806_v22 = vadd.f32 %v1802_v27, %v1792_v47 }
 0x2c8   : > { %v1894_v41 = vpop.permute.xlu1 %1893  ;;  %v1828_v0 = vpop.permute.xlu0 %1827 }
 0x2c9   : > { %v1833_v38 = vadd.f32 %v1828_v0, %v1819_v6  ;;  %v1898_v10 = vadd.f32 %v1894_v41, %v1884_v48 }
 0x2cc   : > { %v1816_v36 = vpop.permute.xlu1 %1815  ;;  %v1920_v37 = vpop.permute.xlu0 %1919 }
 0x2cd   : > { %v1925_v31 = vadd.f32 %v1920_v37, %v1911_v35  ;;  %v1820_v55 = vadd.f32 %v1816_v36, %v1806_v22 }
 0x2cf   : > { %v1929_v17 = vadd.f32 %v1925_v31, %v1833_v38 }
 0x2d0   : > { %v1908_v45 = vpop.permute.xlu1 %1907 }
 0x2d1   : > { %v1931_v46 = vadd.f32 %v1929_v17, %v3364_v33  ;;  %v1912_v56 = vadd.f32 %v1908_v45, %v1898_v10 }
 0x2d3   : > { %v2183_v9 = vmul.f32 -1.442695, %v1931_v46 }
 0x2d4   : > { %v1830_v53 = vpop.permute.xlu1 %1829 }
 0x2d5   : > { %2285 = vpow2.f32 %v2183_v9  ;;  %v1834_v58 = vadd.f32 %v1830_v53, %v1820_v55 }
 0x2d8   : > { %v1922_v57 = vpop.permute.xlu1 %1921 }
 0x2d9   : > { %v1926_v60 = vadd.f32 %v1922_v57, %v1912_v56 }
 0x2db   : > { %v1930_v29 = vadd.f32 %v1926_v60, %v1834_v58 }
 0x2dd   : > { %v1932_v34 = vadd.f32 %v1930_v29, %v3395_v54 }
 0x2df   : > { %v2286_v61 = vpop.eup %2285  ;;  %v2184_v1 = vmul.f32 -1.442695, %v1932_v34 }
 0x2e0   : > { %v1939_v33 = vadd.f32 1.0, %v2286_v61 }
 0x2e1   : > { %2287 = vpow2.f32 %v2184_v1 }
 0x2e2   : > { %2289 = vrcp.f32 %v1939_v33 }
 0x2eb   : > { %v2288_v42 = vpop.eup %2287 }
 0x2ec   : > { %v2290_v3 = vpop.eup %2289  ;;  %v1940_v5 = vadd.f32 1.0, %v2288_v42 }
 0x2ed   : > { %1946 = vst.msk [vmem:[%s187_s4] sm:$0xff] %vm1945_vm8, %v2290_v3 }
 0x2ee   : > { %2291 = vrcp.f32 %v1940_v5 }
 0x2f8   : > { %v2292_v54 = vpop.eup %2291 }
 0x2f9   : > { %1947 = vst.msk [vmem:[%s187_s4 + $0x8] sm:$0xff] %vm1945_vm8, %v2292_v54 }
 0x2fa   : > { %2349 = shalt.err (!%p2346_p11)
}
 0x2fb   : > { %s2350_s27 = scalar_lea.hbm %s3506_s16, 256  ;;  %s2354_s19 = scalar_lea.hbm %s3559_s2, 512 }
 0x2fc   : > { %p2351_p13 = scmp.ne.s32.totalorder %s3506_s16, %s2350_s27  ;;  %p2355_p6 = scmp.lt.u32.totalorder %s3506_s16, %s3559_s2 }
 0x2fd   : > { %p2356_p9 = scmp.lt.u32.totalorder %s2354_s19, %s2350_s27  ;;  %p2358_p4 = scmp.lt.u32.totalorder %s2350_s27, %s3506_s16 }
 0x2fe   : > { %p2352_p7 = pnand %p2351_p13, %p3578_p8 }
 0x2ff   : > { %p2357_p1 = por %p2356_p9, %p2355_p6 }
 0x300   : > { %p2353_p10 = pneg %p2352_p7 }
 0x301   : > { %p2359_p2 = por %p2358_p4, %p2357_p1 }
 0x303   : > { %p2360_p12 = pnand %p2359_p2, %p2353_p10 }
 0x305   : > { %2363 = shalt.err (!%p2360_p12)
}
 0x306   : > { %s2444_s29 = smov 128   ;;  %s2445_s4 = smov 8  }
 0x307   : > { %2198 = dma.vmem_to_hbm [thread:$0]  (%p3578_p8), %s3508_s21, 256, %s3506_s16, %s1949_s8, %s2444_s29, %s2444_s29, %s2445_s4  }
 0x308 PF: > { %s1977_s17 = sand.u32 1, %s2402_s9   ;;  %p3579_p0 = scmp.ne.s32.totalorder %s3567_s20, 0 }
 0x309   : > { %p3580_p3 = scmp.ge.s32.totalorder %s2422_s14, 2  ;;  %s1978_s3 = scalar_lea.sflag [#allocation7], %s1977_s17 }
 0x30b   : > { %p2209_p5 = pnand %p3580_p3, %p3579_p0 }
 0x30d   : > { %2397 = dma.done.wait (!%p2209_p5), %s1978_s3, 256  }
 0x30e   : > { %2399 = vsyncadd (!%p2209_p5), %s1978_s3, 4294967040  ;;  %s19_s14 = sadd.s32 1, %s2422_s14   ;;  %s3581_s9 = smov %s2406_s10 }
 0x30f   : > { %p16_p11 = scmp.ge.s32.totalorder %s19_s14, 4   ;;  %s3582_s10 = smov %s2410_s11 }
 0x310   : > { %s3583_s11 = smov %s2578_s26  ;;  %s3584_s12 = smov %s2418_s13 }
 0x311   : > { %s3585_s13 = smov %s3587_s22  ;;  %18 = sbr.rel (!%p16_p11) target bundleno = 7 (0x7), region = 87 }
 0x318   :  { %1983 = vsyncpa [#allocation6], 1 }
 0x319   :  { %1985 = vsyncpa [#allocation6 + $0x1], 1 }
 0x31a   :  { %1986 = vsyncpa [#allocation7], 1 }
 0x31b   :  { %1988 = vsyncpa [#allocation7 + $0x1], 1 }
 0x31c   :  { %1989 = vsyncpa [#allocation8], 1 }
 0x31d   :  { %1991 = vsyncpa [#allocation8 + $0x1], 1 }

</bundles_post_ra>
